<compile_context>
chip_gen: v6e
topology: v6e:2x2x1
jax: 0.10.0
libtpu: 0.0.40
codegen_flags: <defaults>
</compile_context>

<pallas_src>
import jax
import jax.numpy as jnp
from jax.experimental import pallas as pl
from jax.experimental.pallas import tpu as pltpu

MODEL_DIM = 128          # fixed by the module
T_SEQ = 120              # fixed: static_to_t2s_inputs_cond expects 120 * model_dim
VIDEO_FEAT_DIM = 256     # synthetic stand-in for config.VIDEO_FEAT_DIM
N_GROUPS = 8             # synthetic stand-in for config.N_GROUPS
LATENT_SEQ_LEN = 30
LATENT_DIM = 64
T_BLOCK = 60             # 120 / 60 = 2 reduction steps over the w2 weight stream


def _t2s_kernel(video_ref, wv_ref, w2_ref, out_ref, proj_ref):
    kt = pl.program_id(0)
    B = video_ref.shape[0]

    @pl.when(kt == 0)
    def _():
        out_ref[...] = jnp.zeros_like(out_ref)
        # One-shot bf16 video projection for all T_SEQ frames, stored time-major
        # [T, B, D] so later steps never relayout activations: B plain 2-D matmuls.
        for b in range(B):
            pb = jnp.dot(video_ref[b], wv_ref[...],
                         preferred_element_type=jnp.float32)       # [T_SEQ, D] f32
            proj_ref[:, b, :] = pb.astype(proj_ref.dtype)

    # This step's projection block, sliced statically from the resident scratch.
    t0 = pl.multiple_of(kt * T_BLOCK, T_BLOCK)
    proj_blk = proj_ref[pl.ds(t0, T_BLOCK)]                        # [T_BLOCK, B, D] bf16

    # Time-batched contraction: for each t, [B, D] @ [D, D]; no [B, Tt*D] flatten.
    # The MXU consumes w2 rows straight from their natural sublane layout; the f32
    # partials reduce over the (leading) time axis on the VPU, off the MXU slot.
    partial = jnp.einsum("tbd,tde->tbe", proj_blk, w2_ref[...],
                         preferred_element_type=jnp.float32)       # [T_BLOCK, B, D] f32
    out_ref[...] += jnp.sum(partial, axis=0)


def prepare_t2s_params(params):
    """One-time derived weights: bf16 streaming copies + the time-summed w2 fold."""
    p = dict(params)
    w2_tdd = params["w2"].reshape(T_SEQ, MODEL_DIM, MODEL_DIM)
    p["wv_bf16"] = params["wv"].astype(jnp.bfloat16)                # [V, D]
    p["w2_bf16"] = w2_tdd.astype(jnp.bfloat16)                      # [T, D, D]
    p["w2_sum"] = w2_tdd.sum(0)                                     # [D, D] f32
    return p


def t2s_emotion_inputs_cond(params, video, event_type, va_values, group_label):
    B = video.shape[0]
    D = MODEL_DIM
    num_kt = T_SEQ // T_BLOCK

    # Grid-invariant per-batch conditioning (tiny K=2 matmuls + embedding gather):
    # computed once in XLA.  Folded algebraically through the big linear:
    #   sum_t (cond + bv) @ w2[t] == (cond + bv) @ W2_sum, added after the kernel.
    cond_bv = (event_type @ params["we"] + params["be"]
               + va_values @ params["wa"] + params["ba"]
               + params["egrp"][group_label]
               + params["bv"])                                      # [B, D]
    final_add = cond_bv @ params["w2_sum"] + params["b2"]           # [B, D] f32

    video_bf16 = video.astype(jnp.bfloat16)

    acc = pl.pallas_call(
        _t2s_kernel,
        out_shape=jax.ShapeDtypeStruct((B, D), jnp.float32),
        grid=(num_kt,),
        in_specs=[
            # Full video array, constant index map -> DMA'd once, stays resident.
            pl.BlockSpec((B, T_SEQ, VIDEO_FEAT_DIM), lambda kt: (0, 0, 0)),
            # wv resident.
            pl.BlockSpec((VIDEO_FEAT_DIM, D), lambda kt: (0, 0)),
            # bf16 w2 slab for this time block: the only per-step stream.
            pl.BlockSpec((T_BLOCK, D, D), lambda kt: (kt, 0, 0)),
        ],
        out_specs=pl.BlockSpec((B, D), lambda kt: (0, 0)),          # resident accumulator
        scratch_shapes=[pltpu.VMEM((T_SEQ, B, D), jnp.bfloat16)],   # hoisted projection
        compiler_params=pltpu.CompilerParams(dimension_semantics=("arbitrary",)),
    )(video_bf16, params["wv_bf16"], params["w2_bf16"])

    return acc + final_add


def t2s_emotion_forward(params, batch):
    """Mirrors T2S_Emotion.forward: returns (true_emo_seq, inputs_cond)."""
    video = batch["video_features"]
    event_type = batch["event_type"]
    va_values = batch["va_values"]
    group_label = batch["group_label"]
    true_emo_seq = batch.get("true_emo_seq", None)

    inputs_cond = t2s_emotion_inputs_cond(
        params, video, event_type, va_values, group_label)
    # TODO(synk): self.model (DiT denoiser) and the vqvae encoder are constructed in
    # __init__ but never used in forward(); they are intentionally omitted.
    return true_emo_seq, inputs_cond


def init_params(key):
    ks = jax.random.split(key, 10)

    def lin(k, fan_in, shape):
        bound = 1.0 / jnp.sqrt(fan_in)
        return jax.random.uniform(k, shape, jnp.float32, -bound, bound)

    D = MODEL_DIM
    return {
        "wv": lin(ks[0], VIDEO_FEAT_DIM, (VIDEO_FEAT_DIM, D)),
        "bv": lin(ks[1], VIDEO_FEAT_DIM, (1, D)),
        "we": lin(ks[2], 2, (2, D)),
        "be": lin(ks[3], 2, (1, D)),
        "wa": lin(ks[4], 2, (2, D)),
        "ba": lin(ks[5], 2, (1, D)),
        "egrp": jax.random.normal(ks[6], (N_GROUPS, D), jnp.float32),
        "w2": lin(ks[7], T_SEQ * D, (T_SEQ * D, D)),
        "b2": lin(ks[8], T_SEQ * D, (1, D)),
    }


def reference_forward(params, batch):
    """Pure-JAX f32 reference matching the PyTorch module semantics."""
    video = batch["video_features"]
    event = batch["event_type"]
    va = batch["va_values"]
    group = batch["group_label"]
    B = video.shape[0]
    stim = jnp.einsum("btv,vd->btd", video, params["wv"]) + params["bv"]
    cond = (event @ params["we"] + params["be"]
            + va @ params["wa"] + params["ba"]
            + params["egrp"][group])
    ctx = stim + cond[:, None, :]
    return ctx.reshape(B, -1) @ params["w2"] + params["b2"]


if __name__ == "__main__":
    key = jax.random.PRNGKey(0)
    kp, kv, ke, ka, kg, ks = jax.random.split(key, 6)
    raw_params = init_params(kp)
    params = prepare_t2s_params(raw_params)

    B = 2
    batch = {
        "video_features": jax.random.normal(kv, (B, T_SEQ, VIDEO_FEAT_DIM), jnp.float32),
        "event_type": jax.random.normal(ke, (B, 2), jnp.float32),
        "va_values": jax.random.normal(ka, (B, 2), jnp.float32),
        "group_label": jax.random.randint(kg, (B,), 0, N_GROUPS),
        "true_emo_seq": jax.random.normal(ks, (B, LATENT_SEQ_LEN, LATENT_DIM), jnp.float32),
    }

    true_emo, inputs_cond = t2s_emotion_forward(params, batch)
    inputs_cond = jax.block_until_ready(inputs_cond)

    ref = reference_forward(raw_params, batch)
    assert inputs_cond.shape == (B, MODEL_DIM)
    # Tolerance loosened vs a pure-f32 kernel: video/wv/w2 are streamed & multiplied in
    # bf16 with f32 accumulation (K = 15360 for the big contraction).
    err = float(jnp.max(jnp.abs(inputs_cond - ref)))
    assert jnp.allclose(inputs_cond, ref, atol=2e-2, rtol=2e-2), err
    print("KERNEL_OK")
</pallas_src>

<mosaic_0001>
module attributes {stable_mosaic.version = 11 : i64} {
  func.func @_t2s_kernel(%arg0: i32, %arg1: memref<2x120x256xbf16, #tpu.memory_space<vmem>>, %arg2: memref<256x128xbf16, #tpu.memory_space<vmem>>, %arg3: memref<60x128x128xbf16, #tpu.memory_space<vmem>>, %arg4: memref<2x128xf32, #tpu.memory_space<vmem>>, %arg5: memref<120x2x128xbf16, #tpu.memory_space<vmem>>) attributes {dimension_semantics = [#tpu.dimension_semantics<arbitrary>], iteration_bounds = array<i64: 2>, scalar_prefetch = 0 : i64, scratch_operands = 1 : i64, tpu.core_type = #tpu.core_type<tc>, window_params = [{pipeline_mode = #tpu.pipeline_mode<synchronous>, transform_indices = @transform_0, window_bounds = array<i64: 2, 120, 256>}, {pipeline_mode = #tpu.pipeline_mode<synchronous>, transform_indices = @transform_1, window_bounds = array<i64: 256, 128>}, {transform_indices = @transform_2, window_bounds = array<i64: 60, 128, 128>}, {pipeline_mode = #tpu.pipeline_mode<synchronous>, transform_indices = @transform_3, window_bounds = array<i64: 2, 128>}]} {
    %c0_i32 = arith.constant 0 : i32
    %0 = arith.cmpi eq, %arg0, %c0_i32 : i32
    %1 = arith.extui %0 : i1 to i32
    %c0_i32_0 = arith.constant 0 : i32
    %2 = arith.cmpi ne, %1, %c0_i32_0 : i32
    scf.if %2 {
      %cst_10 = arith.constant 0.000000e+00 : f32
      %13 = vector.broadcast %cst_10 : f32 to vector<2x128xf32>
      %c0_11 = arith.constant 0 : index
      %c0_12 = arith.constant 0 : index
      %14 = vector.load %arg4[%c0_11, %c0_12] : memref<2x128xf32, #tpu.memory_space<vmem>>, vector<2x128xf32>
      tpu.vector_store %arg4[%c0_11, %c0_12], %13 {strides = array<i32>} : memref<2x128xf32, #tpu.memory_space<vmem>>, vector<2x128xf32>,
      %c0_13 = arith.constant 0 : index
      %c0_14 = arith.constant 0 : index
      %c0_15 = arith.constant 0 : index
      %15 = vector.load %arg1[%c0_13, %c0_14, %c0_15] : memref<2x120x256xbf16, #tpu.memory_space<vmem>>, vector<1x120x256xbf16>
      %16 = vector.shape_cast %15 : vector<1x120x256xbf16> to vector<120x256xbf16>
      %c0_16 = arith.constant 0 : index
      %c0_17 = arith.constant 0 : index
      %17 = vector.load %arg2[%c0_16, %c0_17] : memref<256x128xbf16, #tpu.memory_space<vmem>>, vector<256x128xbf16>
      %cst_18 = arith.constant dense<0.000000e+00> : vector<120x128xf32>
      %18 = tpu.matmul %16, %17, %cst_18 {dimension_numbers = #tpu.dot_dimension_numbers<[1], [0], [0], [1], [0, 0, 1, 1], [], []>} : vector<120x256xbf16>, vector<256x128xbf16>, vector<120x128xf32> -> vector<120x128xf32>
      %19 = arith.truncf %18 : vector<120x128xf32> to vector<120x128xbf16>
      %c0_19 = arith.constant 0 : index
      %c0_20 = arith.constant 0 : index
      %c0_21 = arith.constant 0 : index
      %20 = vector.load %arg5[%c0_19, %c0_20, %c0_21] : memref<120x2x128xbf16, #tpu.memory_space<vmem>>, vector<120x1x128xbf16>
      %21 = vector.shape_cast %20 : vector<120x1x128xbf16> to vector<120x128xbf16>
      %22 = vector.shape_cast %19 : vector<120x128xbf16> to vector<120x1x128xbf16>
      tpu.vector_store %arg5[%c0_19, %c0_20, %c0_21], %22 {strides = array<i32>} : memref<120x2x128xbf16, #tpu.memory_space<vmem>>, vector<120x1x128xbf16>,
      %c1 = arith.constant 1 : index
      %c0_22 = arith.constant 0 : index
      %c0_23 = arith.constant 0 : index
      %23 = vector.load %arg1[%c1, %c0_22, %c0_23] : memref<2x120x256xbf16, #tpu.memory_space<vmem>>, vector<1x120x256xbf16>
      %24 = vector.shape_cast %23 : vector<1x120x256xbf16> to vector<120x256xbf16>
      %c0_24 = arith.constant 0 : index
      %c0_25 = arith.constant 0 : index
      %25 = vector.load %arg2[%c0_24, %c0_25] : memref<256x128xbf16, #tpu.memory_space<vmem>>, vector<256x128xbf16>
      %cst_26 = arith.constant dense<0.000000e+00> : vector<120x128xf32>
      %26 = tpu.matmul %24, %25, %cst_26 {dimension_numbers = #tpu.dot_dimension_numbers<[1], [0], [0], [1], [0, 0, 1, 1], [], []>} : vector<120x256xbf16>, vector<256x128xbf16>, vector<120x128xf32> -> vector<120x128xf32>
      %27 = arith.truncf %26 : vector<120x128xf32> to vector<120x128xbf16>
      %c0_27 = arith.constant 0 : index
      %c1_28 = arith.constant 1 : index
      %c0_29 = arith.constant 0 : index
      %28 = vector.load %arg5[%c0_27, %c1_28, %c0_29] : memref<120x2x128xbf16, #tpu.memory_space<vmem>>, vector<120x1x128xbf16>
      %29 = vector.shape_cast %28 : vector<120x1x128xbf16> to vector<120x128xbf16>
      %30 = vector.shape_cast %27 : vector<120x128xbf16> to vector<120x1x128xbf16>
      tpu.vector_store %arg5[%c0_27, %c1_28, %c0_29], %30 {strides = array<i32>} : memref<120x2x128xbf16, #tpu.memory_space<vmem>>, vector<120x1x128xbf16>,
    } else {
    }
    %c60_i32 = arith.constant 60 : i32
    %3 = arith.muli %arg0, %c60_i32 : i32
    %4 = tpu.assume_multiple %3, 60 : i32
    %5 = arith.index_cast %4 : i32 to index
    %c0 = arith.constant 0 : index
    %c0_1 = arith.constant 0 : index
    %6 = vector.load %arg5[%5, %c0, %c0_1] : memref<120x2x128xbf16, #tpu.memory_space<vmem>>, vector<60x2x128xbf16>
    %c0_2 = arith.constant 0 : index
    %c0_3 = arith.constant 0 : index
    %c0_4 = arith.constant 0 : index
    %7 = vector.load %arg3[%c0_2, %c0_3, %c0_4] : memref<60x128x128xbf16, #tpu.memory_space<vmem>>, vector<60x128x128xbf16>
    "tpu.trace_start"() <{level = 10 : i32, message = "tbd,tde->tbe"}> : () -> ()
    %cst = arith.constant dense<0.000000e+00> : vector<60x2x128xf32>
    %8 = tpu.matmul %6, %7, %cst {dimension_numbers = #tpu.dot_dimension_numbers<[2], [1], [1], [2], [0, 0, 0, 1, 1, 2], [0], [0]>} : vector<60x2x128xbf16>, vector<60x128x128xbf16>, vector<60x2x128xf32> -> vector<60x2x128xf32>
    "tpu.trace_stop"() : () -> ()
    %c0_5 = arith.constant 0 : index
    %c0_6 = arith.constant 0 : index
    %9 = vector.load %arg4[%c0_5, %c0_6] : memref<2x128xf32, #tpu.memory_space<vmem>>, vector<2x128xf32>
    %cst_7 = arith.constant dense<0.000000e+00> : vector<2x128xf32>
    %10 = vector.multi_reduction <add>, %8, %cst_7 [0] : vector<60x2x128xf32> to vector<2x128xf32>
    %11 = arith.addf %9, %10 : vector<2x128xf32>
    %c0_8 = arith.constant 0 : index
    %c0_9 = arith.constant 0 : index
    %12 = vector.load %arg4[%c0_8, %c0_9] : memref<2x128xf32, #tpu.memory_space<vmem>>, vector<2x128xf32>
    tpu.vector_store %arg4[%c0_8, %c0_9], %11 {strides = array<i32>} : memref<2x128xf32, #tpu.memory_space<vmem>>, vector<2x128xf32>,
    return
  }
  func.func @transform_0(%arg0: i32) -> (i32, i32, i32) {
    %c0_i32 = arith.constant 0 : i32
    %c0_i32_0 = arith.constant 0 : i32
    %c0_i32_1 = arith.constant 0 : i32
    %c0_i32_2 = arith.constant 0 : i32
    return %c0_i32, %c0_i32_0, %c0_i32_1 : i32, i32, i32
  }
  func.func @transform_1(%arg0: i32) -> (i32, i32) {
    %c0_i32 = arith.constant 0 : i32
    %c0_i32_0 = arith.constant 0 : i32
    %c0_i32_1 = arith.constant 0 : i32
    return %c0_i32, %c0_i32_0 : i32, i32
  }
  func.func @transform_2(%arg0: i32) -> (i32, i32, i32) {
    %c0_i32 = arith.constant 0 : i32
    %c0_i32_0 = arith.constant 0 : i32
    %c0_i32_1 = arith.constant 0 : i32
    return %arg0, %c0_i32, %c0_i32_0 : i32, i32, i32
  }
  func.func @transform_3(%arg0: i32) -> (i32, i32) {
    %c0_i32 = arith.constant 0 : i32
    %c0_i32_0 = arith.constant 0 : i32
    %c0_i32_1 = arith.constant 0 : i32
    return %c0_i32, %c0_i32_0 : i32, i32
  }
}

</mosaic_0001>

<bundles_post_ra>
// kernel: tpu_custom_call.1
= control target key start
LH: loop header
LB: loop body
LE: loop exit
PB: predicated region body
PF: predicated region fallthrough
CT: control target
= control target key end

     0   :  { %8 = vsyncpa [#allocation4], 0  ;;  %s15636_s0 = inlined_call_operand.hbm [shape: bf16[2,120,256], index: 0, kind: input, shape index: {}]   ;;  %s15637_s1 = inlined_call_operand.hbm [shape: bf16[256,128], index: 1, kind: input, shape index: {}]   ;;  %s15638_s2 = inlined_call_operand.hbm [shape: bf16[120,128,128], index: 2, kind: input, shape index: {}]   ;;  %s15639_s3 = inlined_call_operand.hbm [shape: f32[2,128], index: 3, kind: output, shape index: {}]  }
   0x1   :  { %9 = vsyncpa [#allocation7], 0 }
   0x2   :  { %10 = vsyncpa [#allocation5], 0  ;;  %s12942_s12 = smov 0   ;;  %s12944_s13 = smov 0  }
   0x3   :  { %s12946_s14 = smov 0   ;;  %s12948_s15 = smov 0  }
   0x4 LB: > { %s12961_s16 = sadd.s32 4294967295, %s12908_s15   ;;  %s12964_s17 = sadd.s32 1, %s12908_s15   ;;  %s12908_s15 = sphi %s12948_s15, %s15691_s15   ;;  %s12904_s14 = sphi %s12946_s14, %s15690_s14   ;;  %s12900_s13 = sphi %s12944_s13, %s15689_s13   ;;  %s12896_s12 = sphi %s12942_s12, %s15688_s12  }
   0x5   : > { %s62_s18 = ssub.s32 %s12908_s15, %s12964_s17  ;;  %s65_s19 = sadd.s32 1, %s12904_s14 }
   0x6   : > { %p63_p0 = scmp.eq.s32.totalorder %s62_s18, 0  ;;  %p72_p1 = scmp.ne.s32.totalorder %s12904_s14, %s12900_s13 }
   0x7   : > { %p73_p2 = scmp.eq.s32.totalorder %s12908_s15, 0  ;;  %p78_p3 = scmp.ne.s32.totalorder %s12900_s13, %s12896_s12 }
   0x8   : > { %s12974_s20 = scalar_select %p63_p0, %s12904_s14, %s65_s19  }
   0x9   : > { %p12976_p4 = por %p73_p2, %p72_p1  ;;  %p15640_p5 = scmp.eq.s32.totalorder %s12961_s16, 0 }
   0xa   : > { %p9560_p6 = scmp.ge.s32.totalorder %s12908_s15, 1  ;;  %p110_p7 = scmp.lt.s32.totalorder %s12908_s15, 3 }
   0xb   : > { %p12985_p8 = por %p15640_p5, %p78_p3  ;;  %s12910_s24 = smov [#allocation3]  }
   0xc   : > { %p12990_p10 = pnand %p9560_p6, %p110_p7  ;;  %s122_s25 = sshll.u32 %s12910_s24, 4  ;;  %s123_s25 = int_to_ptr.vmem [resolvable:$true] %s122_s25 }
   0xd   : > { %s15644_s22 = scalar_select %p12985_p8, 1, 0 }
   0xe   : > { %s15645_s23 = scalar_select %p12990_p10, 1, 0 }
   0xf   : > { %p12139_p11 = pneg %p12990_p10  ;;  %p12152_p13 = scmp.lt.s32.totalorder %s12908_s15, 2 }
  0x10   : > { %s12769_s28 = scalar_lea.vmem %s123_s25, 3840  ;;  %p12777_p7 = scmp.lt.s32.totalorder %s123_s25, %s123_s25 }
  0x11   : > { %p12998_p12 = pnand %p12139_p11, %p15640_p5  ;;  %p13005_p0 = pnand %p12152_p13, %p12976_p4 }
  0x12   : > { %p12770_p2 = scmp.ne.s32.totalorder %s123_s25, %s12769_s28  ;;  %p12778_p11 = scmp.lt.s32.totalorder %s12769_s28, %s12769_s28 }
  0x13   : > { %p12760_p1 = pneg %p12998_p12 }
  0x14   : > { %p12779_p9 = por %p12778_p11, %p12777_p7 }
  0x15   : > { %p12772_p3 = pnand %p12770_p2, %p12760_p1 }
  0x17   : > { %p12773_p6 = pneg %p12772_p3 }
  0x19   : > { %p12780_p5 = pnand %p12779_p9, %p12773_p6 }
  0x1b   : > { %12783 = shalt.err (!%p12780_p5)
}
  0x1c   : > { %s12911_s29 = smov 128   ;;  %s12912_s30 = smov 8  }
  0x1d   : > { %12142 = dma.hbm_to_vmem [thread:$0]  (!%p12998_p12), %s15636_s0, 3840, %s123_s25, [#allocation4], %s12911_s29, %s12911_s29, %s12912_s30  }
  0x1e   : > { %s12913_s6 = smov [#allocation6]  }
  0x1f   : > { %s135_s7 = sshll.u32 %s12913_s6, 4  ;;  %s136_s7 = int_to_ptr.vmem [resolvable:$true] %s135_s7 }
  0x20   : > { %s12795_s8 = scalar_lea.vmem %s136_s7, 2048  ;;  %p12803_p9 = scmp.lt.s32.totalorder %s136_s7, %s136_s7 }
  0x21   : > { %p12796_p4 = scmp.ne.s32.totalorder %s136_s7, %s12795_s8  ;;  %p12804_p5 = scmp.lt.s32.totalorder %s12795_s8, %s12795_s8 }
  0x23   : > { %p12798_p13 = pnand %p12796_p4, %p12760_p1  ;;  %p12805_p3 = por %p12804_p5, %p12803_p9 }
  0x25   : > { %p12799_p2 = pneg %p12798_p13 }
  0x27   : > { %p12806_p6 = pnand %p12805_p3, %p12799_p2 }
  0x29   : > { %12809 = shalt.err (!%p12806_p6)
}
  0x2a   : > { %s12914_s9 = smov 64   ;;  %s12915_s10 = smov 4  }
  0x2b   : > { %12145 = dma.hbm_to_vmem [thread:$0]  (!%p12998_p12), %s15637_s1, 2048, %s136_s7, [#allocation7], %s12914_s9, %s12914_s9, %s12915_s10  }
  0x2c   : > { %s149_s18 = sand.u32 1, %s12908_s15   ;;  %s151_s19 = sand.u32 1, %s12904_s14  }
  0x2d   : > { %s12123_s21 = smul.u32 3840, %s151_s19  ;;  %s13040_s4 = scalar_lea.sflag [#allocation4], %s149_s18 }
  0x2e   : > { %s10254_s24 = smul.u32 61440, %s12908_s15  ;;  %p12812_p1 = pneg %p13005_p0 }
  0x2f   : > { %s153_s26 = scalar_lea.vmem [#allocation8], %s12123_s21  ;;  %s12815_s7 = scalar_lea.hbm %s15638_s2, 122880 }
  0x30   : > { %s13036_s29 = scalar_lea.hbm %s15638_s2, %s10254_s24  ;;  %s161_s30 = sshll.u32 %s153_s26, 4  ;;  %s13038_s30 = int_to_ptr.vmem [resolvable:$true] %s161_s30 }
  0x31   : > { %s12810_s5 = scalar_lea.hbm %s13036_s29, 61440  ;;  %p12816_p4 = scmp.lt.s32.totalorder %s13036_s29, %s15638_s2 }
  0x32   : > { %p12811_p12 = scmp.ne.s32.totalorder %s13036_s29, %s12810_s5  ;;  %p12817_p13 = scmp.lt.s32.totalorder %s12815_s7, %s12810_s5 }
  0x34   : > { %p12813_p7 = pnand %p12812_p1, %p12811_p12  ;;  %p12818_p2 = por %p12817_p13, %p12816_p4 }
  0x36   : > { %p12814_p11 = pneg %p12813_p7 }
  0x38   : > { %p12819_p9 = pnand %p12818_p2, %p12814_p11 }
  0x3a   : > { %12822 = shalt.err (!%p12819_p9)
}
  0x3b   : > { %s12823_s12 = scalar_lea.vmem %s13038_s30, 61440  ;;  %s12916_s18 = smov [#allocation8]  }
  0x3c   : > { %p12824_p5 = scmp.ne.s32.totalorder %s13038_s30, %s12823_s12  ;;  %s12828_s19 = sshll.u32 %s12916_s18, 4  ;;  %s12829_s19 = int_to_ptr.vmem [resolvable:$false] %s12828_s19 }
  0x3d   : > { %s12830_s21 = scalar_lea.vmem %s12829_s19, 122880  ;;  %p12831_p12 = scmp.lt.s32.totalorder %s13038_s30, %s12829_s19 }
  0x3e   : > { %p12826_p3 = pnand %p12824_p5, %p12812_p1  ;;  %p12832_p7 = scmp.lt.s32.totalorder %s12830_s21, %s12823_s12 }
  0x40   : > { %p12827_p6 = pneg %p12826_p3  ;;  %p12833_p8 = por %p12832_p7, %p12831_p12 }
  0x42   : > { %p12834_p10 = pnand %p12833_p8, %p12827_p6 }
  0x44   : > { %12837 = shalt.err (!%p12834_p10)
}
  0x45   : > { %12149 = dma.hbm_to_vmem [thread:$0]  (!%p13005_p0), %s13036_s29, 61440, %s13038_s30, %s13040_s4, %s12914_s9, %s12914_s9, %s12915_s10  }
  0x46   : > { %p15648_p1 = scmp.ne.s32.totalorder %s15645_s23, 0 }
  0x47   : > { %p15649_p11 = scmp.eq.s32.totalorder (!%p15648_p1), %s12961_s16, 0 }
  0x48   : > { %173 = sbr.rel (%p15648_p1) target bundleno = 1738 (0x6ca), region = 32 }
  0x4d   : > { %12879 = dma.done.wait (%p15649_p11), [#allocation4], 3840   ;;  %p15650_p4 = pmov %p15649_p11 }
  0x4f   : > { %12881 = vsyncadd (%p15650_p4), [#allocation4], 4294963456  ;;  %p15651_p8 = pmov %p15650_p4 }
  0x50   : > { %p15652_p10 = pmov %p15650_p4 }
  0x51   : > { %12883 = dma.done.wait (%p15651_p8), [#allocation7], 2048  }
  0x52   : > { %12885 = vsyncadd (%p15652_p10), [#allocation7], 4294965248  ;;  %s183_s27 = sand.u32 1, %s12961_s16   ;;  %s185_s9 = sand.u32 1, %s12900_s13  }
  0x53   : > { %s12124_s10 = smul.u32 3840, %s185_s9  ;;  %s184_s23 = scalar_lea.sflag [#allocation4], %s183_s27 }
  0x54   : > { %p15653_p0 = scmp.ne.s32.totalorder %s15644_s22, 0 }
  0x55   : > { %s13076_s24 = scalar_lea.vmem [#allocation8], %s12124_s10 }
  0x56   : > { %12887 = dma.done.wait (%p15653_p0), %s184_s23, 61440  }
  0x57   : > { %12889 = vsyncadd (%p15653_p0), %s184_s23, 4294905856  ;;  %p15654_p13 = scmp.ne.s32.totalorder %s12961_s16, 0 }
  0x59   : > { %210 = sbr.rel (%p15654_p13) target bundleno = 572 (0x23c), region = 48 }
  0x5e   : > { %v12200_v0 = vld [vmem:[#allocation6 + $0x78] sm:$0xff]   ;;  %v12917_v1 = vmov 0.0   ;;  %v12203_v4 = vld [vmem:[#allocation6 + $0x70] sm:$0xff]   ;;  %v12207_v8 = vld [vmem:[#allocation6 + $0x68] sm:$0xff]   ;;  %vm1271_vm0 = vcmask 1040384  }
  0x5f   : > { %211 = vst [vmem:[#allocation9] sm:$0x3] %v12917_v1  ;;  %v12201_v2 = vld [vmem:[#allocation6 + $0x38] sm:$0xff]   ;;  %10255 = vmatprep.subr.bf16.mxu0 %v12200_v0  ;;  %v12205_v6 = vld [vmem:[#allocation6 + $0x30] sm:$0xff]   ;;  %v12209_v10 = vld [vmem:[#allocation6 + $0x28] sm:$0xff]  }
  0x60   : > { %v12202_v3 = vld [vmem:[#allocation6 + $0x78] sm:$0xff]   ;;  %10256 = vmatpush3.bf16.msra.mxu0 %v12201_v2  ;;  %v12206_v7 = vld [vmem:[#allocation6 + $0x70] sm:$0xff]   ;;  %v12210_v11 = vld [vmem:[#allocation6 + $0x68] sm:$0xff]   ;;  %vm1272_vm1 = vsmask.f32 256 }
  0x61   : > { %10319 = vmatprep.subr.bf16.mxu1 %v12202_v3  ;;  %v12204_v5 = vld [vmem:[#allocation6 + $0x38] sm:$0xff]   ;;  %10257 = vmatprep.subr.bf16.mxu0 %v12203_v4  ;;  %v12208_v9 = vld [vmem:[#allocation6 + $0x30] sm:$0xff]   ;;  %v12211_v12 = vld [vmem:[#allocation6 + $0x60] sm:$0xff]   ;;  %v12918_v3 = vmov 1966171168  }
  0x62   : > { %10320 = vmatpush3.bf16.msra.mxu1 %v12204_v5  ;;  %v12212_v13 = vld [vmem:[#allocation6 + $0x28] sm:$0xff]   ;;  %v12213_v14 = vld [vmem:[#allocation6 + $0x20] sm:$0xff]   ;;  %v12215_v16 = vld [vmem:[#allocation6 + $0x58] sm:$0xff]   ;;  %v546_v4 = vunpack.c.l.s4 %v12918_v3  ;;  %v548_v5 = vlaneseq  ;;  %vm2694_vm3 = vsmask.f32 7938 }
  0x63   : > { %10321 = vmatprep.subr.bf16.mxu1 %v12206_v7  ;;  %v12214_v15 = vld [vmem:[#allocation6 + $0x60] sm:$0xff]   ;;  %v12217_v18 = vld [vmem:[#allocation6 + $0x18] sm:$0xff]   ;;  %v12219_v20 = vld [vmem:[#allocation6 + $0x50] sm:$0xff]  }
  0x64   : > { %10258 = vmatpush3.bf16.msra.mxu0 %v12205_v6  ;;  %v12216_v17 = vld [vmem:[#allocation6 + $0x20] sm:$0xff]   ;;  %v12218_v19 = vld [vmem:[#allocation6 + $0x58] sm:$0xff]   ;;  %v12221_v22 = vld [vmem:[#allocation6 + $0x10] sm:$0xff]  }
  0x65   : > { %10259 = vmatprep.subr.bf16.mxu0 %v12207_v8  ;;  %v12220_v21 = vld [vmem:[#allocation6 + $0x18] sm:$0xff]   ;;  %v12222_v23 = vld [vmem:[#allocation6 + $0x50] sm:$0xff]   ;;  %v12223_v24 = vld [vmem:[#allocation6 + $0x48] sm:$0xff]   ;;  %v547_v8 = vunpack.c.0.s8 %v546_v4 }
  0x66   : > { %10322 = vmatpush3.bf16.msra.mxu1 %v12208_v9  ;;  %v12224_v25 = vld [vmem:[#allocation6 + $0x10] sm:$0xff]   ;;  %v12225_v26 = vld [vmem:[#allocation6 + $0x8] sm:$0xff]   ;;  %v12227_v28 = vld [vmem:[#allocation6 + $0x40] sm:$0xff]   ;;  %v549_v9 = vshrl.u32 %v548_v5, 7 }
  0x67   : > { %10323 = vmatprep.subr.bf16.mxu1 %v12210_v11  ;;  %v12226_v27 = vld [vmem:[#allocation6 + $0x48] sm:$0xff]   ;;  %v12229_v30 = vld [vmem:[#allocation6] sm:$0xff]   ;;  %v12230_v31 = vld [vmem:[#allocation3] ss:$8 sps:$4 sm:$0xff]  }
  0x68   : > { %10260 = vmatpush3.bf16.msra.mxu0 %v12209_v10  ;;  %v12228_v29 = vld [vmem:[#allocation6 + $0x8] sm:$0xff]   ;;  %v12232_v32 = vld [vmem:[#allocation3 + $0x4] ss:$8 sps:$4 sm:$0xff]   ;;  %v12233_v33 = vld [vmem:[#allocation6 + $0x40] sm:$0xff]  }
  0x69   : > { %10261 = vmatprep.subr.bf16.mxu0 %v12211_v12  ;;  %464 = vmatprep.mubr.bf16.mxu0 %v12232_v32  ;;  %v12234_v34 = vld [vmem:[#allocation6] sm:$0xff]   ;;  %v12235_v35 = vld [vmem:[#allocation3 + $0x78] ss:$8 sps:$4 sm:$0xff]   ;;  %v12237_v36 = vld [vmem:[#allocation3 + $0x7c] ss:$8 sps:$4 sm:$0xff]  }
  0x6a   : > { %10324 = vmatpush3.bf16.msra.mxu1 %v12212_v13  ;;  %v12238_v37 = vld [vmem:[#allocation3 + $0x14] ss:$8 sps:$4 sm:$0xff]   ;;  %1887 = vmatprep.mubr.bf16.mxu1 %v12237_v36  ;;  %v12240_v39 = vld [vmem:[#allocation3 + $0x10] ss:$8 sps:$4 sm:$0xff]   ;;  %v12244_v40 = vld [vmem:[#allocation3 + $0x24] ss:$8 sps:$4 sm:$0xff]  }
  0x6b   : > { %10325 = vmatprep.subr.bf16.mxu1 %v12214_v15  ;;  %v12241_v38 = vld [vmem:[#allocation3 + $0x8c] ss:$8 sps:$4 sm:$0xff]   ;;  %v12243_v41 = vld [vmem:[#allocation3 + $0x88] ss:$8 sps:$4 sm:$0xff]   ;;  %v12247_v42 = vld [vmem:[#allocation3 + $0x9c] ss:$8 sps:$4 sm:$0xff]  }
  0x6c   : > { %10262 = vmatpush3.bf16.msra.mxu0 %v12213_v14  ;;  %v12246_v43 = vld [vmem:[#allocation3 + $0x20] ss:$8 sps:$4 sm:$0xff]   ;;  %v12250_v44 = vld [vmem:[#allocation3 + $0x34] ss:$8 sps:$4 sm:$0xff]   ;;  %v12252_v47 = vld [vmem:[#allocation3 + $0x30] ss:$8 sps:$4 sm:$0xff]  }
  0x6d   : > { %10263 = vmatprep.subr.bf16.mxu0 %v12215_v16  ;;  %v12249_v45 = vld [vmem:[#allocation3 + $0x98] ss:$8 sps:$4 sm:$0xff]   ;;  %v12253_v46 = vld [vmem:[#allocation3 + $0xac] ss:$8 sps:$4 sm:$0xff]   ;;  %v12255_v49 = vld [vmem:[#allocation3 + $0xa8] ss:$8 sps:$4 sm:$0xff]   ;;  %v13084_v16 = vsub.s32 %v547_v8, %v549_v9 }
  0x6e   : > { %10326 = vmatpush3.bf16.msra.mxu1 %v12216_v17  ;;  %v12256_v48 = vld [vmem:[#allocation3 + $0x44] ss:$8 sps:$4 sm:$0xff]   ;;  %v12258_v51 = vld [vmem:[#allocation3 + $0x40] ss:$8 sps:$4 sm:$0xff]   ;;  %v12262_v52 = vld [vmem:[#allocation3 + $0x54] ss:$8 sps:$4 sm:$0xff]  }
  0x6f   : > { %10327 = vmatprep.subr.bf16.mxu1 %v12218_v19  ;;  %v12259_v50 = vld [vmem:[#allocation3 + $0xbc] ss:$8 sps:$4 sm:$0xff]   ;;  %v12261_v53 = vld [vmem:[#allocation3 + $0xb8] ss:$8 sps:$4 sm:$0xff]   ;;  %v12265_v54 = vld [vmem:[#allocation3 + $0xcc] ss:$8 sps:$4 sm:$0xff]  }
  0x70   : > { %10264 = vmatpush3.bf16.msra.mxu0 %v12217_v18  ;;  %v12264_v55 = vld [vmem:[#allocation3 + $0x50] ss:$8 sps:$4 sm:$0xff]   ;;  %v12268_v56 = vld [vmem:[#allocation3 + $0x64] ss:$8 sps:$4 sm:$0xff]   ;;  %v12270_v60 = vld [vmem:[#allocation3 + $0x60] ss:$8 sps:$4 sm:$0xff]  }
  0x71   : > { %10265 = vmatprep.subr.bf16.mxu0 %v12219_v20  ;;  %v12267_v57 = vld [vmem:[#allocation3 + $0xc8] ss:$8 sps:$4 sm:$0xff]   ;;  %v12271_v58 = vld [vmem:[#allocation3 + $0xdc] ss:$8 sps:$4 sm:$0xff]   ;;  %v12273_v63 = vld [vmem:[#allocation3 + $0xd8] ss:$8 sps:$4 sm:$0xff]  }
  0x72   : > { %10328 = vmatpush3.bf16.msra.mxu1 %v12220_v21  ;;  %v226_v59 = vld [vmem:[#allocation3 + $0x70] sm:$0xff]  ;;  %v1649_v62 = vld [vmem:[#allocation3 + $0xe8] sm:$0xff]  ;;  %vm13133_vm2 = vmand %vm1271_vm0, %vm1272_vm1 }
  0x73   : > { %10329 = vmatprep.subr.bf16.mxu1 %v12222_v23  ;;  %v9585_v61 = vcombine.high %v226_v59, %v226_v59  ;;  %v9684_v0 = vcombine.high %v1649_v62, %v1649_v62  ;;  %v9584_v1 = vcombine.low %v226_v59, %v226_v59  ;;  %v9683_v2 = vcombine.low %v1649_v62, %v1649_v62  ;;  %v1298_v3 = vld [vmem:[#allocation2 + $0x8] sm:$0x1]  ;;  %v1283_v8 = vld [vmem:[#allocation2 + $0x3] sm:$0x1]  ;;  %v1289_v9 = vld [vmem:[#allocation2 + $0x5] sm:$0x1] }
  0x74   : > { %10266 = vmatpush3.bf16.msra.mxu0 %v12221_v22  ;;  %vm13266_vm4 = vmand %vm1271_vm0, %vm2694_vm3 }
  0x75   : > { %10267 = vmatprep.subr.bf16.mxu0 %v12223_v24 }
  0x76   : > { %10330 = vmatpush3.bf16.msra.mxu1 %v12224_v25 }
  0x77   : > { %10331 = vmatprep.subr.bf16.mxu1 %v12226_v27 }
  0x78   : > { %10268 = vmatpush3.bf16.msra.mxu0 %v12225_v26 }
  0x79   : > { %10269 = vmatprep.subr.bf16.mxu0 %v12227_v28 }
  0x7a   : > { %10332 = vmatpush3.bf16.msra.mxu1 %v12228_v29 }
  0x7b   : > { %10333 = vmatprep.subr.bf16.mxu1 %v12233_v33 }
  0x7c   : > { %10270 = vmatpush3.bf16.msra.mxu0 %v12229_v30 }
  0x7e   : > { %10334 = vmatpush3.bf16.msra.mxu1 %v12234_v34 }
  0x7f   : > { %465 = vmatmul.mubr.bf16.vlgmr.msra.gmra.mxu0 %v12230_v31 }
  0x80   : > { %472 = vmatprep.mubr.bf16.mxu0 %v12238_v37 }
  0x81   : > { %1888 = vmatmul.mubr.bf16.vlgmr.msra.gmra.mxu1 %v12235_v35 }
  0x82   : > { %1895 = vmatprep.mubr.bf16.mxu1 %v12241_v38 }
  0x87   : > { %473 = vmatmul.mubr.bf16.gmra.mxu0 %v12240_v39 }
  0x88   : > { %480 = vmatprep.mubr.bf16.mxu0 %v12244_v40 }
  0x89   : > { %1896 = vmatmul.mubr.bf16.gmra.mxu1 %v12243_v41 }
  0x8a   : > { %1903 = vmatprep.mubr.bf16.mxu1 %v12247_v42 }
  0x8f   : > { %481 = vmatmul.mubr.bf16.gmra.mxu0 %v12246_v43 }
  0x90   : > { %488 = vmatprep.mubr.bf16.mxu0 %v12250_v44 }
  0x91   : > { %1904 = vmatmul.mubr.bf16.gmra.mxu1 %v12249_v45 }
  0x92   : > { %1911 = vmatprep.mubr.bf16.mxu1 %v12253_v46 }
  0x97   : > { %489 = vmatmul.mubr.bf16.gmra.mxu0 %v12252_v47 }
  0x98   : > { %496 = vmatprep.mubr.bf16.mxu0 %v12256_v48 }
  0x99   : > { %1912 = vmatmul.mubr.bf16.gmra.mxu1 %v12255_v49 }
  0x9a   : > { %1919 = vmatprep.mubr.bf16.mxu1 %v12259_v50 }
  0x9f   : > { %497 = vmatmul.mubr.bf16.gmra.mxu0 %v12258_v51 }
  0xa0   : > { %504 = vmatprep.mubr.bf16.mxu0 %v12262_v52 }
  0xa1   : > { %1920 = vmatmul.mubr.bf16.gmra.mxu1 %v12261_v53 }
  0xa2   : > { %1927 = vmatprep.mubr.bf16.mxu1 %v12265_v54 }
  0xa7   : > { %505 = vmatmul.mubr.bf16.gmra.mxu0 %v12264_v55 }
  0xa8   : > { %512 = vmatprep.mubr.bf16.mxu0 %v12268_v56 }
  0xa9   : > { %1928 = vmatmul.mubr.bf16.gmra.mxu1 %v12267_v57  ;;  %v1274_v57 = vld [vmem:[#allocation2] sm:$0x1] }
  0xaa   : > { %1935 = vmatprep.mubr.bf16.mxu1 %v12271_v58 }
  0xaf   : > { %513 = vmatmul.mubr.bf16.gmra.mxu0 %v12270_v60 }
  0xb0   : > { %520 = vmatprep.mubr.bf16.mxu0 %v9585_v61 }
  0xb1   : > { %1936 = vmatmul.mubr.bf16.gmra.mxu1 %v12273_v63 }
  0xb2   : > { %1943 = vmatprep.mubr.bf16.mxu1 %v9684_v0  ;;  %v1277_v0 = vld [vmem:[#allocation2 + $0x1] sm:$0x1] }
  0xb7   : > { %521 = vmatmul.mubr.bf16.gmra.mxu0 %v9584_v1  ;;  %v1280_v1 = vld [vmem:[#allocation2 + $0x2] sm:$0x1] }
  0xb9   : > { %1944 = vmatmul.mubr.bf16.gmra.mxu1 %v9683_v2  ;;  %v1286_v2 = vld [vmem:[#allocation2 + $0x4] sm:$0x1] }
 0x13f   : > { %v10271_v6 = vpop.f32.mrf.mxu0 }
 0x141   : > { %v10272_v7 = vpop.f32.mrf.mxu0  ;;  %v10335_v10 = vpop.f32.mrf.mxu1 }
 0x142   : > { %v10273_v14 = vadd.f32 %v10272_v7, %v10271_v6 }
 0x143   : > { %v10274_v11 = vpop.f32.mrf.mxu0  ;;  %v10336_v12 = vpop.f32.mrf.mxu1 }
 0x144   : > { %v13086_v21 = vadd.f32 %v10336_v12, %v10335_v10  ;;  %v1292_v10 = vld [vmem:[#allocation2 + $0x6] sm:$0x1] }
 0x145   : > { %v10275_v13 = vpop.f32.mrf.mxu0  ;;  %v10338_v17 = vpop.f32.mrf.mxu1 }
 0x146   : > { %v10276_v15 = vadd.f32 %v10275_v13, %v10274_v11 }
 0x147   : > { %v10277_v18 = vpop.f32.mrf.mxu0  ;;  %v10339_v22 = vpop.f32.mrf.mxu1 }
 0x148   : > { %v528_v19 = vpack.c.bf16 %v10276_v15, %v10273_v14  ;;  %v9602_v20 = vpack.c.bf16 %v10276_v15, %v10276_v15  ;;  %v13090_v26 = vadd.f32 %v10339_v22, %v10338_v17 }
 0x149   : > { %v10278_v23 = vpop.f32.mrf.mxu0  ;;  %v13092_v27 = vpop.f32.mrf.mxu1 }
 0x14a   : > { %v551_v24 = vrot.slane %v528_v19, %v13084_v16  ;;  %v558_v25 = vrot.slane %v9602_v20, %v13084_v16  ;;  %v1951_v33 = vpack.c.bf16 %v13090_v26, %v13086_v21  ;;  %v9701_v34 = vpack.c.bf16 %v13090_v26, %v13090_v26  ;;  %v1301_v19 = vld [vmem:[#allocation2 + $0x9] sm:$0x1]  ;;  %v1304_v20 = vld [vmem:[#allocation2 + $0xa] sm:$0x1] }
 0x14b   : > { %v13094_v28 = vpop.f32.mrf.mxu0  ;;  %v13104_v35 = vadd.f32 %v10278_v23, %v10277_v18  ;;  %v13106_v36 = vpop.f32.mrf.mxu1  ;;  %v1295_v18 = vld [vmem:[#allocation2 + $0x7] sm:$0x1] }
 0x14c   : > { %v559_v29 = vcombine.high %v551_v24, %v551_v24  ;;  %v560_v30 = vcombine.high %v558_v25, %v558_v25  ;;  %v567_v31 = vrot.slane %v551_v24, %v13084_v16  ;;  %v13098_v32 = vrot.slane %v558_v25, %v13084_v16 }
 0x14d   : > { %v13108_v37 = vpop.f32.mrf.mxu0  ;;  %v13121_v46 = vpop.f32.mrf.mxu1 }
 0x14e   : > { %v581_v38 = vrot.slane %v559_v29, %v13084_v16  ;;  %v13112_v39 = vrot.slane %v560_v30, %v13084_v16  ;;  %v589_v40 = vcombine.high %v567_v31, %v567_v31  ;;  %v13116_v41 = vcombine.high %v13098_v32, %v13098_v32  ;;  %v1307_v29 = vld [vmem:[#allocation2 + $0xb] sm:$0x1]  ;;  %v1310_v30 = vld [vmem:[#allocation2 + $0xc] sm:$0x1] }
 0x14f   : > { %v912_v42 = vunpack.i.h.s16 %v567_v31  ;;  %v920_v43 = vunpack.i.h.s16 %v13098_v32  ;;  %v9609_v44 = vpack.i.b16 %v567_v31, %v567_v31  ;;  %v9613_v45 = vpack.i.b16 %v13098_v32, %v13098_v32  ;;  %v13123_v47 = vpop.f32.mrf.mxu0  ;;  %v13137_v58 = vpop.f32.mrf.mxu1  ;;  %v1313_v31 = vld [vmem:[#allocation2 + $0xd] sm:$0x1] }
 0x150   : > { %v591_v48 = vcombine.high %v581_v38, %v581_v38  ;;  %v13127_v49 = vcombine.high %v13112_v39, %v13112_v39  ;;  %v914_v50 = vunpack.i.h.s16 %v581_v38  ;;  %v916_v51 = vunpack.i.h.s16 %v589_v40 }
 0x151   : > { %v922_v52 = vunpack.i.h.s16 %v13112_v39  ;;  %v924_v53 = vunpack.i.h.s16 %v13116_v41  ;;  %v1032_v54 = vpack.i.b16 %v912_v42, %v912_v42  ;;  %v9610_v55 = vpack.i.b16 %v581_v38, %v581_v38  ;;  %v13139_v59 = vpop.f32.mrf.mxu0  ;;  %v13144_v11 = vpop.f32.mrf.mxu1 }
 0x152   : > { %v918_v60 = vunpack.i.h.s16 %v591_v48  ;;  %v926_v61 = vunpack.i.h.s16 %v13127_v49  ;;  %v1034_v62 = vpack.i.b16 %v914_v50, %v914_v50  ;;  %v9611_v63 = vpack.i.b16 %v589_v40, %v589_v40 }
 0x153   : > { %v1036_v4 = vpack.i.b16 %v916_v51, %v916_v51  ;;  %v9612_v5 = vpack.i.b16 %v591_v48, %v591_v48  ;;  %v1040_v6 = vpack.i.b16 %v920_v43, %v920_v43  ;;  %v9614_v7 = vpack.i.b16 %v13112_v39, %v13112_v39  ;;  %v13146_v12 = vpop.f32.mrf.mxu0  ;;  %v13156_v38 = vpop.f32.mrf.mxu1  ;;  %v1319_v48 = vld [vmem:[#allocation2 + $0xf] sm:$0x1] }
 0x154   : > { %v1038_v13 = vpack.i.b16 %v918_v60, %v918_v60  ;;  %v1042_v14 = vpack.i.b16 %v922_v52, %v922_v52  ;;  %v9615_v15 = vpack.i.b16 %v13116_v41, %v13116_v41  ;;  %v1044_v17 = vpack.i.b16 %v924_v53, %v924_v53 }
 0x155   : > { %v9616_v22 = vpack.i.b16 %v13127_v49, %v13127_v49  ;;  %v1046_v23 = vpack.i.b16 %v926_v61, %v926_v61  ;;  %v1275_v24 = vsel %vm13133_vm2, %v9609_v44, %v1274_v57  ;;  %v1278_v25 = vsel %vm13133_vm2, %v1032_v54, %v1277_v0  ;;  %v13158_v39 = vpop.f32.mrf.mxu0  ;;  %v1316_v44 = vld [vmem:[#allocation2 + $0xe] sm:$0x1]  ;;  %v13179_v53 = vpop.f32.mrf.mxu1 }
 0x156   : > { %1276 = vst [vmem:[#allocation2] sm:$0x1] %v1275_v24  ;;  %1279 = vst [vmem:[#allocation2 + $0x1] sm:$0x1] %v1278_v25  ;;  %v1281_v40 = vsel %vm13133_vm2, %v9610_v55, %v1280_v1  ;;  %v1284_v41 = vsel %vm13133_vm2, %v1034_v62, %v1283_v8  ;;  %v1287_v42 = vsel %vm13133_vm2, %v9611_v63, %v1286_v2 }
 0x157   : > { %v1290_v43 = vsel %vm13133_vm2, %v1036_v4, %v1289_v9  ;;  %1282 = vst [vmem:[#allocation2 + $0x2] sm:$0x1] %v1281_v40  ;;  %1285 = vst [vmem:[#allocation2 + $0x3] sm:$0x1] %v1284_v41  ;;  %v1293_v49 = vsel %vm13133_vm2, %v9612_v5, %v1292_v10  ;;  %v1296_v50 = vsel %vm13133_vm2, %v1038_v13, %v1295_v18  ;;  %v13181_v54 = vpop.f32.mrf.mxu0  ;;  %v13203_v0 = vpop.f32.mrf.mxu1 }
 0x158   : > { %1288 = vst [vmem:[#allocation2 + $0x4] sm:$0x1] %v1287_v42  ;;  %1291 = vst [vmem:[#allocation2 + $0x5] sm:$0x1] %v1290_v43  ;;  %v1299_v51 = vsel %vm13133_vm2, %v9613_v45, %v1298_v3  ;;  %v1302_v52 = vsel %vm13133_vm2, %v1040_v6, %v1301_v19  ;;  %v1305_v55 = vsel %vm13133_vm2, %v9614_v7, %v1304_v20 }
 0x159   : > { %1294 = vst [vmem:[#allocation2 + $0x6] sm:$0x1] %v1293_v49  ;;  %1297 = vst [vmem:[#allocation2 + $0x7] sm:$0x1] %v1296_v50  ;;  %v1308_v32 = vsel %vm13133_vm2, %v1042_v14, %v1307_v29  ;;  %v1311_v45 = vsel %vm13133_vm2, %v9615_v15, %v1310_v30  ;;  %v1314_v57 = vsel %vm13133_vm2, %v1044_v17, %v1313_v31  ;;  %v13205_v1 = vpop.f32.mrf.mxu0 }
 0x15a   : > { %1300 = vst [vmem:[#allocation2 + $0x8] sm:$0x1] %v1299_v51  ;;  %1303 = vst [vmem:[#allocation2 + $0x9] sm:$0x1] %v1302_v52  ;;  %v1317_v60 = vsel %vm13133_vm2, %v9616_v22, %v1316_v44  ;;  %v1320_v61 = vsel %vm13133_vm2, %v1046_v23, %v1319_v48  ;;  %v1974_v62 = vrot.slane %v1951_v33, %v13084_v16 }
 0x15b   : > { %1306 = vst [vmem:[#allocation2 + $0xa] sm:$0x1] %v1305_v55  ;;  %1309 = vst [vmem:[#allocation2 + $0xb] sm:$0x1] %v1308_v32  ;;  %v1981_v63 = vrot.slane %v9701_v34, %v13084_v16  ;;  %v13209_v2 = vadd.f32 %v13106_v36, %v13092_v27  ;;  %v13213_v3 = vadd.f32 %v13108_v37, %v13094_v28  ;;  %v13227_v27 = vpop.f32.mrf.mxu1  ;;  %v13229_v36 = vpop.f32.mrf.mxu0 }
 0x15c   : > { %1312 = vst [vmem:[#allocation2 + $0xc] sm:$0x1] %v1311_v45  ;;  %1315 = vst [vmem:[#allocation2 + $0xd] sm:$0x1] %v1314_v57  ;;  %v13217_v21 = vadd.f32 %v13137_v58, %v13121_v46  ;;  %v13221_v26 = vadd.f32 %v13139_v59, %v13123_v47  ;;  %v1982_v33 = vcombine.high %v1974_v62, %v1974_v62 }
 0x15d   : > { %1318 = vst [vmem:[#allocation2 + $0xe] sm:$0x1] %v1317_v60  ;;  %1321 = vst [vmem:[#allocation2 + $0xf] sm:$0x1] %v1320_v61  ;;  %v1983_v34 = vcombine.high %v1981_v63, %v1981_v63  ;;  %v1990_v4 = vrot.slane %v1974_v62, %v13084_v16  ;;  %v13225_v5 = vrot.slane %v1981_v63, %v13084_v16  ;;  %v13247_v8 = vpop.f32.mrf.mxu1  ;;  %v13249_v9 = vpop.f32.mrf.mxu0  ;;  %v2696_v40 = vld [vmem:[#allocation2] sm:$0x1] }
 0x15e   : > { %v529_v28 = vpack.c.bf16 %v13213_v3, %v13104_v35  ;;  %v2004_v58 = vrot.slane %v1982_v33, %v13084_v16  ;;  %v2699_v41 = vld [vmem:[#allocation2 + $0x1] sm:$0x1]  ;;  %v2702_v49 = vld [vmem:[#allocation2 + $0x2] sm:$0x1]  ;;  %v2705_v50 = vld [vmem:[#allocation2 + $0x3] sm:$0x1]  ;;  %v13350_v35 = vadd.f32 %v13156_v38, %v13144_v11 }
 0x15f   : > { %v13241_v59 = vrot.slane %v1983_v34, %v13084_v16  ;;  %v2012_v6 = vcombine.high %v1990_v4, %v1990_v4  ;;  %v13245_v7 = vcombine.high %v13225_v5, %v13225_v5  ;;  %v2335_v10 = vunpack.i.h.s16 %v1990_v4  ;;  %v13258_v22 = vpop.f32.mrf.mxu1  ;;  %v13260_v23 = vpop.f32.mrf.mxu0  ;;  %v2708_v51 = vld [vmem:[#allocation2 + $0x4] sm:$0x1]  ;;  %v2711_v61 = vld [vmem:[#allocation2 + $0x5] sm:$0x1] }
 0x160   : > { %v2343_v13 = vunpack.i.h.s16 %v13225_v5  ;;  %v9708_v14 = vpack.i.b16 %v1990_v4, %v1990_v4  ;;  %v9712_v15 = vpack.i.b16 %v13225_v5, %v13225_v5  ;;  %v2014_v17 = vcombine.high %v2004_v58, %v2004_v58  ;;  %v2714_v62 = vld [vmem:[#allocation2 + $0x6] sm:$0x1]  ;;  %v2717_v63 = vld [vmem:[#allocation2 + $0x7] sm:$0x1] }
 0x161   : > { %v13256_v18 = vcombine.high %v13241_v59, %v13241_v59  ;;  %v2337_v19 = vunpack.i.h.s16 %v2004_v58  ;;  %v2339_v20 = vunpack.i.h.s16 %v2012_v6  ;;  %v2345_v24 = vunpack.i.h.s16 %v13241_v59  ;;  %v13271_v52 = vpop.f32.mrf.mxu1  ;;  %v13273_v55 = vpop.f32.mrf.mxu0 }
 0x162   : > { %v2347_v25 = vunpack.i.h.s16 %v13245_v7  ;;  %v2455_v29 = vpack.i.b16 %v2335_v10, %v2335_v10  ;;  %v9709_v30 = vpack.i.b16 %v2004_v58, %v2004_v58  ;;  %v2341_v42 = vunpack.i.h.s16 %v2014_v17  ;;  %v2723_v10 = vld [vmem:[#allocation2 + $0x9] sm:$0x1] }
 0x163   : > { %v2349_v43 = vunpack.i.h.s16 %v13256_v18  ;;  %v2457_v44 = vpack.i.b16 %v2337_v19, %v2337_v19  ;;  %v9710_v48 = vpack.i.b16 %v2012_v6, %v2012_v6  ;;  %v2459_v32 = vpack.i.b16 %v2339_v20, %v2339_v20  ;;  %v2720_v6 = vld [vmem:[#allocation2 + $0x8] sm:$0x1]  ;;  %v2726_v19 = vld [vmem:[#allocation2 + $0xa] sm:$0x1]  ;;  %v13279_v47 = vpop.f32.mrf.mxu1  ;;  %v13281_v20 = vpop.f32.mrf.mxu0 }
 0x164   : > { %v9711_v45 = vpack.i.b16 %v2014_v17, %v2014_v17  ;;  %v2463_v57 = vpack.i.b16 %v2343_v13, %v2343_v13  ;;  %v9713_v60 = vpack.i.b16 %v13241_v59, %v13241_v59  ;;  %v2461_v33 = vpack.i.b16 %v2341_v42, %v2341_v42  ;;  %v2729_v42 = vld [vmem:[#allocation2 + $0xb] sm:$0x1] }
 0x165   : > { %v2465_v34 = vpack.i.b16 %v2345_v24, %v2345_v24  ;;  %v9714_v4 = vpack.i.b16 %v13245_v7, %v13245_v7  ;;  %v2467_v58 = vpack.i.b16 %v2347_v25, %v2347_v25  ;;  %v9715_v13 = vpack.i.b16 %v13256_v18, %v13256_v18  ;;  %v2732_v7 = vld [vmem:[#allocation2 + $0xc] sm:$0x1]  ;;  %v2735_v25 = vld [vmem:[#allocation2 + $0xd] sm:$0x1] }
 0x166   : > { %v2469_v59 = vpack.i.b16 %v2349_v43, %v2349_v43  ;;  %v2697_v17 = vsel %vm13266_vm4, %v9708_v14, %v2696_v40  ;;  %v2700_v24 = vsel %vm13266_vm4, %v2455_v29, %v2699_v41  ;;  %v2703_v46 = vsel %vm13266_vm4, %v9709_v30, %v2702_v49  ;;  %v2738_v40 = vld [vmem:[#allocation2 + $0xe] sm:$0x1]  ;;  %v2741_v43 = vld [vmem:[#allocation2 + $0xf] sm:$0x1]  ;;  %v13297_v29 = vpop.f32.mrf.mxu1  ;;  %v13299_v41 = vpop.f32.mrf.mxu0 }
 0x167   : > { %2698 = vst [vmem:[#allocation2] sm:$0x1] %v2697_v17  ;;  %2701 = vst [vmem:[#allocation2 + $0x1] sm:$0x1] %v2700_v24  ;;  %v2706_v37 = vsel %vm13266_vm4, %v2457_v44, %v2705_v50  ;;  %v2709_v18 = vsel %vm13266_vm4, %v9710_v48, %v2708_v51  ;;  %v2712_v14 = vsel %vm13266_vm4, %v2459_v32, %v2711_v61 }
 0x168   : > { %2704 = vst [vmem:[#allocation2 + $0x2] sm:$0x1] %v2703_v46  ;;  %2707 = vst [vmem:[#allocation2 + $0x3] sm:$0x1] %v2706_v37  ;;  %v2715_v30 = vsel %vm13266_vm4, %v9711_v45, %v2714_v62  ;;  %v2718_v44 = vsel %vm13266_vm4, %v2461_v33, %v2717_v63  ;;  %v2721_v48 = vsel %vm13266_vm4, %v9712_v15, %v2720_v6  ;;  %v13320_v15 = vpop.f32.mrf.mxu1  ;;  %v13322_v51 = vpop.f32.mrf.mxu0 }
 0x169   : > { %2710 = vst [vmem:[#allocation2 + $0x4] sm:$0x1] %v2709_v18  ;;  %2713 = vst [vmem:[#allocation2 + $0x5] sm:$0x1] %v2712_v14  ;;  %v2724_v49 = vsel %vm13266_vm4, %v2463_v57, %v2723_v10  ;;  %v2727_v37 = vsel %vm13266_vm4, %v9713_v60, %v2726_v19  ;;  %v2730_v46 = vsel %vm13266_vm4, %v2465_v34, %v2729_v42  ;;  %v1337_v10 = vld [vmem:[#allocation2 + $0x15] sm:$0x1] }
 0x16a   : > { %2716 = vst [vmem:[#allocation2 + $0x6] sm:$0x1] %v2715_v30  ;;  %2719 = vst [vmem:[#allocation2 + $0x7] sm:$0x1] %v2718_v44  ;;  %v2733_v50 = vsel %vm13266_vm4, %v9714_v4, %v2732_v7  ;;  %v2736_v5 = vsel %vm13266_vm4, %v2467_v58, %v2735_v25  ;;  %v2739_v32 = vsel %vm13266_vm4, %v9715_v13, %v2738_v40  ;;  %v13358_v4 = vpop.f32.mrf.mxu0 }
 0x16b   : > { %2722 = vst [vmem:[#allocation2 + $0x8] sm:$0x1] %v2721_v48  ;;  %2725 = vst [vmem:[#allocation2 + $0x9] sm:$0x1] %v2724_v49  ;;  %v2742_v45 = vsel %vm13266_vm4, %v2469_v59, %v2741_v43  ;;  %v600_v57 = vrot.slane %v529_v28, %v13084_v16  ;;  %v15660_v60 = vpack.c.bf16 %v13213_v3, %v13213_v3  ;;  %v13356_v28 = vpop.f32.mrf.mxu1 }
 0x16c   : > { %15659 = vst [vmem:[#allocation14_spill] sm:$0xff] %v13322_v51  ;;  %2728 = vst [vmem:[#allocation2 + $0xa] sm:$0x1] %v2727_v37  ;;  %v15661_v62 = vpack.c.bf16 %v13217_v21, %v13209_v2  ;;  %v15662_v33 = vpack.c.bf16 %v13217_v21, %v13217_v21  ;;  %v13354_v3 = vadd.f32 %v13158_v39, %v13146_v12  ;;  %v13378_v19 = vpop.f32.mrf.mxu0  ;;  %v1352_v51 = vld [vmem:[#allocation2 + $0x1a] sm:$0x1] }
 0x16d   : > { %2731 = vst [vmem:[#allocation2 + $0xb] sm:$0x1] %v2730_v46  ;;  %2734 = vst [vmem:[#allocation2 + $0xc] sm:$0x1] %v2733_v50  ;;  %v607_v61 = vrot.slane %v15660_v60, %v13084_v16  ;;  %v608_v2 = vcombine.high %v600_v57, %v600_v57  ;;  %v616_v6 = vrot.slane %v600_v57, %v13084_v16  ;;  %v13376_v39 = vpop.f32.mrf.mxu1  ;;  %v1322_v50 = vld [vmem:[#allocation2 + $0x10] sm:$0x1] }
 0x16e   : > { %2737 = vst [vmem:[#allocation2 + $0xd] sm:$0x1] %v2736_v5  ;;  %2740 = vst [vmem:[#allocation2 + $0xe] sm:$0x1] %v2739_v32  ;;  %v13340_v63 = vrot.slane %v15661_v62, %v13084_v16  ;;  %v13346_v34 = vrot.slane %v15662_v33, %v13084_v16  ;;  %v13391_v14 = vpop.f32.mrf.mxu0  ;;  %v1325_v62 = vld [vmem:[#allocation2 + $0x11] sm:$0x1] }
 0x16f   : > { %2743 = vst [vmem:[#allocation2 + $0xf] sm:$0x1] %v2742_v45  ;;  %15663 = vst [vmem:[#allocation15_spill] sm:$0xff] %v13356_v28  ;;  %v609_v58 = vcombine.high %v607_v61, %v607_v61  ;;  %v13362_v21 = vrot.slane %v607_v61, %v13084_v16  ;;  %v630_v13 = vrot.slane %v608_v2, %v13084_v16  ;;  %v928_v42 = vunpack.i.h.s16 %v616_v6  ;;  %v13399_v5 = vpop.f32.mrf.mxu1  ;;  %v1328_v33 = vld [vmem:[#allocation2 + $0x12] sm:$0x1] }
 0x170   : > { %15664 = vst [vmem:[#allocation16_spill] sm:$0xff] %v13358_v4  ;;  %v13370_v12 = vrot.slane %v13340_v63, %v13084_v16  ;;  %v13374_v38 = vrot.slane %v13346_v34, %v13084_v16  ;;  %15665 = vst [vmem:[#allocation17_spill] sm:$0xff] %v13376_v39  ;;  %v638_v17 = vcombine.high %v616_v6, %v616_v6  ;;  %v13401_v32 = vpop.f32.mrf.mxu0  ;;  %v1334_v2 = vld [vmem:[#allocation2 + $0x14] sm:$0x1]  ;;  %v1343_v39 = vld [vmem:[#allocation2 + $0x17] sm:$0x1] }
 0x171   : > { %15666 = vst [vmem:[#allocation18_spill] sm:$0xff] %v13378_v19  ;;  %v13382_v59 = vrot.slane %v609_v58, %v13084_v16  ;;  %v13386_v24 = vcombine.high %v13362_v21, %v13362_v21  ;;  %v936_v7 = vunpack.i.h.s16 %v13362_v21  ;;  %v9617_v25 = vpack.i.b16 %v616_v6, %v616_v6  ;;  %15667 = vst [vmem:[#allocation19_spill] sm:$0xff] %v13391_v14  ;;  %v1346_v58 = vld [vmem:[#allocation2 + $0x18] sm:$0x1]  ;;  %v1340_v14 = vld [vmem:[#allocation2 + $0x16] sm:$0x1]  ;;  %v13416_v28 = vpop.f32.mrf.mxu1 }
 0x172   : > { %v9621_v18 = vpack.i.b16 %v13362_v21, %v13362_v21  ;;  %v640_v40 = vcombine.high %v630_v13, %v630_v13  ;;  %v930_v30 = vunpack.i.h.s16 %v630_v13  ;;  %v932_v44 = vunpack.i.h.s16 %v638_v17  ;;  %15668 = vst [vmem:[#allocation20_spill] sm:$0xff] %v13399_v5  ;;  %15669 = vst [vmem:[#allocation21_spill] sm:$0xff] %v13401_v32  ;;  %v13406_v19 = vpop.f32.mrf.mxu0  ;;  %v1349_v4 = vld [vmem:[#allocation2 + $0x19] sm:$0x1] }
 0x173   : > { %v13395_v43 = vcombine.high %v13382_v59, %v13382_v59  ;;  %v938_v48 = vunpack.i.h.s16 %v13382_v59  ;;  %v940_v49 = vunpack.i.h.s16 %v13386_v24  ;;  %v1048_v37 = vpack.i.b16 %v928_v42, %v928_v42  ;;  %v1331_v42 = vld [vmem:[#allocation2 + $0x13] sm:$0x1]  ;;  %15670 = vst [vmem:[#allocation22_spill] sm:$0xff] %v13406_v19  ;;  %v1355_v19 = vld [vmem:[#allocation2 + $0x1b] sm:$0x1] }
 0x174   : > { %v9618_v46 = vpack.i.b16 %v630_v13, %v630_v13  ;;  %v934_v45 = vunpack.i.h.s16 %v640_v40  ;;  %v1050_v60 = vpack.i.b16 %v930_v30, %v930_v30  ;;  %v9619_v61 = vpack.i.b16 %v638_v17, %v638_v17 }
 0x175   : > { %v942_v57 = vunpack.i.h.s16 %v13395_v43  ;;  %v1052_v6 = vpack.i.b16 %v932_v44, %v932_v44  ;;  %v9620_v21 = vpack.i.b16 %v640_v40, %v640_v40  ;;  %v1056_v11 = vpack.i.b16 %v936_v7, %v936_v7 }
 0x176   : > { %v9622_v13 = vpack.i.b16 %v13382_v59, %v13382_v59  ;;  %v1054_v32 = vpack.i.b16 %v934_v45, %v934_v45  ;;  %v1058_v5 = vpack.i.b16 %v938_v48, %v938_v48  ;;  %v9623_v17 = vpack.i.b16 %v13386_v24, %v13386_v24  ;;  %v1358_v45 = vld [vmem:[#allocation2 + $0x1c] sm:$0x1]  ;;  %v1361_v48 = vld [vmem:[#allocation2 + $0x1d] sm:$0x1] }
 0x177   : > { %v1060_v30 = vpack.i.b16 %v940_v49, %v940_v49  ;;  %v9624_v7 = vpack.i.b16 %v13395_v43, %v13395_v43  ;;  %v1062_v40 = vpack.i.b16 %v942_v57, %v942_v57  ;;  %v1323_v59 = vsel %vm13133_vm2, %v9617_v25, %v1322_v50  ;;  %v1367_v50 = vld [vmem:[#allocation2 + $0x1f] sm:$0x1] }
 0x178   : > { %v1326_v44 = vsel %vm13133_vm2, %v1048_v37, %v1325_v62  ;;  %1324 = vst [vmem:[#allocation2 + $0x10] sm:$0x1] %v1323_v59  ;;  %v1329_v24 = vsel %vm13133_vm2, %v9618_v46, %v1328_v33  ;;  %v1332_v43 = vsel %vm13133_vm2, %v1050_v60, %v1331_v42  ;;  %v1335_v49 = vsel %vm13133_vm2, %v9619_v61, %v1334_v2  ;;  %v1364_v37 = vld [vmem:[#allocation2 + $0x1e] sm:$0x1]  ;;  %v13434_v62 = vpop.f32.mrf.mxu0  ;;  %v13458_v33 = vpop.f32.mrf.mxu1 }
 0x179   : > { %1327 = vst [vmem:[#allocation2 + $0x11] sm:$0x1] %v1326_v44  ;;  %v1338_v25 = vsel %vm13133_vm2, %v1052_v6, %v1337_v10  ;;  %1330 = vst [vmem:[#allocation2 + $0x12] sm:$0x1] %v1329_v24  ;;  %v1341_v57 = vsel %vm13133_vm2, %v9620_v21, %v1340_v14  ;;  %v1344_v46 = vsel %vm13133_vm2, %v1054_v32, %v1343_v39  ;;  %v2359_v6 = vunpack.i.h.s16 %v13374_v38 }
 0x17a   : > { %1333 = vst [vmem:[#allocation2 + $0x13] sm:$0x1] %v1332_v43  ;;  %1336 = vst [vmem:[#allocation2 + $0x14] sm:$0x1] %v1335_v49  ;;  %v1347_v60 = vsel %vm13133_vm2, %v9621_v18, %v1346_v58  ;;  %v1350_v61 = vsel %vm13133_vm2, %v1056_v11, %v1349_v4  ;;  %v1353_v10 = vsel %vm13133_vm2, %v9622_v13, %v1352_v51 }
 0x17b   : > { %1339 = vst [vmem:[#allocation2 + $0x15] sm:$0x1] %v1338_v25  ;;  %1342 = vst [vmem:[#allocation2 + $0x16] sm:$0x1] %v1341_v57  ;;  %v1356_v14 = vsel %vm13133_vm2, %v1058_v5, %v1355_v19  ;;  %v1359_v39 = vsel %vm13133_vm2, %v9623_v17, %v1358_v45  ;;  %v1362_v18 = vsel %vm13133_vm2, %v1060_v30, %v1361_v48  ;;  %v13473_v17 = vpop.f32.mrf.mxu0  ;;  %v13479_v25 = vpop.f32.mrf.mxu1 }
 0x17c   : > { %1345 = vst [vmem:[#allocation2 + $0x17] sm:$0x1] %v1344_v46  ;;  %1348 = vst [vmem:[#allocation2 + $0x18] sm:$0x1] %v1347_v60  ;;  %v1365_v4 = vsel %vm13133_vm2, %v9624_v7, %v1364_v37  ;;  %v1368_v11 = vsel %vm13133_vm2, %v1062_v40, %v1367_v50  ;;  %v15671_v51 = vcombine.high %v13340_v63, %v13340_v63  ;;  %v2351_v63 = vunpack.i.h.s16 %v13370_v12 }
 0x17d   : > { %1351 = vst [vmem:[#allocation2 + $0x19] sm:$0x1] %v1350_v61  ;;  %1354 = vst [vmem:[#allocation2 + $0x1a] sm:$0x1] %v1353_v10  ;;  %v15672_v5 = vcombine.high %v13346_v34, %v13346_v34  ;;  %v2061_v2 = vcombine.high %v13370_v12, %v13370_v12  ;;  %v13464_v58 = vcombine.high %v13374_v38, %v13374_v38 }
 0x17e   : > { %1357 = vst [vmem:[#allocation2 + $0x1b] sm:$0x1] %v1356_v14  ;;  %1360 = vst [vmem:[#allocation2 + $0x1c] sm:$0x1] %v1359_v39  ;;  %v2053_v19 = vrot.slane %v15671_v51, %v13084_v16  ;;  %v9716_v40 = vpack.i.b16 %v13370_v12, %v13370_v12  ;;  %v2471_v59 = vpack.i.b16 %v2351_v63, %v2351_v63 }
 0x17f   : > { %1363 = vst [vmem:[#allocation2 + $0x1d] sm:$0x1] %v1362_v18  ;;  %v13456_v32 = vrot.slane %v15672_v5, %v13084_v16  ;;  %1366 = vst [vmem:[#allocation2 + $0x1e] sm:$0x1] %v1365_v4  ;;  %v2355_v30 = vunpack.i.h.s16 %v2061_v2  ;;  %v2363_v7 = vunpack.i.h.s16 %v13464_v58  ;;  %v2744_v43 = vld [vmem:[#allocation2 + $0x10] sm:$0x1]  ;;  %v9718_v37 = vpack.i.b16 %v2061_v2, %v2061_v2 }
 0x180   : > { %1369 = vst [vmem:[#allocation2 + $0x1f] sm:$0x1] %v1368_v11  ;;  %v2063_v21 = vcombine.high %v2053_v19, %v2053_v19  ;;  %v2353_v13 = vunpack.i.h.s16 %v2053_v19  ;;  %v9717_v48 = vpack.i.b16 %v2053_v19, %v2053_v19  ;;  %v2747_v49 = vld [vmem:[#allocation2 + $0x11] sm:$0x1]  ;;  %v9720_v46 = vpack.i.b16 %v13374_v38, %v13374_v38  ;;  %v2750_v60 = vld [vmem:[#allocation2 + $0x12] sm:$0x1]  ;;  %v13485_v19 = vpop.f32.mrf.mxu0 }
 0x181   : > { %v13470_v34 = vcombine.high %v13456_v32, %v13456_v32  ;;  %v2361_v42 = vunpack.i.h.s16 %v13456_v32  ;;  %v2475_v50 = vpack.i.b16 %v2355_v30, %v2355_v30  ;;  %v2753_v61 = vld [vmem:[#allocation2 + $0x13] sm:$0x1]  ;;  %v2756_v10 = vld [vmem:[#allocation2 + $0x14] sm:$0x1]  ;;  %v2479_v14 = vpack.i.b16 %v2359_v6, %v2359_v6  ;;  %15673 = vst [vmem:[#allocation23_spill] sm:$0xff] %v13485_v19 }
 0x182   : > { %v2357_v44 = vunpack.i.h.s16 %v2063_v21  ;;  %v2473_v24 = vpack.i.b16 %v2353_v13, %v2353_v13  ;;  %v9719_v57 = vpack.i.b16 %v2063_v21, %v2063_v21  ;;  %v9721_v39 = vpack.i.b16 %v13456_v32, %v13456_v32  ;;  %v2759_v4 = vld [vmem:[#allocation2 + $0x15] sm:$0x1]  ;;  %v2762_v11 = vld [vmem:[#allocation2 + $0x16] sm:$0x1] }
 0x183   : > { %v2365_v45 = vunpack.i.h.s16 %v13470_v34  ;;  %v2481_v18 = vpack.i.b16 %v2361_v42, %v2361_v42  ;;  %v2765_v51 = vld [vmem:[#allocation2 + $0x17] sm:$0x1]  ;;  %v9722_v5 = vpack.i.b16 %v13464_v58, %v13464_v58  ;;  %v2483_v2 = vpack.i.b16 %v2363_v7, %v2363_v7  ;;  %v2768_v21 = vld [vmem:[#allocation2 + $0x18] sm:$0x1] }
 0x184   : > { %v2477_v12 = vpack.i.b16 %v2357_v44, %v2357_v44  ;;  %v9723_v38 = vpack.i.b16 %v13470_v34, %v13470_v34  ;;  %v2771_v13 = vld [vmem:[#allocation2 + $0x19] sm:$0x1]  ;;  %v2774_v6 = vld [vmem:[#allocation2 + $0x1a] sm:$0x1]  ;;  %v2745_v32 = vsel %vm13266_vm4, %v9716_v40, %v2744_v43  ;;  %v2748_v42 = vsel %vm13266_vm4, %v2471_v59, %v2747_v49  ;;  %v13499_v34 = vpop.f32.mrf.mxu1 }
 0x185   : > { %v2485_v63 = vpack.i.b16 %v2365_v45, %v2365_v45  ;;  %v2751_v30 = vsel %vm13266_vm4, %v9717_v48, %v2750_v60  ;;  %v2754_v58 = vsel %vm13266_vm4, %v2473_v24, %v2753_v61  ;;  %v2777_v7 = vld [vmem:[#allocation2 + $0x1b] sm:$0x1]  ;;  %v2780_v44 = vld [vmem:[#allocation2 + $0x1c] sm:$0x1]  ;;  %2746 = vst [vmem:[#allocation2 + $0x10] sm:$0x1] %v2745_v32  ;;  %v2757_v40 = vsel %vm13266_vm4, %v9718_v37, %v2756_v10  ;;  %v13517_v60 = vpop.f32.mrf.mxu0 }
 0x186   : > { %v2783_v19 = vld [vmem:[#allocation2 + $0x1d] sm:$0x1]  ;;  %2749 = vst [vmem:[#allocation2 + $0x11] sm:$0x1] %v2748_v42  ;;  %2752 = vst [vmem:[#allocation2 + $0x12] sm:$0x1] %v2751_v30  ;;  %v2760_v59 = vsel %vm13266_vm4, %v2475_v50, %v2759_v4  ;;  %v2763_v45 = vsel %vm13266_vm4, %v9719_v57, %v2762_v11  ;;  %v2766_v48 = vsel %vm13266_vm4, %v2477_v12, %v2765_v51  ;;  %v13535_v11 = vpop.f32.mrf.mxu1 }
 0x187   : > { %2755 = vst [vmem:[#allocation2 + $0x13] sm:$0x1] %v2754_v58  ;;  %v2786_v24 = vld [vmem:[#allocation2 + $0x1e] sm:$0x1]  ;;  %v2789_v43 = vld [vmem:[#allocation2 + $0x1f] sm:$0x1]  ;;  %v2769_v49 = vsel %vm13266_vm4, %v9720_v46, %v2768_v21  ;;  %v2772_v37 = vsel %vm13266_vm4, %v2479_v14, %v2771_v13  ;;  %v2775_v50 = vsel %vm13266_vm4, %v9721_v39, %v2774_v6  ;;  %v2778_v57 = vsel %vm13266_vm4, %v2481_v18, %v2777_v7  ;;  %v10316_v51 = vpop.f32.mrf.mxu0 }
 0x188   : > { %2758 = vst [vmem:[#allocation2 + $0x14] sm:$0x1] %v2757_v40  ;;  %2761 = vst [vmem:[#allocation2 + $0x15] sm:$0x1] %v2760_v59  ;;  %v2781_v61 = vsel %vm13266_vm4, %v9722_v5, %v2780_v44  ;;  %v2784_v46 = vsel %vm13266_vm4, %v2483_v2, %v2783_v19  ;;  %v2787_v10 = vsel %vm13266_vm4, %v9723_v38, %v2786_v24  ;;  %v13562_v38 = vpop.f32.mrf.mxu1  ;;  %v1394_v51 = vld [vmem:[#allocation2 + $0x28] sm:$0x1] }
 0x189   : > { %2764 = vst [vmem:[#allocation2 + $0x16] sm:$0x1] %v2763_v45  ;;  %2767 = vst [vmem:[#allocation2 + $0x17] sm:$0x1] %v2766_v48  ;;  %v2790_v12 = vsel %vm13266_vm4, %v2485_v63, %v2789_v43  ;;  %v530_v14 = vpack.c.bf16 %v13354_v3, %v13221_v26  ;;  %v9604_v39 = vpack.c.bf16 %v13354_v3, %v13354_v3 }
 0x18a   : > { %2770 = vst [vmem:[#allocation2 + $0x18] sm:$0x1] %v2769_v49  ;;  %2773 = vst [vmem:[#allocation2 + $0x19] sm:$0x1] %v2772_v37  ;;  %v10352_v18 = vadd.f32 %v13203_v0, %v13179_v53  ;;  %v10291_v4 = vadd.f32 %v13205_v1, %v13181_v54  ;;  %v13539_v19 = vadd.f32 %v13247_v8, %v13227_v27  ;;  %v10317_v27 = vpop.f32.mrf.mxu0  ;;  %v13591_v43 = vpop.f32.mrf.mxu1 }
 0x18b   : > { %2776 = vst [vmem:[#allocation2 + $0x1a] sm:$0x1] %v2775_v50  ;;  %2779 = vst [vmem:[#allocation2 + $0x1b] sm:$0x1] %v2778_v57  ;;  %v10294_v5 = vadd.f32 %v13249_v9, %v13229_v36  ;;  %v13545_v26 = vadd.f32 %v13271_v52, %v13258_v22  ;;  %v13549_v53 = vadd.f32 %v13273_v55, %v13260_v23  ;;  %v1379_v27 = vld [vmem:[#allocation2 + $0x23] sm:$0x1] }
 0x18c   : > { %2782 = vst [vmem:[#allocation2 + $0x1c] sm:$0x1] %v2781_v61  ;;  %2785 = vst [vmem:[#allocation2 + $0x1d] sm:$0x1] %v2784_v46  ;;  %v649_v54 = vrot.slane %v530_v14, %v13084_v16  ;;  %v656_v0 = vrot.slane %v9604_v39, %v13084_v16  ;;  %v1953_v1 = vpack.c.bf16 %v10352_v18, %v13350_v35  ;;  %v1370_v61 = vld [vmem:[#allocation2 + $0x20] sm:$0x1] }
 0x18d   : > { %2788 = vst [vmem:[#allocation2 + $0x1e] sm:$0x1] %v2787_v10  ;;  %2791 = vst [vmem:[#allocation2 + $0x1f] sm:$0x1] %v2790_v12  ;;  %v9703_v3 = vpack.c.bf16 %v10352_v18, %v10352_v18  ;;  %v531_v8 = vpack.c.bf16 %v10294_v5, %v10291_v4  ;;  %v9605_v2 = vpack.c.bf16 %v10294_v5, %v10294_v5  ;;  %v1373_v39 = vld [vmem:[#allocation2 + $0x21] sm:$0x1]  ;;  %v13596_v5 = vpop.f32.mrf.mxu1 }
 0x18e   : > { %v657_v22 = vcombine.high %v649_v54, %v649_v54  ;;  %v658_v52 = vcombine.high %v656_v0, %v656_v0  ;;  %v665_v23 = vrot.slane %v649_v54, %v13084_v16  ;;  %v13560_v55 = vrot.slane %v656_v0, %v13084_v16  ;;  %v1376_v18 = vld [vmem:[#allocation2 + $0x22] sm:$0x1]  ;;  %v1382_v4 = vld [vmem:[#allocation2 + $0x24] sm:$0x1]  ;;  %v1409_v9 = vld [vmem:[#allocation2 + $0x2d] sm:$0x1] }
 0x18f   : > { %v13565_v35 = vrot.slane %v1953_v1, %v13084_v16  ;;  %v13568_v63 = vrot.slane %v9703_v3, %v13084_v16  ;;  %v13571_v21 = vrot.slane %v531_v8, %v13084_v16  ;;  %v13574_v13 = vrot.slane %v9605_v2, %v13084_v16  ;;  %v1385_v8 = vld [vmem:[#allocation2 + $0x25] sm:$0x1]  ;;  %v1388_v2 = vld [vmem:[#allocation2 + $0x26] sm:$0x1] }
 0x190   : > { %v679_v6 = vrot.slane %v657_v22, %v13084_v16  ;;  %v13578_v32 = vrot.slane %v658_v52, %v13084_v16  ;;  %v687_v42 = vcombine.high %v665_v23, %v665_v23  ;;  %v13582_v30 = vcombine.high %v13560_v55, %v13560_v55 }
 0x191   : > { %v944_v58 = vunpack.i.h.s16 %v665_v23  ;;  %v952_v7 = vunpack.i.h.s16 %v13560_v55  ;;  %v9625_v44 = vpack.i.b16 %v665_v23, %v665_v23  ;;  %v9629_v40 = vpack.i.b16 %v13560_v55, %v13560_v55 }
 0x192   : > { %v689_v59 = vcombine.high %v679_v6, %v679_v6  ;;  %v13589_v45 = vcombine.high %v13578_v32, %v13578_v32  ;;  %v946_v48 = vunpack.i.h.s16 %v679_v6  ;;  %v948_v24 = vunpack.i.h.s16 %v687_v42 }
 0x193   : > { %v954_v49 = vunpack.i.h.s16 %v13578_v32  ;;  %v956_v37 = vunpack.i.h.s16 %v13582_v30  ;;  %v1064_v50 = vpack.i.b16 %v944_v58, %v944_v58  ;;  %v9626_v57 = vpack.i.b16 %v679_v6, %v679_v6  ;;  %v1391_v6 = vld [vmem:[#allocation2 + $0x27] sm:$0x1]  ;;  %v1400_v58 = vld [vmem:[#allocation2 + $0x2a] sm:$0x1] }
 0x194   : > { %v950_v46 = vunpack.i.h.s16 %v689_v59  ;;  %v958_v10 = vunpack.i.h.s16 %v13589_v45  ;;  %v1066_v12 = vpack.i.b16 %v946_v48, %v946_v48  ;;  %v9627_v14 = vpack.i.b16 %v687_v42, %v687_v42  ;;  %v1397_v42 = vld [vmem:[#allocation2 + $0x29] sm:$0x1]  ;;  %v10380_v48 = vpop.f32.mrf.mxu1 }
 0x195   : > { %v1068_v54 = vpack.i.b16 %v948_v24, %v948_v24  ;;  %v9628_v0 = vpack.i.b16 %v689_v59, %v689_v59  ;;  %v1072_v1 = vpack.i.b16 %v952_v7, %v952_v7  ;;  %v9630_v3 = vpack.i.b16 %v13578_v32, %v13578_v32 }
 0x196   : > { %v1070_v22 = vpack.i.b16 %v950_v46, %v950_v46  ;;  %v1074_v52 = vpack.i.b16 %v954_v49, %v954_v49  ;;  %v9631_v23 = vpack.i.b16 %v13582_v30, %v13582_v30  ;;  %v1076_v55 = vpack.i.b16 %v956_v37, %v956_v37  ;;  %v1403_v46 = vld [vmem:[#allocation2 + $0x2b] sm:$0x1]  ;;  %v1406_v49 = vld [vmem:[#allocation2 + $0x2c] sm:$0x1] }
 0x197   : > { %v9632_v59 = vpack.i.b16 %v13589_v45, %v13589_v45  ;;  %v1078_v7 = vpack.i.b16 %v958_v10, %v958_v10  ;;  %v1371_v32 = vsel %vm13133_vm2, %v9625_v44, %v1370_v61  ;;  %v1374_v24 = vsel %vm13133_vm2, %v1064_v50, %v1373_v39  ;;  %v1412_v61 = vld [vmem:[#allocation2 + $0x2e] sm:$0x1]  ;;  %v1415_v10 = vld [vmem:[#allocation2 + $0x2f] sm:$0x1]  ;;  %v10381_v50 = vpop.f32.mrf.mxu1 }
 0x198   : > { %1372 = vst [vmem:[#allocation2 + $0x20] sm:$0x1] %v1371_v32  ;;  %1375 = vst [vmem:[#allocation2 + $0x21] sm:$0x1] %v1374_v24  ;;  %v1377_v30 = vsel %vm13133_vm2, %v9626_v57, %v1376_v18  ;;  %v1380_v37 = vsel %vm13133_vm2, %v1066_v12, %v1379_v27  ;;  %v1383_v45 = vsel %vm13133_vm2, %v9627_v14, %v1382_v4 }
 0x199   : > { %v1386_v44 = vsel %vm13133_vm2, %v1068_v54, %v1385_v8  ;;  %1378 = vst [vmem:[#allocation2 + $0x22] sm:$0x1] %v1377_v30  ;;  %1381 = vst [vmem:[#allocation2 + $0x23] sm:$0x1] %v1380_v37  ;;  %v1389_v39 = vsel %vm13133_vm2, %v9628_v0, %v1388_v2  ;;  %v1392_v57 = vsel %vm13133_vm2, %v1070_v22, %v1391_v6 }
 0x19a   : > { %1384 = vst [vmem:[#allocation2 + $0x24] sm:$0x1] %v1383_v45  ;;  %1387 = vst [vmem:[#allocation2 + $0x25] sm:$0x1] %v1386_v44  ;;  %v1395_v12 = vsel %vm13133_vm2, %v9629_v40, %v1394_v51  ;;  %v1398_v14 = vsel %vm13133_vm2, %v1072_v1, %v1397_v42  ;;  %v1401_v18 = vsel %vm13133_vm2, %v9630_v3, %v1400_v58 }
 0x19b   : > { %1390 = vst [vmem:[#allocation2 + $0x26] sm:$0x1] %v1389_v39  ;;  %1393 = vst [vmem:[#allocation2 + $0x27] sm:$0x1] %v1392_v57  ;;  %v1404_v4 = vsel %vm13133_vm2, %v1074_v52, %v1403_v46  ;;  %v1407_v54 = vsel %vm13133_vm2, %v9631_v23, %v1406_v49  ;;  %v1410_v0 = vsel %vm13133_vm2, %v1076_v55, %v1409_v9 }
 0x19c   : > { %1396 = vst [vmem:[#allocation2 + $0x28] sm:$0x1] %v1395_v12  ;;  %1399 = vst [vmem:[#allocation2 + $0x29] sm:$0x1] %v1398_v14  ;;  %v1413_v40 = vsel %vm13133_vm2, %v9632_v59, %v1412_v61  ;;  %v1416_v51 = vsel %vm13133_vm2, %v1078_v7, %v1415_v10  ;;  %v2080_v1 = vcombine.high %v13565_v35, %v13565_v35 }
 0x19d   : > { %1402 = vst [vmem:[#allocation2 + $0x2a] sm:$0x1] %v1401_v18  ;;  %1405 = vst [vmem:[#allocation2 + $0x2b] sm:$0x1] %v1404_v4  ;;  %v2081_v3 = vcombine.high %v13568_v63, %v13568_v63  ;;  %v2088_v9 = vrot.slane %v13565_v35, %v13084_v16  ;;  %v13644_v27 = vrot.slane %v13568_v63, %v13084_v16 }
 0x19e   : > { %1408 = vst [vmem:[#allocation2 + $0x2c] sm:$0x1] %v1407_v54  ;;  %1411 = vst [vmem:[#allocation2 + $0x2d] sm:$0x1] %v1410_v0  ;;  %v2102_v22 = vrot.slane %v2080_v1, %v13084_v16  ;;  %v13656_v23 = vrot.slane %v13571_v21, %v13084_v16  ;;  %v13660_v35 = vrot.slane %v13574_v13, %v13084_v16 }
 0x19f   : > { %1414 = vst [vmem:[#allocation2 + $0x2e] sm:$0x1] %v1413_v40  ;;  %1417 = vst [vmem:[#allocation2 + $0x2f] sm:$0x1] %v1416_v51  ;;  %v13652_v52 = vrot.slane %v2081_v3, %v13084_v16  ;;  %v2110_v63 = vcombine.high %v2088_v9, %v2088_v9  ;;  %v13664_v55 = vcombine.high %v13644_v27, %v13644_v27  ;;  %v2367_v6 = vunpack.i.h.s16 %v2088_v9  ;;  %v2792_v30 = vld [vmem:[#allocation2 + $0x20] sm:$0x1] }
 0x1a0   : > { %v2375_v42 = vunpack.i.h.s16 %v13644_v27  ;;  %v2112_v58 = vcombine.high %v2102_v22, %v2102_v22  ;;  %v2369_v59 = vunpack.i.h.s16 %v2102_v22  ;;  %v9724_v46 = vpack.i.b16 %v2088_v9, %v2088_v9  ;;  %v2795_v10 = vld [vmem:[#allocation2 + $0x21] sm:$0x1]  ;;  %v2798_v50 = vld [vmem:[#allocation2 + $0x22] sm:$0x1]  ;;  %v2801_v39 = vld [vmem:[#allocation2 + $0x23] sm:$0x1] }
 0x1a1   : > { %v13669_v48 = vcombine.high %v13652_v52, %v13652_v52  ;;  %v2377_v7 = vunpack.i.h.s16 %v13652_v52  ;;  %v2371_v32 = vunpack.i.h.s16 %v2110_v63  ;;  %v2379_v24 = vunpack.i.h.s16 %v13664_v55  ;;  %v2804_v4 = vld [vmem:[#allocation2 + $0x24] sm:$0x1]  ;;  %v2807_v54 = vld [vmem:[#allocation2 + $0x25] sm:$0x1] }
 0x1a2   : > { %v2487_v49 = vpack.i.b16 %v2367_v6, %v2367_v6  ;;  %v2373_v37 = vunpack.i.h.s16 %v2112_v58  ;;  %v9725_v44 = vpack.i.b16 %v2102_v22, %v2102_v22  ;;  %v2489_v61 = vpack.i.b16 %v2369_v59, %v2369_v59  ;;  %v2810_v0 = vld [vmem:[#allocation2 + $0x26] sm:$0x1]  ;;  %v2813_v9 = vld [vmem:[#allocation2 + $0x27] sm:$0x1] }
 0x1a3   : > { %v2381_v45 = vunpack.i.h.s16 %v13669_v48  ;;  %v9726_v57 = vpack.i.b16 %v2110_v63, %v2110_v63  ;;  %v2491_v12 = vpack.i.b16 %v2371_v32, %v2371_v32  ;;  %v9727_v14 = vpack.i.b16 %v2112_v58, %v2112_v58  ;;  %v2816_v22 = vld [vmem:[#allocation2 + $0x28] sm:$0x1]  ;;  %v2819_v6 = vld [vmem:[#allocation2 + $0x29] sm:$0x1] }
 0x1a4   : > { %v9728_v18 = vpack.i.b16 %v13644_v27, %v13644_v27  ;;  %v2493_v40 = vpack.i.b16 %v2373_v37, %v2373_v37  ;;  %v2495_v51 = vpack.i.b16 %v2375_v42, %v2375_v42  ;;  %v9729_v1 = vpack.i.b16 %v13652_v52, %v13652_v52  ;;  %v2822_v32 = vld [vmem:[#allocation2 + $0x2a] sm:$0x1]  ;;  %v2825_v36 = vld [vmem:[#allocation2 + $0x2b] sm:$0x1] }
 0x1a5   : > { %v2497_v3 = vpack.i.b16 %v2377_v7, %v2377_v7  ;;  %v9730_v63 = vpack.i.b16 %v13664_v55, %v13664_v55  ;;  %v2499_v59 = vpack.i.b16 %v2379_v24, %v2379_v24  ;;  %v9731_v58 = vpack.i.b16 %v13669_v48, %v13669_v48  ;;  %v2828_v2 = vld [vmem:[#allocation2 + $0x2c] sm:$0x1]  ;;  %v2831_v24 = vld [vmem:[#allocation2 + $0x2d] sm:$0x1] }
 0x1a6   : > { %v2501_v27 = vpack.i.b16 %v2381_v45, %v2381_v45  ;;  %v2793_v42 = vsel %vm13266_vm4, %v9724_v46, %v2792_v30  ;;  %v2796_v52 = vsel %vm13266_vm4, %v2487_v49, %v2795_v10  ;;  %v2799_v7 = vsel %vm13266_vm4, %v9725_v44, %v2798_v50  ;;  %v2834_v37 = vld [vmem:[#allocation2 + $0x2e] sm:$0x1]  ;;  %v2837_v8 = vld [vmem:[#allocation2 + $0x2f] sm:$0x1] }
 0x1a7   : > { %v2802_v55 = vsel %vm13266_vm4, %v2489_v61, %v2801_v39  ;;  %2794 = vst [vmem:[#allocation2 + $0x20] sm:$0x1] %v2793_v42  ;;  %2797 = vst [vmem:[#allocation2 + $0x21] sm:$0x1] %v2796_v52  ;;  %v2805_v48 = vsel %vm13266_vm4, %v9726_v57, %v2804_v4  ;;  %v2808_v46 = vsel %vm13266_vm4, %v2491_v12, %v2807_v54  ;;  %v960_v54 = vunpack.i.h.s16 %v13656_v23  ;;  %v1424_v42 = vld [vmem:[#allocation2 + $0x32] sm:$0x1] }
 0x1a8   : > { %2800 = vst [vmem:[#allocation2 + $0x22] sm:$0x1] %v2799_v7  ;;  %2803 = vst [vmem:[#allocation2 + $0x23] sm:$0x1] %v2802_v55  ;;  %v2811_v49 = vsel %vm13266_vm4, %v9727_v14, %v2810_v0  ;;  %v2814_v30 = vsel %vm13266_vm4, %v2493_v40, %v2813_v9  ;;  %v2817_v45 = vsel %vm13266_vm4, %v9728_v18, %v2816_v22  ;;  %v968_v0 = vunpack.i.h.s16 %v13660_v35  ;;  %v1430_v52 = vld [vmem:[#allocation2 + $0x34] sm:$0x1] }
 0x1a9   : > { %2806 = vst [vmem:[#allocation2 + $0x24] sm:$0x1] %v2805_v48  ;;  %2809 = vst [vmem:[#allocation2 + $0x25] sm:$0x1] %v2808_v46  ;;  %v2820_v44 = vsel %vm13266_vm4, %v2495_v51, %v2819_v6  ;;  %v2823_v61 = vsel %vm13266_vm4, %v9729_v1, %v2822_v32  ;;  %v2826_v10 = vsel %vm13266_vm4, %v2497_v3, %v2825_v36  ;;  %v1442_v7 = vld [vmem:[#allocation2 + $0x38] sm:$0x1] }
 0x1aa   : > { %2812 = vst [vmem:[#allocation2 + $0x26] sm:$0x1] %v2811_v49  ;;  %2815 = vst [vmem:[#allocation2 + $0x27] sm:$0x1] %v2814_v30  ;;  %v2829_v50 = vsel %vm13266_vm4, %v9730_v63, %v2828_v2  ;;  %v2832_v39 = vsel %vm13266_vm4, %v2499_v59, %v2831_v24  ;;  %v2835_v57 = vsel %vm13266_vm4, %v9731_v58, %v2834_v37  ;;  %v1418_v59 = vld [vmem:[#allocation2 + $0x30] sm:$0x1] }
 0x1ab   : > { %2818 = vst [vmem:[#allocation2 + $0x28] sm:$0x1] %v2817_v45  ;;  %2821 = vst [vmem:[#allocation2 + $0x29] sm:$0x1] %v2820_v44  ;;  %v2838_v12 = vsel %vm13266_vm4, %v2501_v27, %v2837_v8  ;;  %v15674_v36 = vcombine.high %v13571_v21, %v13571_v21  ;;  %v15675_v2 = vcombine.high %v13574_v13, %v13574_v13  ;;  %v1427_v46 = vld [vmem:[#allocation2 + $0x33] sm:$0x1] }
 0x1ac   : > { %2824 = vst [vmem:[#allocation2 + $0x2a] sm:$0x1] %v2823_v61  ;;  %2827 = vst [vmem:[#allocation2 + $0x2b] sm:$0x1] %v2826_v10  ;;  %v736_v4 = vcombine.high %v13656_v23, %v13656_v23  ;;  %v13728_v8 = vcombine.high %v13660_v35, %v13660_v35  ;;  %v9633_v21 = vpack.i.b16 %v13656_v23, %v13656_v23  ;;  %v1433_v49 = vld [vmem:[#allocation2 + $0x35] sm:$0x1] }
 0x1ad   : > { %2830 = vst [vmem:[#allocation2 + $0x2c] sm:$0x1] %v2829_v50  ;;  %2833 = vst [vmem:[#allocation2 + $0x2d] sm:$0x1] %v2832_v39  ;;  %v728_v14 = vrot.slane %v15674_v36, %v13084_v16  ;;  %v13722_v18 = vrot.slane %v15675_v2, %v13084_v16  ;;  %v9637_v40 = vpack.i.b16 %v13660_v35, %v13660_v35  ;;  %v1421_v35 = vld [vmem:[#allocation2 + $0x31] sm:$0x1] }
 0x1ae   : > { %2836 = vst [vmem:[#allocation2 + $0x2e] sm:$0x1] %v2835_v57  ;;  %2839 = vst [vmem:[#allocation2 + $0x2f] sm:$0x1] %v2838_v12  ;;  %v964_v3 = vunpack.i.h.s16 %v736_v4  ;;  %v972_v22 = vunpack.i.h.s16 %v13728_v8  ;;  %v1080_v6 = vpack.i.b16 %v960_v54, %v960_v54  ;;  %v9635_v32 = vpack.i.b16 %v736_v4, %v736_v4  ;;  %v1436_v30 = vld [vmem:[#allocation2 + $0x36] sm:$0x1] }
 0x1af   : > { %v738_v13 = vcombine.high %v728_v14, %v728_v14  ;;  %v13738_v51 = vcombine.high %v13722_v18, %v13722_v18  ;;  %v962_v1 = vunpack.i.h.s16 %v728_v14  ;;  %v970_v9 = vunpack.i.h.s16 %v13722_v18  ;;  %v1439_v50 = vld [vmem:[#allocation2 + $0x37] sm:$0x1]  ;;  %v1445_v39 = vld [vmem:[#allocation2 + $0x39] sm:$0x1]  ;;  %v1448_v57 = vld [vmem:[#allocation2 + $0x3a] sm:$0x1] }
 0x1b0   : > { %v9634_v63 = vpack.i.b16 %v728_v14, %v728_v14  ;;  %v1084_v55 = vpack.i.b16 %v964_v3, %v964_v3  ;;  %v1088_v37 = vpack.i.b16 %v968_v0, %v968_v0  ;;  %v9638_v48 = vpack.i.b16 %v13722_v18, %v13722_v18  ;;  %v1451_v18 = vld [vmem:[#allocation2 + $0x3b] sm:$0x1]  ;;  %v1454_v4 = vld [vmem:[#allocation2 + $0x3c] sm:$0x1]  ;;  %v1457_v54 = vld [vmem:[#allocation2 + $0x3d] sm:$0x1] }
 0x1b1   : > { %v966_v58 = vunpack.i.h.s16 %v738_v13  ;;  %v974_v23 = vunpack.i.h.s16 %v13738_v51  ;;  %v1082_v27 = vpack.i.b16 %v962_v1, %v962_v1  ;;  %v9636_v24 = vpack.i.b16 %v738_v13, %v738_v13  ;;  %v1463_v1 = vld [vmem:[#allocation2 + $0x3f] sm:$0x1] }
 0x1b2   : > { %v1090_v44 = vpack.i.b16 %v970_v9, %v970_v9  ;;  %v9639_v61 = vpack.i.b16 %v13728_v8, %v13728_v8  ;;  %v1092_v10 = vpack.i.b16 %v972_v22, %v972_v22  ;;  %v9640_v12 = vpack.i.b16 %v13738_v51, %v13738_v51  ;;  %v1460_v51 = vld [vmem:[#allocation2 + $0x3e] sm:$0x1] }
 0x1b3   : > { %v1086_v45 = vpack.i.b16 %v966_v58, %v966_v58  ;;  %v1094_v36 = vpack.i.b16 %v974_v23, %v974_v23  ;;  %v1419_v14 = vsel %vm13133_vm2, %v9633_v21, %v1418_v59  ;;  %v1422_v2 = vsel %vm13133_vm2, %v1080_v6, %v1421_v35 }
 0x1b4   : > { %1420 = vst [vmem:[#allocation2 + $0x30] sm:$0x1] %v1419_v14  ;;  %1423 = vst [vmem:[#allocation2 + $0x31] sm:$0x1] %v1422_v2  ;;  %v1425_v8 = vsel %vm13133_vm2, %v9634_v63, %v1424_v42  ;;  %v1428_v0 = vsel %vm13133_vm2, %v1082_v27, %v1427_v46  ;;  %v1431_v13 = vsel %vm13133_vm2, %v9635_v32, %v1430_v52 }
 0x1b5   : > { %v1434_v21 = vsel %vm13133_vm2, %v1084_v55, %v1433_v49  ;;  %1426 = vst [vmem:[#allocation2 + $0x32] sm:$0x1] %v1425_v8  ;;  %1429 = vst [vmem:[#allocation2 + $0x33] sm:$0x1] %v1428_v0  ;;  %v1437_v3 = vsel %vm13133_vm2, %v9636_v24, %v1436_v30  ;;  %v1440_v9 = vsel %vm13133_vm2, %v1086_v45, %v1439_v50  ;;  %v15678_v24 = vld [vmem:[#allocation15_spill] sm:$0xff] }
 0x1b6   : > { %1432 = vst [vmem:[#allocation2 + $0x34] sm:$0x1] %v1431_v13  ;;  %1435 = vst [vmem:[#allocation2 + $0x35] sm:$0x1] %v1434_v21  ;;  %v1443_v22 = vsel %vm13133_vm2, %v9637_v40, %v1442_v7  ;;  %v1446_v6 = vsel %vm13133_vm2, %v1088_v37, %v1445_v39  ;;  %v1449_v63 = vsel %vm13133_vm2, %v9638_v48, %v1448_v57  ;;  %v15680_v48 = vld [vmem:[#allocation16_spill] sm:$0xff] }
 0x1b7   : > { %1438 = vst [vmem:[#allocation2 + $0x36] sm:$0x1] %v1437_v3  ;;  %1441 = vst [vmem:[#allocation2 + $0x37] sm:$0x1] %v1440_v9  ;;  %v1452_v59 = vsel %vm13133_vm2, %v1090_v44, %v1451_v18  ;;  %v1455_v58 = vsel %vm13133_vm2, %v9639_v61, %v1454_v4  ;;  %v1458_v23 = vsel %vm13133_vm2, %v1092_v10, %v1457_v54 }
 0x1b8   : > { %1444 = vst [vmem:[#allocation2 + $0x38] sm:$0x1] %v1443_v22  ;;  %1447 = vst [vmem:[#allocation2 + $0x39] sm:$0x1] %v1446_v6  ;;  %v1461_v40 = vsel %vm13133_vm2, %v9640_v12, %v1460_v51  ;;  %v1464_v27 = vsel %vm13133_vm2, %v1094_v36, %v1463_v1  ;;  %v15676_v32 = vpack.c.bf16 %v13545_v26, %v13539_v19  ;;  %v15679_v19 = vld [vmem:[#allocation14_spill] sm:$0xff] }
 0x1b9   : > { %1450 = vst [vmem:[#allocation2 + $0x3a] sm:$0x1] %v1449_v63  ;;  %1453 = vst [vmem:[#allocation2 + $0x3b] sm:$0x1] %v1452_v59  ;;  %v15677_v42 = vpack.c.bf16 %v13545_v26, %v13545_v26  ;;  %v13791_v7 = vadd.f32 %v13297_v29, %v13279_v47  ;;  %v13795_v55 = vadd.f32 %v13299_v41, %v13281_v20 }
 0x1ba   : > { %1456 = vst [vmem:[#allocation2 + $0x3c] sm:$0x1] %v1455_v58  ;;  %1459 = vst [vmem:[#allocation2 + $0x3d] sm:$0x1] %v1458_v23  ;;  %v2121_v35 = vrot.slane %v15676_v32, %v13084_v16  ;;  %v13799_v37 = vadd.f32 %v15678_v24, %v13320_v15  ;;  %v13803_v46 = vadd.f32 %v15680_v48, %v15679_v19 }
 0x1bb   : > { %v2128_v52 = vrot.slane %v15677_v42, %v13084_v16  ;;  %1462 = vst [vmem:[#allocation2 + $0x3e] sm:$0x1] %v1461_v40  ;;  %1465 = vst [vmem:[#allocation2 + $0x3f] sm:$0x1] %v1464_v27  ;;  %v532_v47 = vpack.c.bf16 %v13795_v55, %v13549_v53  ;;  %v9606_v20 = vpack.c.bf16 %v13795_v55, %v13795_v55  ;;  %v2840_v13 = vld [vmem:[#allocation2 + $0x30] sm:$0x1] }
 0x1bc   : > { %v2129_v26 = vcombine.high %v2121_v35, %v2121_v35  ;;  %v2137_v30 = vrot.slane %v2121_v35, %v13084_v16  ;;  %v1955_v29 = vpack.c.bf16 %v13799_v37, %v13791_v7  ;;  %v9705_v41 = vpack.c.bf16 %v13799_v37, %v13799_v37  ;;  %v2843_v21 = vld [vmem:[#allocation2 + $0x31] sm:$0x1]  ;;  %v2846_v22 = vld [vmem:[#allocation2 + $0x32] sm:$0x1]  ;;  %v2849_v6 = vld [vmem:[#allocation2 + $0x33] sm:$0x1] }
 0x1bd   : > { %v2130_v49 = vcombine.high %v2128_v52, %v2128_v52  ;;  %v13807_v45 = vrot.slane %v2128_v52, %v13084_v16  ;;  %v2852_v63 = vld [vmem:[#allocation2 + $0x34] sm:$0x1]  ;;  %v2855_v27 = vld [vmem:[#allocation2 + $0x35] sm:$0x1]  ;;  %v15681_v53 = vld [vmem:[#allocation17_spill] sm:$0xff] }
 0x1be   : > { %v2151_v15 = vrot.slane %v2129_v26, %v13084_v16  ;;  %v2159_v61 = vcombine.high %v2137_v30, %v2137_v30  ;;  %v2383_v50 = vunpack.i.h.s16 %v2137_v30  ;;  %v9732_v57 = vpack.i.b16 %v2137_v30, %v2137_v30  ;;  %v2858_v32 = vld [vmem:[#allocation2 + $0x36] sm:$0x1]  ;;  %v2861_v35 = vld [vmem:[#allocation2 + $0x37] sm:$0x1]  ;;  %v15683_v55 = vld [vmem:[#allocation18_spill] sm:$0xff] }
 0x1bf   : > { %v13819_v44 = vrot.slane %v2130_v49, %v13084_v16  ;;  %v13823_v10 = vcombine.high %v13807_v45, %v13807_v45  ;;  %v2391_v39 = vunpack.i.h.s16 %v13807_v45  ;;  %v9736_v12 = vpack.i.b16 %v13807_v45, %v13807_v45  ;;  %v2864_v48 = vld [vmem:[#allocation2 + $0x38] sm:$0x1]  ;;  %v2867_v26 = vld [vmem:[#allocation2 + $0x39] sm:$0x1] }
 0x1c0   : > { %v2161_v36 = vcombine.high %v2151_v15, %v2151_v15  ;;  %v2385_v2 = vunpack.i.h.s16 %v2151_v15  ;;  %v2387_v18 = vunpack.i.h.s16 %v2159_v61  ;;  %v2503_v8 = vpack.i.b16 %v2383_v50, %v2383_v50  ;;  %v2870_v49 = vld [vmem:[#allocation2 + $0x3a] sm:$0x1] }
 0x1c1   : > { %v13830_v14 = vcombine.high %v13819_v44, %v13819_v44  ;;  %v2393_v4 = vunpack.i.h.s16 %v13819_v44  ;;  %v2395_v54 = vunpack.i.h.s16 %v13823_v10  ;;  %v9733_v0 = vpack.i.b16 %v2151_v15, %v2151_v15  ;;  %v2876_v50 = vld [vmem:[#allocation2 + $0x3c] sm:$0x1] }
 0x1c2   : > { %v2389_v51 = vunpack.i.h.s16 %v2161_v36  ;;  %v2505_v3 = vpack.i.b16 %v2385_v2, %v2385_v2  ;;  %v9734_v9 = vpack.i.b16 %v2159_v61, %v2159_v61  ;;  %v2507_v59 = vpack.i.b16 %v2387_v18, %v2387_v18  ;;  %v2873_v61 = vld [vmem:[#allocation2 + $0x3b] sm:$0x1]  ;;  %v2882_v2 = vld [vmem:[#allocation2 + $0x3e] sm:$0x1]  ;;  %v2885_v18 = vld [vmem:[#allocation2 + $0x3f] sm:$0x1] }
 0x1c3   : > { %v2397_v1 = vunpack.i.h.s16 %v13830_v14  ;;  %v9735_v58 = vpack.i.b16 %v2161_v36, %v2161_v36  ;;  %v2511_v23 = vpack.i.b16 %v2391_v39, %v2391_v39  ;;  %v9737_v40 = vpack.i.b16 %v13819_v44, %v13819_v44  ;;  %v2879_v39 = vld [vmem:[#allocation2 + $0x3d] sm:$0x1] }
 0x1c4   : > { %v2509_v42 = vpack.i.b16 %v2389_v51, %v2389_v51  ;;  %v2513_v52 = vpack.i.b16 %v2393_v4, %v2393_v4  ;;  %v9738_v24 = vpack.i.b16 %v13823_v10, %v13823_v10  ;;  %v2515_v19 = vpack.i.b16 %v2395_v54, %v2395_v54 }
 0x1c5   : > { %v9739_v30 = vpack.i.b16 %v13830_v14, %v13830_v14  ;;  %v2517_v45 = vpack.i.b16 %v2397_v1, %v2397_v1  ;;  %v2841_v15 = vsel %vm13266_vm4, %v9732_v57, %v2840_v13  ;;  %v2844_v44 = vsel %vm13266_vm4, %v2503_v8, %v2843_v21 }
 0x1c6   : > { %2842 = vst [vmem:[#allocation2 + $0x30] sm:$0x1] %v2841_v15  ;;  %2845 = vst [vmem:[#allocation2 + $0x31] sm:$0x1] %v2844_v44  ;;  %v2847_v10 = vsel %vm13266_vm4, %v9733_v0, %v2846_v22  ;;  %v2850_v36 = vsel %vm13266_vm4, %v2505_v3, %v2849_v6  ;;  %v2853_v14 = vsel %vm13266_vm4, %v9734_v9, %v2852_v63 }
 0x1c7   : > { %v2856_v57 = vsel %vm13266_vm4, %v2507_v59, %v2855_v27  ;;  %2848 = vst [vmem:[#allocation2 + $0x32] sm:$0x1] %v2847_v10  ;;  %2851 = vst [vmem:[#allocation2 + $0x33] sm:$0x1] %v2850_v36  ;;  %v2859_v4 = vsel %vm13266_vm4, %v9735_v58, %v2858_v32  ;;  %v2862_v54 = vsel %vm13266_vm4, %v2509_v42, %v2861_v35  ;;  %v1466_v36 = vld [vmem:[#allocation2 + $0x40] sm:$0x1] }
 0x1c8   : > { %2854 = vst [vmem:[#allocation2 + $0x34] sm:$0x1] %v2853_v14  ;;  %2857 = vst [vmem:[#allocation2 + $0x35] sm:$0x1] %v2856_v57  ;;  %v2865_v8 = vsel %vm13266_vm4, %v9736_v12, %v2864_v48  ;;  %v2868_v0 = vsel %vm13266_vm4, %v2511_v23, %v2867_v26  ;;  %v2871_v13 = vsel %vm13266_vm4, %v9737_v40, %v2870_v49 }
 0x1c9   : > { %2860 = vst [vmem:[#allocation2 + $0x36] sm:$0x1] %v2859_v4  ;;  %2863 = vst [vmem:[#allocation2 + $0x37] sm:$0x1] %v2862_v54  ;;  %v2874_v21 = vsel %vm13266_vm4, %v2513_v52, %v2873_v61  ;;  %v2877_v51 = vsel %vm13266_vm4, %v9738_v24, %v2876_v50  ;;  %v2880_v1 = vsel %vm13266_vm4, %v2515_v19, %v2879_v39  ;;  %v1469_v4 = vld [vmem:[#allocation2 + $0x41] sm:$0x1] }
 0x1ca   : > { %2866 = vst [vmem:[#allocation2 + $0x38] sm:$0x1] %v2865_v8  ;;  %2869 = vst [vmem:[#allocation2 + $0x39] sm:$0x1] %v2868_v0  ;;  %v2883_v12 = vsel %vm13266_vm4, %v9739_v30, %v2882_v2  ;;  %v2886_v3 = vsel %vm13266_vm4, %v2517_v45, %v2885_v18  ;;  %v747_v9 = vrot.slane %v532_v47, %v13084_v16  ;;  %v15682_v47 = vld [vmem:[#allocation20_spill] sm:$0xff] }
 0x1cb   : > { %2872 = vst [vmem:[#allocation2 + $0x3a] sm:$0x1] %v2871_v13  ;;  %2875 = vst [vmem:[#allocation2 + $0x3b] sm:$0x1] %v2874_v21  ;;  %v754_v22 = vrot.slane %v9606_v20, %v13084_v16  ;;  %v13885_v6 = vrot.slane %v1955_v29, %v13084_v16  ;;  %v13891_v63 = vrot.slane %v9705_v41, %v13084_v16  ;;  %v15684_v20 = vld [vmem:[#allocation19_spill] sm:$0xff] }
 0x1cc   : > { %2878 = vst [vmem:[#allocation2 + $0x3c] sm:$0x1] %v2877_v51  ;;  %2881 = vst [vmem:[#allocation2 + $0x3d] sm:$0x1] %v2880_v1  ;;  %v13895_v59 = vadd.f32 %v15682_v47, %v15681_v53  ;;  %v13899_v58 = vadd.f32 %v15684_v20, %v15683_v55  ;;  %v755_v23 = vcombine.high %v747_v9, %v747_v9  ;;  %v1472_v54 = vld [vmem:[#allocation2 + $0x42] sm:$0x1] }
 0x1cd   : > { %2884 = vst [vmem:[#allocation2 + $0x3e] sm:$0x1] %v2883_v12  ;;  %2887 = vst [vmem:[#allocation2 + $0x3f] sm:$0x1] %v2886_v3  ;;  %v756_v40 = vcombine.high %v754_v22, %v754_v22  ;;  %v763_v7 = vrot.slane %v747_v9, %v13084_v16  ;;  %v13903_v29 = vrot.slane %v754_v22, %v13084_v16  ;;  %v1478_v8 = vld [vmem:[#allocation2 + $0x44] sm:$0x1] }
 0x1ce   : > { %v2178_v37 = vcombine.high %v13885_v6, %v13885_v6  ;;  %v2179_v41 = vcombine.high %v13891_v63, %v13891_v63  ;;  %v13911_v27 = vrot.slane %v13885_v6, %v13084_v16  ;;  %v13915_v32 = vrot.slane %v13891_v63, %v13084_v16  ;;  %v1490_v0 = vld [vmem:[#allocation2 + $0x48] sm:$0x1]  ;;  %v1475_v12 = vld [vmem:[#allocation2 + $0x43] sm:$0x1]  ;;  %v1481_v3 = vld [vmem:[#allocation2 + $0x45] sm:$0x1] }
 0x1cf   : > { %v777_v35 = vrot.slane %v755_v23, %v13084_v16  ;;  %v13919_v42 = vrot.slane %v756_v40, %v13084_v16  ;;  %v785_v52 = vcombine.high %v763_v7, %v763_v7  ;;  %v13923_v24 = vcombine.high %v13903_v29, %v13903_v29  ;;  %v1484_v9 = vld [vmem:[#allocation2 + $0x46] sm:$0x1]  ;;  %v1487_v20 = vld [vmem:[#allocation2 + $0x47] sm:$0x1]  ;;  %v1493_v23 = vld [vmem:[#allocation2 + $0x49] sm:$0x1] }
 0x1d0   : > { %v976_v19 = vunpack.i.h.s16 %v763_v7  ;;  %v984_v48 = vunpack.i.h.s16 %v13903_v29  ;;  %v9641_v26 = vpack.i.b16 %v763_v7, %v763_v7  ;;  %v9645_v49 = vpack.i.b16 %v13903_v29, %v13903_v29  ;;  %v1496_v40 = vld [vmem:[#allocation2 + $0x4a] sm:$0x1] }
 0x1d1   : > { %v787_v30 = vcombine.high %v777_v35, %v777_v35  ;;  %v13930_v45 = vcombine.high %v13919_v42, %v13919_v42  ;;  %v978_v15 = vunpack.i.h.s16 %v777_v35  ;;  %v980_v44 = vunpack.i.h.s16 %v785_v52 }
 0x1d2   : > { %v986_v61 = vunpack.i.h.s16 %v13919_v42  ;;  %v988_v50 = vunpack.i.h.s16 %v13923_v24  ;;  %v1096_v39 = vpack.i.b16 %v976_v19, %v976_v19  ;;  %v9642_v10 = vpack.i.b16 %v777_v35, %v777_v35  ;;  %v1502_v19 = vld [vmem:[#allocation2 + $0x4c] sm:$0x1] }
 0x1d3   : > { %v982_v14 = vunpack.i.h.s16 %v787_v30  ;;  %v990_v57 = vunpack.i.h.s16 %v13930_v45  ;;  %v1098_v2 = vpack.i.b16 %v978_v15, %v978_v15  ;;  %v9643_v18 = vpack.i.b16 %v785_v52, %v785_v52  ;;  %v1499_v52 = vld [vmem:[#allocation2 + $0x4b] sm:$0x1]  ;;  %v1508_v15 = vld [vmem:[#allocation2 + $0x4e] sm:$0x1] }
 0x1d4   : > { %v1100_v13 = vpack.i.b16 %v980_v44, %v980_v44  ;;  %v9644_v21 = vpack.i.b16 %v787_v30, %v787_v30  ;;  %v1104_v51 = vpack.i.b16 %v984_v48, %v984_v48  ;;  %v9646_v1 = vpack.i.b16 %v13919_v42, %v13919_v42  ;;  %v1505_v48 = vld [vmem:[#allocation2 + $0x4d] sm:$0x1]  ;;  %v1511_v44 = vld [vmem:[#allocation2 + $0x4f] sm:$0x1] }
 0x1d5   : > { %v1102_v22 = vpack.i.b16 %v982_v14, %v982_v14  ;;  %v1106_v53 = vpack.i.b16 %v986_v61, %v986_v61  ;;  %v9647_v47 = vpack.i.b16 %v13923_v24, %v13923_v24  ;;  %v1108_v55 = vpack.i.b16 %v988_v50, %v988_v50 }
 0x1d6   : > { %v9648_v7 = vpack.i.b16 %v13930_v45, %v13930_v45  ;;  %v1110_v29 = vpack.i.b16 %v990_v57, %v990_v57  ;;  %v1467_v35 = vsel %vm13133_vm2, %v9641_v26, %v1466_v36  ;;  %v1470_v42 = vsel %vm13133_vm2, %v1096_v39, %v1469_v4 }
 0x1d7   : > { %1468 = vst [vmem:[#allocation2 + $0x40] sm:$0x1] %v1467_v35  ;;  %1471 = vst [vmem:[#allocation2 + $0x41] sm:$0x1] %v1470_v42  ;;  %v1473_v24 = vsel %vm13133_vm2, %v9642_v10, %v1472_v54  ;;  %v1476_v30 = vsel %vm13133_vm2, %v1098_v2, %v1475_v12  ;;  %v1479_v45 = vsel %vm13133_vm2, %v9643_v18, %v1478_v8  ;;  %v2407_v6 = vunpack.i.h.s16 %v13915_v32 }
 0x1d8   : > { %v1482_v26 = vsel %vm13133_vm2, %v1100_v13, %v1481_v3  ;;  %1474 = vst [vmem:[#allocation2 + $0x42] sm:$0x1] %v1473_v24  ;;  %1477 = vst [vmem:[#allocation2 + $0x43] sm:$0x1] %v1476_v30  ;;  %v1485_v61 = vsel %vm13133_vm2, %v9644_v21, %v1484_v9  ;;  %v1488_v50 = vsel %vm13133_vm2, %v1102_v22, %v1487_v20  ;;  %v2399_v13 = vunpack.i.h.s16 %v13911_v27 }
 0x1d9   : > { %1480 = vst [vmem:[#allocation2 + $0x44] sm:$0x1] %v1479_v45  ;;  %1483 = vst [vmem:[#allocation2 + $0x45] sm:$0x1] %v1482_v26  ;;  %v1491_v39 = vsel %vm13133_vm2, %v9645_v49, %v1490_v0  ;;  %v1494_v10 = vsel %vm13133_vm2, %v1104_v51, %v1493_v23  ;;  %v1497_v36 = vsel %vm13133_vm2, %v9646_v1, %v1496_v40 }
 0x1da   : > { %1486 = vst [vmem:[#allocation2 + $0x46] sm:$0x1] %v1485_v61  ;;  %1489 = vst [vmem:[#allocation2 + $0x47] sm:$0x1] %v1488_v50  ;;  %v1500_v14 = vsel %vm13133_vm2, %v1106_v53, %v1499_v52  ;;  %v1503_v57 = vsel %vm13133_vm2, %v9647_v47, %v1502_v19  ;;  %v1506_v2 = vsel %vm13133_vm2, %v1108_v55, %v1505_v48 }
 0x1db   : > { %1492 = vst [vmem:[#allocation2 + $0x48] sm:$0x1] %v1491_v39  ;;  %1495 = vst [vmem:[#allocation2 + $0x49] sm:$0x1] %v1494_v10  ;;  %v1509_v49 = vsel %vm13133_vm2, %v9648_v7, %v1508_v15  ;;  %v1512_v18 = vsel %vm13133_vm2, %v1110_v29, %v1511_v44  ;;  %v2200_v4 = vrot.slane %v2178_v37, %v13084_v16 }
 0x1dc   : > { %1498 = vst [vmem:[#allocation2 + $0x4a] sm:$0x1] %v1497_v36  ;;  %1501 = vst [vmem:[#allocation2 + $0x4b] sm:$0x1] %v1500_v14  ;;  %v13981_v54 = vrot.slane %v2179_v41, %v13084_v16  ;;  %v2208_v8 = vcombine.high %v13911_v27, %v13911_v27  ;;  %v13987_v0 = vcombine.high %v13915_v32, %v13915_v32 }
 0x1dd   : > { %1504 = vst [vmem:[#allocation2 + $0x4c] sm:$0x1] %v1503_v57  ;;  %1507 = vst [vmem:[#allocation2 + $0x4d] sm:$0x1] %v1506_v2  ;;  %v2210_v37 = vcombine.high %v2200_v4, %v2200_v4  ;;  %v2401_v63 = vunpack.i.h.s16 %v2200_v4  ;;  %v9740_v12 = vpack.i.b16 %v13911_v27, %v13911_v27  ;;  %v2519_v3 = vpack.i.b16 %v2399_v13, %v2399_v13 }
 0x1de   : > { %1510 = vst [vmem:[#allocation2 + $0x4e] sm:$0x1] %v1509_v49  ;;  %1513 = vst [vmem:[#allocation2 + $0x4f] sm:$0x1] %v1512_v18  ;;  %v13993_v21 = vcombine.high %v13981_v54, %v13981_v54  ;;  %v2409_v41 = vunpack.i.h.s16 %v13981_v54  ;;  %v2403_v51 = vunpack.i.h.s16 %v2208_v8  ;;  %v2411_v1 = vunpack.i.h.s16 %v13987_v0  ;;  %v2888_v55 = vld [vmem:[#allocation2 + $0x40] sm:$0x1] }
 0x1df   : > { %v2405_v9 = vunpack.i.h.s16 %v2210_v37  ;;  %v9741_v53 = vpack.i.b16 %v2200_v4, %v2200_v4  ;;  %v2521_v47 = vpack.i.b16 %v2401_v63, %v2401_v63  ;;  %v2891_v20 = vld [vmem:[#allocation2 + $0x41] sm:$0x1]  ;;  %v9742_v23 = vpack.i.b16 %v2208_v8, %v2208_v8  ;;  %v2894_v35 = vld [vmem:[#allocation2 + $0x42] sm:$0x1]  ;;  %v2897_v42 = vld [vmem:[#allocation2 + $0x43] sm:$0x1] }
 0x1e0   : > { %v2413_v22 = vunpack.i.h.s16 %v13993_v21  ;;  %v2523_v40 = vpack.i.b16 %v2403_v51, %v2403_v51  ;;  %v9743_v7 = vpack.i.b16 %v2210_v37, %v2210_v37  ;;  %v9744_v29 = vpack.i.b16 %v13915_v32, %v13915_v32  ;;  %v2900_v52 = vld [vmem:[#allocation2 + $0x44] sm:$0x1]  ;;  %v2903_v30 = vld [vmem:[#allocation2 + $0x45] sm:$0x1] }
 0x1e1   : > { %v2525_v19 = vpack.i.b16 %v2405_v9, %v2405_v9  ;;  %v2527_v48 = vpack.i.b16 %v2407_v6, %v2407_v6  ;;  %v9745_v27 = vpack.i.b16 %v13981_v54, %v13981_v54  ;;  %v2529_v24 = vpack.i.b16 %v2409_v41, %v2409_v41  ;;  %v2906_v45 = vld [vmem:[#allocation2 + $0x46] sm:$0x1]  ;;  %v2909_v26 = vld [vmem:[#allocation2 + $0x47] sm:$0x1] }
 0x1e2   : > { %v9746_v15 = vpack.i.b16 %v13987_v0, %v13987_v0  ;;  %v2531_v44 = vpack.i.b16 %v2411_v1, %v2411_v1  ;;  %v9747_v61 = vpack.i.b16 %v13993_v21, %v13993_v21  ;;  %v2533_v32 = vpack.i.b16 %v2413_v22, %v2413_v22  ;;  %v2912_v50 = vld [vmem:[#allocation2 + $0x48] sm:$0x1]  ;;  %v2915_v39 = vld [vmem:[#allocation2 + $0x49] sm:$0x1] }
 0x1e3   : > { %v2918_v10 = vld [vmem:[#allocation2 + $0x4a] sm:$0x1]  ;;  %v2889_v36 = vsel %vm13266_vm4, %v9740_v12, %v2888_v55  ;;  %v2892_v14 = vsel %vm13266_vm4, %v2519_v3, %v2891_v20  ;;  %v2895_v57 = vsel %vm13266_vm4, %v9741_v53, %v2894_v35  ;;  %v2898_v2 = vsel %vm13266_vm4, %v2521_v47, %v2897_v42  ;;  %v2921_v49 = vld [vmem:[#allocation2 + $0x4b] sm:$0x1]  ;;  %v15685_v55 = vld [vmem:[#allocation21_spill] sm:$0xff] }
 0x1e4   : > { %v2924_v18 = vld [vmem:[#allocation2 + $0x4c] sm:$0x1]  ;;  %v2927_v4 = vld [vmem:[#allocation2 + $0x4d] sm:$0x1]  ;;  %2890 = vst [vmem:[#allocation2 + $0x40] sm:$0x1] %v2889_v36  ;;  %v2901_v54 = vsel %vm13266_vm4, %v9742_v23, %v2900_v52  ;;  %v2904_v8 = vsel %vm13266_vm4, %v2523_v40, %v2903_v30  ;;  %v2907_v0 = vsel %vm13266_vm4, %v9743_v7, %v2906_v45  ;;  %v2910_v13 = vsel %vm13266_vm4, %v2525_v19, %v2909_v26 }
 0x1e5   : > { %2893 = vst [vmem:[#allocation2 + $0x41] sm:$0x1] %v2892_v14  ;;  %2896 = vst [vmem:[#allocation2 + $0x42] sm:$0x1] %v2895_v57  ;;  %v2930_v6 = vld [vmem:[#allocation2 + $0x4e] sm:$0x1]  ;;  %v2913_v21 = vsel %vm13266_vm4, %v9744_v29, %v2912_v50  ;;  %v2916_v63 = vsel %vm13266_vm4, %v2527_v48, %v2915_v39  ;;  %v2919_v41 = vsel %vm13266_vm4, %v9745_v27, %v2918_v10 }
 0x1e6   : > { %2899 = vst [vmem:[#allocation2 + $0x43] sm:$0x1] %v2898_v2  ;;  %v2933_v37 = vld [vmem:[#allocation2 + $0x4f] sm:$0x1]  ;;  %2902 = vst [vmem:[#allocation2 + $0x44] sm:$0x1] %v2901_v54  ;;  %v2922_v51 = vsel %vm13266_vm4, %v2529_v24, %v2921_v49  ;;  %v2925_v1 = vsel %vm13266_vm4, %v9746_v15, %v2924_v18  ;;  %v2928_v12 = vsel %vm13266_vm4, %v2531_v44, %v2927_v4 }
 0x1e7   : > { %2905 = vst [vmem:[#allocation2 + $0x45] sm:$0x1] %v2904_v8  ;;  %2908 = vst [vmem:[#allocation2 + $0x46] sm:$0x1] %v2907_v0  ;;  %v2931_v3 = vsel %vm13266_vm4, %v9747_v61, %v2930_v6  ;;  %v2934_v9 = vsel %vm13266_vm4, %v2533_v32, %v2933_v37  ;;  %v533_v22 = vpack.c.bf16 %v13899_v58, %v13803_v46  ;;  %v15686_v20 = vld [vmem:[#allocation22_spill] sm:$0xff]  ;;  %v15687_v46 = vld [vmem:[#allocation23_spill] sm:$0xff] }
 0x1e8   : > { %2911 = vst [vmem:[#allocation2 + $0x47] sm:$0x1] %v2910_v13  ;;  %2914 = vst [vmem:[#allocation2 + $0x48] sm:$0x1] %v2913_v21  ;;  %v9607_v53 = vpack.c.bf16 %v13899_v58, %v13899_v58  ;;  %v10370_v47 = vadd.f32 %v13458_v33, %v13416_v28  ;;  %v10309_v23 = vadd.f32 %v15686_v20, %v15685_v55  ;;  %v1514_v18 = vld [vmem:[#allocation2 + $0x50] sm:$0x1] }
 0x1e9   : > { %2917 = vst [vmem:[#allocation2 + $0x49] sm:$0x1] %v2916_v63  ;;  %2920 = vst [vmem:[#allocation2 + $0x4a] sm:$0x1] %v2919_v41  ;;  %v14050_v40 = vadd.f32 %v13499_v34, %v13479_v25  ;;  %v10312_v7 = vadd.f32 %v13473_v17, %v13434_v62  ;;  %v14056_v29 = vadd.f32 %v13562_v38, %v13535_v11  ;;  %v1517_v13 = vld [vmem:[#allocation2 + $0x51] sm:$0x1] }
 0x1ea   : > { %2923 = vst [vmem:[#allocation2 + $0x4b] sm:$0x1] %v2922_v51  ;;  %2926 = vst [vmem:[#allocation2 + $0x4c] sm:$0x1] %v2925_v1  ;;  %v14060_v58 = vadd.f32 %v13517_v60, %v15687_v46  ;;  %v796_v28 = vrot.slane %v533_v22, %v13084_v16  ;;  %v803_v33 = vrot.slane %v9607_v53, %v13084_v16  ;;  %v1520_v6 = vld [vmem:[#allocation2 + $0x52] sm:$0x1] }
 0x1eb   : > { %2929 = vst [vmem:[#allocation2 + $0x4d] sm:$0x1] %v2928_v12  ;;  %2932 = vst [vmem:[#allocation2 + $0x4e] sm:$0x1] %v2931_v3  ;;  %v1956_v35 = vpack.c.bf16 %v10370_v47, %v13895_v59  ;;  %v9706_v42 = vpack.c.bf16 %v10370_v47, %v10370_v47  ;;  %v534_v25 = vpack.c.bf16 %v10312_v7, %v10309_v23  ;;  %v1526_v37 = vld [vmem:[#allocation2 + $0x54] sm:$0x1] }
 0x1ec   : > { %2935 = vst [vmem:[#allocation2 + $0x4f] sm:$0x1] %v2934_v9  ;;  %v9608_v34 = vpack.c.bf16 %v10312_v7, %v10312_v7  ;;  %v1957_v62 = vpack.c.bf16 %v14056_v29, %v14050_v40  ;;  %v9707_v17 = vpack.c.bf16 %v14056_v29, %v14056_v29  ;;  %v804_v11 = vcombine.high %v796_v28, %v796_v28  ;;  %v1538_v21 = vld [vmem:[#allocation2 + $0x58] sm:$0x1]  ;;  %v1523_v12 = vld [vmem:[#allocation2 + $0x53] sm:$0x1] }
 0x1ed   : > { %v805_v38 = vcombine.high %v803_v33, %v803_v33  ;;  %v812_v60 = vrot.slane %v796_v28, %v13084_v16  ;;  %v14071_v52 = vrot.slane %v803_v33, %v13084_v16  ;;  %v14074_v19 = vrot.slane %v1956_v35, %v13084_v16  ;;  %v1529_v3 = vld [vmem:[#allocation2 + $0x55] sm:$0x1]  ;;  %v1532_v9 = vld [vmem:[#allocation2 + $0x56] sm:$0x1]  ;;  %v1535_v20 = vld [vmem:[#allocation2 + $0x57] sm:$0x1] }
 0x1ee   : > { %v14077_v59 = vrot.slane %v9706_v42, %v13084_v16  ;;  %v14080_v48 = vrot.slane %v534_v25, %v13084_v16  ;;  %v14083_v27 = vrot.slane %v9608_v34, %v13084_v16  ;;  %v826_v24 = vrot.slane %v804_v11, %v13084_v16  ;;  %v1541_v23 = vld [vmem:[#allocation2 + $0x59] sm:$0x1]  ;;  %v1544_v7 = vld [vmem:[#allocation2 + $0x5a] sm:$0x1]  ;;  %v1547_v42 = vld [vmem:[#allocation2 + $0x5b] sm:$0x1] }
 0x1ef   : > { %v14087_v30 = vrot.slane %v805_v38, %v13084_v16  ;;  %v834_v45 = vcombine.high %v812_v60, %v812_v60  ;;  %v14091_v26 = vcombine.high %v14071_v52, %v14071_v52  ;;  %v992_v15 = vunpack.i.h.s16 %v812_v60  ;;  %v1550_v25 = vld [vmem:[#allocation2 + $0x5c] sm:$0x1]  ;;  %v1553_v34 = vld [vmem:[#allocation2 + $0x5d] sm:$0x1] }
 0x1f0   : > { %v1000_v44 = vunpack.i.h.s16 %v14071_v52  ;;  %v9649_v61 = vpack.i.b16 %v812_v60, %v812_v60  ;;  %v9653_v32 = vpack.i.b16 %v14071_v52, %v14071_v52  ;;  %v836_v50 = vcombine.high %v826_v24, %v826_v24 }
 0x1f1   : > { %v14098_v39 = vcombine.high %v14087_v30, %v14087_v30  ;;  %v994_v10 = vunpack.i.h.s16 %v826_v24  ;;  %v996_v36 = vunpack.i.h.s16 %v834_v45  ;;  %v1002_v14 = vunpack.i.h.s16 %v14087_v30 }
 0x1f2   : > { %v1004_v57 = vunpack.i.h.s16 %v14091_v26  ;;  %v1112_v2 = vpack.i.b16 %v992_v15, %v992_v15  ;;  %v9650_v49 = vpack.i.b16 %v826_v24, %v826_v24  ;;  %v998_v4 = vunpack.i.h.s16 %v836_v50  ;;  %v1556_v24 = vld [vmem:[#allocation2 + $0x5e] sm:$0x1] }
 0x1f3   : > { %v1006_v54 = vunpack.i.h.s16 %v14098_v39  ;;  %v1114_v8 = vpack.i.b16 %v994_v10, %v994_v10  ;;  %v9651_v0 = vpack.i.b16 %v834_v45, %v834_v45  ;;  %v1116_v63 = vpack.i.b16 %v996_v36, %v996_v36 }
 0x1f4   : > { %v9652_v41 = vpack.i.b16 %v836_v50, %v836_v50  ;;  %v1120_v51 = vpack.i.b16 %v1000_v44, %v1000_v44  ;;  %v9654_v1 = vpack.i.b16 %v14087_v30, %v14087_v30  ;;  %v1118_v22 = vpack.i.b16 %v998_v4, %v998_v4  ;;  %v1559_v30 = vld [vmem:[#allocation2 + $0x5f] sm:$0x1] }
 0x1f5   : > { %v1122_v53 = vpack.i.b16 %v1002_v14, %v1002_v14  ;;  %v9655_v47 = vpack.i.b16 %v14091_v26, %v14091_v26  ;;  %v1124_v55 = vpack.i.b16 %v1004_v57, %v1004_v57  ;;  %v9656_v46 = vpack.i.b16 %v14098_v39, %v14098_v39 }
 0x1f6   : > { %v1126_v28 = vpack.i.b16 %v1006_v54, %v1006_v54  ;;  %v1515_v33 = vsel %vm13133_vm2, %v9649_v61, %v1514_v18  ;;  %v1518_v35 = vsel %vm13133_vm2, %v1112_v2, %v1517_v13  ;;  %v1521_v11 = vsel %vm13133_vm2, %v9650_v49, %v1520_v6 }
 0x1f7   : > { %1516 = vst [vmem:[#allocation2 + $0x50] sm:$0x1] %v1515_v33  ;;  %1519 = vst [vmem:[#allocation2 + $0x51] sm:$0x1] %v1518_v35  ;;  %v1524_v38 = vsel %vm13133_vm2, %v1114_v8, %v1523_v12  ;;  %v1527_v60 = vsel %vm13133_vm2, %v9651_v0, %v1526_v37  ;;  %v1530_v52 = vsel %vm13133_vm2, %v1116_v63, %v1529_v3 }
 0x1f8   : > { %1522 = vst [vmem:[#allocation2 + $0x52] sm:$0x1] %v1521_v11  ;;  %1525 = vst [vmem:[#allocation2 + $0x53] sm:$0x1] %v1524_v38  ;;  %v1533_v45 = vsel %vm13133_vm2, %v9652_v41, %v1532_v9  ;;  %v1536_v26 = vsel %vm13133_vm2, %v1118_v22, %v1535_v20  ;;  %v1539_v15 = vsel %vm13133_vm2, %v9653_v32, %v1538_v21 }
 0x1f9   : > { %1528 = vst [vmem:[#allocation2 + $0x54] sm:$0x1] %v1527_v60  ;;  %1531 = vst [vmem:[#allocation2 + $0x55] sm:$0x1] %v1530_v52  ;;  %v1542_v44 = vsel %vm13133_vm2, %v1120_v51, %v1541_v23  ;;  %v1545_v61 = vsel %vm13133_vm2, %v9654_v1, %v1544_v7  ;;  %v1548_v50 = vsel %vm13133_vm2, %v1122_v53, %v1547_v42 }
 0x1fa   : > { %1534 = vst [vmem:[#allocation2 + $0x56] sm:$0x1] %v1533_v45  ;;  %1537 = vst [vmem:[#allocation2 + $0x57] sm:$0x1] %v1536_v26  ;;  %v1551_v39 = vsel %vm13133_vm2, %v9655_v47, %v1550_v25  ;;  %v1554_v10 = vsel %vm13133_vm2, %v1124_v55, %v1553_v34  ;;  %v1557_v32 = vsel %vm13133_vm2, %v9656_v46, %v1556_v24 }
 0x1fb   : > { %1540 = vst [vmem:[#allocation2 + $0x58] sm:$0x1] %v1539_v15  ;;  %1543 = vst [vmem:[#allocation2 + $0x59] sm:$0x1] %v1542_v44  ;;  %v1560_v36 = vsel %vm13133_vm2, %v1126_v28, %v1559_v30  ;;  %v2227_v14 = vcombine.high %v14074_v19, %v14074_v19  ;;  %v2228_v57 = vcombine.high %v14077_v59, %v14077_v59 }
 0x1fc   : > { %1546 = vst [vmem:[#allocation2 + $0x5a] sm:$0x1] %v1545_v61  ;;  %1549 = vst [vmem:[#allocation2 + $0x5b] sm:$0x1] %v1548_v50  ;;  %v2235_v2 = vrot.slane %v14074_v19, %v13084_v16  ;;  %v14149_v49 = vrot.slane %v14077_v59, %v13084_v16  ;;  %v853_v18 = vcombine.high %v14080_v48, %v14080_v48 }
 0x1fd   : > { %1552 = vst [vmem:[#allocation2 + $0x5c] sm:$0x1] %v1551_v39  ;;  %1555 = vst [vmem:[#allocation2 + $0x5d] sm:$0x1] %v1554_v10  ;;  %v854_v4 = vcombine.high %v14083_v27, %v14083_v27  ;;  %v2249_v54 = vrot.slane %v2227_v14, %v13084_v16  ;;  %v14157_v8 = vrot.slane %v2228_v57, %v13084_v16 }
 0x1fe   : > { %1558 = vst [vmem:[#allocation2 + $0x5e] sm:$0x1] %v1557_v32  ;;  %1561 = vst [vmem:[#allocation2 + $0x5f] sm:$0x1] %v1560_v36  ;;  %v14161_v0 = vrot.slane %v14080_v48, %v13084_v16  ;;  %v14165_v19 = vrot.slane %v14083_v27, %v13084_v16  ;;  %v2257_v59 = vcombine.high %v2235_v2, %v2235_v2  ;;  %v2415_v6 = vunpack.i.h.s16 %v2235_v2  ;;  %v2936_v22 = vld [vmem:[#allocation2 + $0x50] sm:$0x1] }
 0x1ff   : > { %v14169_v13 = vcombine.high %v14149_v49, %v14149_v49  ;;  %v2423_v37 = vunpack.i.h.s16 %v14149_v49  ;;  %v2259_v21 = vcombine.high %v2249_v54, %v2249_v54  ;;  %v14174_v63 = vcombine.high %v14157_v8, %v14157_v8  ;;  %v2939_v23 = vld [vmem:[#allocation2 + $0x51] sm:$0x1]  ;;  %v2942_v7 = vld [vmem:[#allocation2 + $0x52] sm:$0x1]  ;;  %v2945_v46 = vld [vmem:[#allocation2 + $0x53] sm:$0x1] }
 0x200   : > { %v2417_v41 = vunpack.i.h.s16 %v2249_v54  ;;  %v2425_v51 = vunpack.i.h.s16 %v14157_v8  ;;  %v2419_v1 = vunpack.i.h.s16 %v2257_v59  ;;  %v9748_v3 = vpack.i.b16 %v2235_v2, %v2235_v2  ;;  %v2948_v25 = vld [vmem:[#allocation2 + $0x54] sm:$0x1]  ;;  %v2951_v34 = vld [vmem:[#allocation2 + $0x55] sm:$0x1] }
 0x201   : > { %v2427_v12 = vunpack.i.h.s16 %v14169_v13  ;;  %v2535_v9 = vpack.i.b16 %v2415_v6, %v2415_v6  ;;  %v2421_v53 = vunpack.i.h.s16 %v2259_v21  ;;  %v2429_v47 = vunpack.i.h.s16 %v14174_v63  ;;  %v2954_v11 = vld [vmem:[#allocation2 + $0x56] sm:$0x1]  ;;  %v2957_v30 = vld [vmem:[#allocation2 + $0x57] sm:$0x1] }
 0x202   : > { %v9749_v55 = vpack.i.b16 %v2249_v54, %v2249_v54  ;;  %v2537_v20 = vpack.i.b16 %v2417_v41, %v2417_v41  ;;  %v9750_v28 = vpack.i.b16 %v2257_v59, %v2257_v59  ;;  %v2539_v33 = vpack.i.b16 %v2419_v1, %v2419_v1  ;;  %v2960_v45 = vld [vmem:[#allocation2 + $0x58] sm:$0x1]  ;;  %v2963_v26 = vld [vmem:[#allocation2 + $0x59] sm:$0x1] }
 0x203   : > { %v9751_v35 = vpack.i.b16 %v2259_v21, %v2259_v21  ;;  %v9752_v42 = vpack.i.b16 %v14149_v49, %v14149_v49  ;;  %v2541_v38 = vpack.i.b16 %v2421_v53, %v2421_v53  ;;  %v2543_v60 = vpack.i.b16 %v2423_v37, %v2423_v37  ;;  %v2966_v39 = vld [vmem:[#allocation2 + $0x5a] sm:$0x1]  ;;  %v2969_v10 = vld [vmem:[#allocation2 + $0x5b] sm:$0x1] }
 0x204   : > { %v9753_v52 = vpack.i.b16 %v14157_v8, %v14157_v8  ;;  %v2545_v24 = vpack.i.b16 %v2425_v51, %v2425_v51  ;;  %v9754_v15 = vpack.i.b16 %v14169_v13, %v14169_v13  ;;  %v2547_v44 = vpack.i.b16 %v2427_v12, %v2427_v12  ;;  %v2972_v32 = vld [vmem:[#allocation2 + $0x5c] sm:$0x1]  ;;  %v2975_v49 = vld [vmem:[#allocation2 + $0x5d] sm:$0x1] }
 0x205   : > { %v9755_v61 = vpack.i.b16 %v14174_v63, %v14174_v63  ;;  %v2549_v50 = vpack.i.b16 %v2429_v47, %v2429_v47  ;;  %v2937_v36 = vsel %vm13266_vm4, %v9748_v3, %v2936_v22  ;;  %v2940_v14 = vsel %vm13266_vm4, %v2535_v9, %v2939_v23  ;;  %v2978_v54 = vld [vmem:[#allocation2 + $0x5e] sm:$0x1]  ;;  %v2981_v8 = vld [vmem:[#allocation2 + $0x5f] sm:$0x1] }
 0x206   : > { %v2943_v57 = vsel %vm13266_vm4, %v9749_v55, %v2942_v7  ;;  %v2946_v2 = vsel %vm13266_vm4, %v2537_v20, %v2945_v46  ;;  %2938 = vst [vmem:[#allocation2 + $0x50] sm:$0x1] %v2937_v36  ;;  %2941 = vst [vmem:[#allocation2 + $0x51] sm:$0x1] %v2940_v14  ;;  %v2949_v59 = vsel %vm13266_vm4, %v9750_v28, %v2948_v25  ;;  %v1008_v20 = vunpack.i.h.s16 %v14161_v0  ;;  %v1562_v25 = vld [vmem:[#allocation2 + $0x60] sm:$0x1] }
 0x207   : > { %2944 = vst [vmem:[#allocation2 + $0x52] sm:$0x1] %v2943_v57  ;;  %2947 = vst [vmem:[#allocation2 + $0x53] sm:$0x1] %v2946_v2  ;;  %v2952_v13 = vsel %vm13266_vm4, %v2539_v33, %v2951_v34  ;;  %v2955_v6 = vsel %vm13266_vm4, %v9751_v35, %v2954_v11  ;;  %v2958_v37 = vsel %vm13266_vm4, %v2541_v38, %v2957_v30  ;;  %v1016_v23 = vunpack.i.h.s16 %v14165_v19  ;;  %v1565_v34 = vld [vmem:[#allocation2 + $0x61] sm:$0x1] }
 0x208   : > { %2950 = vst [vmem:[#allocation2 + $0x54] sm:$0x1] %v2949_v59  ;;  %2953 = vst [vmem:[#allocation2 + $0x55] sm:$0x1] %v2952_v13  ;;  %v2961_v21 = vsel %vm13266_vm4, %v9752_v42, %v2960_v45  ;;  %v2964_v63 = vsel %vm13266_vm4, %v2543_v60, %v2963_v26  ;;  %v2967_v41 = vsel %vm13266_vm4, %v9753_v52, %v2966_v39  ;;  %v1568_v60 = vld [vmem:[#allocation2 + $0x62] sm:$0x1] }
 0x209   : > { %2956 = vst [vmem:[#allocation2 + $0x56] sm:$0x1] %v2955_v6  ;;  %2959 = vst [vmem:[#allocation2 + $0x57] sm:$0x1] %v2958_v37  ;;  %v2970_v51 = vsel %vm13266_vm4, %v2545_v24, %v2969_v10  ;;  %v2973_v1 = vsel %vm13266_vm4, %v9754_v15, %v2972_v32  ;;  %v2976_v12 = vsel %vm13266_vm4, %v2547_v44, %v2975_v49  ;;  %v1571_v52 = vld [vmem:[#allocation2 + $0x63] sm:$0x1] }
 0x20a   : > { %2962 = vst [vmem:[#allocation2 + $0x58] sm:$0x1] %v2961_v21  ;;  %2965 = vst [vmem:[#allocation2 + $0x59] sm:$0x1] %v2964_v63  ;;  %v2979_v3 = vsel %vm13266_vm4, %v9755_v61, %v2978_v54  ;;  %v2982_v9 = vsel %vm13266_vm4, %v2549_v50, %v2981_v8  ;;  %v875_v22 = vrot.slane %v853_v18, %v13084_v16  ;;  %v1574_v24 = vld [vmem:[#allocation2 + $0x64] sm:$0x1] }
 0x20b   : > { %2968 = vst [vmem:[#allocation2 + $0x5a] sm:$0x1] %v2967_v41  ;;  %2971 = vst [vmem:[#allocation2 + $0x5b] sm:$0x1] %v2970_v51  ;;  %v14227_v53 = vrot.slane %v854_v4, %v13084_v16  ;;  %v883_v47 = vcombine.high %v14161_v0, %v14161_v0  ;;  %v14233_v55 = vcombine.high %v14165_v19, %v14165_v19  ;;  %v1577_v44 = vld [vmem:[#allocation2 + $0x65] sm:$0x1] }
 0x20c   : > { %2974 = vst [vmem:[#allocation2 + $0x5c] sm:$0x1] %v2973_v1  ;;  %2977 = vst [vmem:[#allocation2 + $0x5d] sm:$0x1] %v2976_v12  ;;  %v9657_v48 = vpack.i.b16 %v14161_v0, %v14161_v0  ;;  %v9661_v18 = vpack.i.b16 %v14165_v19, %v14165_v19  ;;  %v885_v27 = vcombine.high %v875_v22, %v875_v22  ;;  %v1010_v7 = vunpack.i.h.s16 %v875_v22  ;;  %v1580_v61 = vld [vmem:[#allocation2 + $0x66] sm:$0x1] }
 0x20d   : > { %2980 = vst [vmem:[#allocation2 + $0x5e] sm:$0x1] %v2979_v3  ;;  %2983 = vst [vmem:[#allocation2 + $0x5f] sm:$0x1] %v2982_v9  ;;  %v14243_v4 = vcombine.high %v14227_v53, %v14227_v53  ;;  %v1012_v46 = vunpack.i.h.s16 %v883_v47  ;;  %v1018_v28 = vunpack.i.h.s16 %v14227_v53  ;;  %v1020_v33 = vunpack.i.h.s16 %v14233_v55  ;;  %v1583_v50 = vld [vmem:[#allocation2 + $0x67] sm:$0x1] }
 0x20e   : > { %v1128_v35 = vpack.i.b16 %v1008_v20, %v1008_v20  ;;  %v9658_v42 = vpack.i.b16 %v875_v22, %v875_v22  ;;  %v1014_v11 = vunpack.i.h.s16 %v885_v27  ;;  %v1130_v38 = vpack.i.b16 %v1010_v7, %v1010_v7  ;;  %v1586_v14 = vld [vmem:[#allocation2 + $0x68] sm:$0x1]  ;;  %v1589_v57 = vld [vmem:[#allocation2 + $0x69] sm:$0x1]  ;;  %v1592_v2 = vld [vmem:[#allocation2 + $0x6a] sm:$0x1] }
 0x20f   : > { %v1022_v0 = vunpack.i.h.s16 %v14243_v4  ;;  %v9659_v19 = vpack.i.b16 %v883_v47, %v883_v47  ;;  %v1132_v30 = vpack.i.b16 %v1012_v46, %v1012_v46  ;;  %v9660_v45 = vpack.i.b16 %v885_v27, %v885_v27  ;;  %v1595_v13 = vld [vmem:[#allocation2 + $0x6b] sm:$0x1]  ;;  %v1598_v6 = vld [vmem:[#allocation2 + $0x6c] sm:$0x1]  ;;  %v1601_v37 = vld [vmem:[#allocation2 + $0x6d] sm:$0x1] }
 0x210   : > { %v1136_v26 = vpack.i.b16 %v1016_v23, %v1016_v23  ;;  %v9662_v15 = vpack.i.b16 %v14227_v53, %v14227_v53  ;;  %v1134_v39 = vpack.i.b16 %v1014_v11, %v1014_v11  ;;  %v1138_v10 = vpack.i.b16 %v1018_v28, %v1018_v28  ;;  %v1604_v1 = vld [vmem:[#allocation2 + $0x6e] sm:$0x1]  ;;  %v1607_v12 = vld [vmem:[#allocation2 + $0x6f] sm:$0x1] }
 0x211   : > { %v9663_v32 = vpack.i.b16 %v14233_v55, %v14233_v55  ;;  %v1140_v36 = vpack.i.b16 %v1020_v33, %v1020_v33  ;;  %v9664_v49 = vpack.i.b16 %v14243_v4, %v14243_v4  ;;  %v1142_v54 = vpack.i.b16 %v1022_v0, %v1022_v0 }
 0x212   : > { %v1563_v8 = vsel %vm13133_vm2, %v9657_v48, %v1562_v25  ;;  %v1566_v59 = vsel %vm13133_vm2, %v1128_v35, %v1565_v34  ;;  %v1569_v21 = vsel %vm13133_vm2, %v9658_v42, %v1568_v60  ;;  %v1572_v63 = vsel %vm13133_vm2, %v1130_v38, %v1571_v52 }
 0x213   : > { %1564 = vst [vmem:[#allocation2 + $0x60] sm:$0x1] %v1563_v8  ;;  %1567 = vst [vmem:[#allocation2 + $0x61] sm:$0x1] %v1566_v59  ;;  %v1575_v41 = vsel %vm13133_vm2, %v9659_v19, %v1574_v24  ;;  %v1578_v51 = vsel %vm13133_vm2, %v1132_v30, %v1577_v44  ;;  %v1581_v3 = vsel %vm13133_vm2, %v9660_v45, %v1580_v61 }
 0x214   : > { %1570 = vst [vmem:[#allocation2 + $0x62] sm:$0x1] %v1569_v21  ;;  %1573 = vst [vmem:[#allocation2 + $0x63] sm:$0x1] %v1572_v63  ;;  %v1584_v9 = vsel %vm13133_vm2, %v1134_v39, %v1583_v50  ;;  %v1587_v22 = vsel %vm13133_vm2, %v9661_v18, %v1586_v14  ;;  %v1590_v53 = vsel %vm13133_vm2, %v1136_v26, %v1589_v57 }
 0x215   : > { %1576 = vst [vmem:[#allocation2 + $0x64] sm:$0x1] %v1575_v41  ;;  %1579 = vst [vmem:[#allocation2 + $0x65] sm:$0x1] %v1578_v51  ;;  %v1593_v47 = vsel %vm13133_vm2, %v9662_v15, %v1592_v2  ;;  %v1596_v55 = vsel %vm13133_vm2, %v1138_v10, %v1595_v13  ;;  %v1599_v20 = vsel %vm13133_vm2, %v9663_v32, %v1598_v6 }
 0x216   : > { %1582 = vst [vmem:[#allocation2 + $0x66] sm:$0x1] %v1581_v3  ;;  %1585 = vst [vmem:[#allocation2 + $0x67] sm:$0x1] %v1584_v9  ;;  %v1602_v23 = vsel %vm13133_vm2, %v1140_v36, %v1601_v37  ;;  %v1605_v48 = vsel %vm13133_vm2, %v9664_v49, %v1604_v1  ;;  %v1608_v18 = vsel %vm13133_vm2, %v1142_v54, %v1607_v12 }
 0x217   : > { %1588 = vst [vmem:[#allocation2 + $0x68] sm:$0x1] %v1587_v22  ;;  %1591 = vst [vmem:[#allocation2 + $0x69] sm:$0x1] %v1590_v53  ;;  %v2268_v27 = vrot.slane %v1957_v62, %v13084_v16  ;;  %v2275_v4 = vrot.slane %v9707_v17, %v13084_v16  ;;  %v535_v7 = vpack.c.bf16 %v14060_v58, %v14060_v58 }
 0x218   : > { %1594 = vst [vmem:[#allocation2 + $0x6a] sm:$0x1] %v1593_v47  ;;  %1597 = vst [vmem:[#allocation2 + $0x6b] sm:$0x1] %v1596_v55  ;;  %v14298_v46 = vadd.f32 %v13596_v5, %v13591_v43 }
 0x219   : > { %1600 = vst [vmem:[#allocation2 + $0x6c] sm:$0x1] %v1599_v20  ;;  %1603 = vst [vmem:[#allocation2 + $0x6d] sm:$0x1] %v1602_v23  ;;  %v2276_v28 = vcombine.high %v2268_v27, %v2268_v27  ;;  %v2277_v33 = vcombine.high %v2275_v4, %v2275_v4  ;;  %v2284_v35 = vrot.slane %v2268_v27, %v13084_v16 }
 0x21a   : > { %1606 = vst [vmem:[#allocation2 + $0x6e] sm:$0x1] %v1605_v48  ;;  %1609 = vst [vmem:[#allocation2 + $0x6f] sm:$0x1] %v1608_v18  ;;  %v14302_v40 = vrot.slane %v2275_v4, %v13084_v16  ;;  %v14305_v62 = vrot.slane %v535_v7, %v13084_v16  ;;  %v1958_v29 = vpack.c.bf16 %v14298_v46, %v14298_v46  ;;  %v2984_v26 = vld [vmem:[#allocation2 + $0x60] sm:$0x1] }
 0x21b   : > { %v2298_v17 = vrot.slane %v2276_v28, %v13084_v16  ;;  %v14311_v58 = vrot.slane %v2277_v33, %v13084_v16  ;;  %v2306_v43 = vcombine.high %v2284_v35, %v2284_v35  ;;  %v2431_v42 = vunpack.i.h.s16 %v2284_v35  ;;  %v2987_v15 = vld [vmem:[#allocation2 + $0x61] sm:$0x1]  ;;  %v2990_v10 = vld [vmem:[#allocation2 + $0x62] sm:$0x1]  ;;  %v2993_v32 = vld [vmem:[#allocation2 + $0x63] sm:$0x1] }
 0x21c   : > { %v14315_v5 = vcombine.high %v14302_v40, %v14302_v40  ;;  %v2439_v25 = vunpack.i.h.s16 %v14302_v40  ;;  %v9756_v34 = vpack.i.b16 %v2284_v35, %v2284_v35  ;;  %v9760_v11 = vpack.i.b16 %v14302_v40, %v14302_v40  ;;  %v2996_v36 = vld [vmem:[#allocation2 + $0x64] sm:$0x1]  ;;  %v2999_v54 = vld [vmem:[#allocation2 + $0x65] sm:$0x1] }
 0x21d   : > { %v2308_v0 = vcombine.high %v2298_v17, %v2298_v17  ;;  %v14322_v38 = vcombine.high %v14311_v58, %v14311_v58  ;;  %v2433_v19 = vunpack.i.h.s16 %v2298_v17  ;;  %v2435_v60 = vunpack.i.h.s16 %v2306_v43  ;;  %v3002_v8 = vld [vmem:[#allocation2 + $0x66] sm:$0x1]  ;;  %v3005_v59 = vld [vmem:[#allocation2 + $0x67] sm:$0x1] }
 0x21e   : > { %v2441_v52 = vunpack.i.h.s16 %v14311_v58  ;;  %v2443_v24 = vunpack.i.h.s16 %v14315_v5  ;;  %v2551_v30 = vpack.i.b16 %v2431_v42, %v2431_v42  ;;  %v9757_v45 = vpack.i.b16 %v2298_v17, %v2298_v17  ;;  %v3008_v63 = vld [vmem:[#allocation2 + $0x68] sm:$0x1]  ;;  %v3011_v41 = vld [vmem:[#allocation2 + $0x69] sm:$0x1] }
 0x21f   : > { %v2437_v44 = vunpack.i.h.s16 %v2308_v0  ;;  %v2445_v61 = vunpack.i.h.s16 %v14322_v38  ;;  %v2553_v50 = vpack.i.b16 %v2433_v19, %v2433_v19  ;;  %v9758_v39 = vpack.i.b16 %v2306_v43, %v2306_v43  ;;  %v3014_v51 = vld [vmem:[#allocation2 + $0x6a] sm:$0x1]  ;;  %v3017_v22 = vld [vmem:[#allocation2 + $0x6b] sm:$0x1] }
 0x220   : > { %v2555_v14 = vpack.i.b16 %v2435_v60, %v2435_v60  ;;  %v9759_v57 = vpack.i.b16 %v2308_v0, %v2308_v0  ;;  %v2559_v2 = vpack.i.b16 %v2439_v25, %v2439_v25  ;;  %v9761_v49 = vpack.i.b16 %v14311_v58, %v14311_v58  ;;  %v3020_v53 = vld [vmem:[#allocation2 + $0x6c] sm:$0x1]  ;;  %v3023_v47 = vld [vmem:[#allocation2 + $0x6d] sm:$0x1]  ;;  %v1610_v60 = vld [vmem:[#allocation2 + $0x70] sm:$0x1] }
 0x221   : > { %v2557_v13 = vpack.i.b16 %v2437_v44, %v2437_v44  ;;  %v2561_v6 = vpack.i.b16 %v2441_v52, %v2441_v52  ;;  %v9762_v37 = vpack.i.b16 %v14315_v5, %v14315_v5  ;;  %v2563_v21 = vpack.i.b16 %v2443_v24, %v2443_v24  ;;  %v3026_v18 = vld [vmem:[#allocation2 + $0x6e] sm:$0x1]  ;;  %v3029_v27 = vld [vmem:[#allocation2 + $0x6f] sm:$0x1]  ;;  %v1616_v44 = vld [vmem:[#allocation2 + $0x72] sm:$0x1] }
 0x222   : > { %v9763_v1 = vpack.i.b16 %v14322_v38, %v14322_v38  ;;  %v2565_v12 = vpack.i.b16 %v2445_v61, %v2445_v61  ;;  %v2985_v3 = vsel %vm13266_vm4, %v9756_v34, %v2984_v26  ;;  %v2988_v9 = vsel %vm13266_vm4, %v2551_v30, %v2987_v15  ;;  %v1613_v15 = vld [vmem:[#allocation2 + $0x71] sm:$0x1]  ;;  %v1622_v61 = vld [vmem:[#allocation2 + $0x74] sm:$0x1] }
 0x223   : > { %2986 = vst [vmem:[#allocation2 + $0x60] sm:$0x1] %v2985_v3  ;;  %2989 = vst [vmem:[#allocation2 + $0x61] sm:$0x1] %v2988_v9  ;;  %v2991_v55 = vsel %vm13266_vm4, %v9757_v45, %v2990_v10  ;;  %v2994_v20 = vsel %vm13266_vm4, %v2553_v50, %v2993_v32  ;;  %v2997_v23 = vsel %vm13266_vm4, %v9758_v39, %v2996_v36  ;;  %v1625_v10 = vld [vmem:[#allocation2 + $0x75] sm:$0x1] }
 0x224   : > { %v3000_v48 = vsel %vm13266_vm4, %v2555_v14, %v2999_v54  ;;  %2992 = vst [vmem:[#allocation2 + $0x62] sm:$0x1] %v2991_v55  ;;  %2995 = vst [vmem:[#allocation2 + $0x63] sm:$0x1] %v2994_v20  ;;  %v3003_v4 = vsel %vm13266_vm4, %v9759_v57, %v3002_v8  ;;  %v3006_v7 = vsel %vm13266_vm4, %v2557_v13, %v3005_v59  ;;  %v1628_v32 = vld [vmem:[#allocation2 + $0x76] sm:$0x1] }
 0x225   : > { %2998 = vst [vmem:[#allocation2 + $0x64] sm:$0x1] %v2997_v23  ;;  %3001 = vst [vmem:[#allocation2 + $0x65] sm:$0x1] %v3000_v48  ;;  %v3009_v28 = vsel %vm13266_vm4, %v9760_v11, %v3008_v63  ;;  %v3012_v33 = vsel %vm13266_vm4, %v2559_v2, %v3011_v41  ;;  %v3015_v35 = vsel %vm13266_vm4, %v9761_v49, %v3014_v51  ;;  %v1631_v13 = vld [vmem:[#allocation2 + $0x77] sm:$0x1] }
 0x226   : > { %3004 = vst [vmem:[#allocation2 + $0x66] sm:$0x1] %v3003_v4  ;;  %3007 = vst [vmem:[#allocation2 + $0x67] sm:$0x1] %v3006_v7  ;;  %v3018_v40 = vsel %vm13266_vm4, %v2561_v6, %v3017_v22  ;;  %v3021_v17 = vsel %vm13266_vm4, %v9762_v37, %v3020_v53  ;;  %v3024_v58 = vsel %vm13266_vm4, %v2563_v21, %v3023_v47 }
 0x227   : > { %3010 = vst [vmem:[#allocation2 + $0x68] sm:$0x1] %v3009_v28  ;;  %3013 = vst [vmem:[#allocation2 + $0x69] sm:$0x1] %v3012_v33  ;;  %v3027_v43 = vsel %vm13266_vm4, %v9763_v1, %v3026_v18  ;;  %v3030_v5 = vsel %vm13266_vm4, %v2565_v12, %v3029_v27  ;;  %v894_v42 = vcombine.high %v14305_v62, %v14305_v62 }
 0x228   : > { %3016 = vst [vmem:[#allocation2 + $0x6a] sm:$0x1] %v3015_v35  ;;  %3019 = vst [vmem:[#allocation2 + $0x6b] sm:$0x1] %v3018_v40  ;;  %v901_v25 = vrot.slane %v14305_v62, %v13084_v16  ;;  %v2316_v34 = vrot.slane %v1958_v29, %v13084_v16  ;;  %v1619_v29 = vld [vmem:[#allocation2 + $0x73] sm:$0x1] }
 0x229   : > { %3022 = vst [vmem:[#allocation2 + $0x6c] sm:$0x1] %v3021_v17  ;;  %3025 = vst [vmem:[#allocation2 + $0x6d] sm:$0x1] %v3024_v58  ;;  %v908_v11 = vrot.slane %v894_v42, %v13084_v16 }
 0x22a   : > { %3028 = vst [vmem:[#allocation2 + $0x6e] sm:$0x1] %v3027_v43  ;;  %3031 = vst [vmem:[#allocation2 + $0x6f] sm:$0x1] %v3030_v5  ;;  %v909_v0 = vcombine.high %v901_v25, %v901_v25  ;;  %v1024_v38 = vunpack.i.h.s16 %v901_v25  ;;  %v9665_v19 = vpack.i.b16 %v901_v25, %v901_v25  ;;  %v2317_v52 = vcombine.high %v2316_v34, %v2316_v34 }
 0x22b   : > { %v2324_v24 = vrot.slane %v2316_v34, %v13084_v16  ;;  %v910_v30 = vcombine.high %v908_v11, %v908_v11  ;;  %v1026_v45 = vunpack.i.h.s16 %v908_v11  ;;  %v9666_v50 = vpack.i.b16 %v908_v11, %v908_v11 }
 0x22c   : > { %v1028_v26 = vunpack.i.h.s16 %v909_v0  ;;  %v1144_v62 = vpack.i.b16 %v1024_v38, %v1024_v38  ;;  %v9667_v39 = vpack.i.b16 %v909_v0, %v909_v0  ;;  %v1611_v46 = vsel %vm13133_vm2, %v9665_v19, %v1610_v60 }
 0x22d   : > { %v2331_v36 = vrot.slane %v2317_v52, %v13084_v16  ;;  %v1030_v14 = vunpack.i.h.s16 %v910_v30  ;;  %v1146_v57 = vpack.i.b16 %v1026_v45, %v1026_v45  ;;  %v9668_v49 = vpack.i.b16 %v910_v30, %v910_v30  ;;  %1612 = vst [vmem:[#allocation2 + $0x70] sm:$0x1] %v1611_v46 }
 0x22e   : > { %v1148_v2 = vpack.i.b16 %v1028_v26, %v1028_v26  ;;  %v1614_v54 = vsel %vm13133_vm2, %v1144_v62, %v1613_v15  ;;  %v1617_v8 = vsel %vm13133_vm2, %v9666_v50, %v1616_v44  ;;  %v1623_v59 = vsel %vm13133_vm2, %v9667_v39, %v1622_v61 }
 0x22f   : > { %v2332_v6 = vcombine.high %v2324_v24, %v2324_v24  ;;  %v1150_v37 = vpack.i.b16 %v1030_v14, %v1030_v14  ;;  %1615 = vst [vmem:[#allocation2 + $0x71] sm:$0x1] %v1614_v54  ;;  %1618 = vst [vmem:[#allocation2 + $0x72] sm:$0x1] %v1617_v8  ;;  %v1620_v16 = vsel %vm13133_vm2, %v1146_v57, %v1619_v29  ;;  %v2447_v1 = vunpack.i.h.s16 %v2324_v24 }
 0x230   : > { %1624 = vst [vmem:[#allocation2 + $0x74] sm:$0x1] %v1623_v59  ;;  %v1626_v21 = vsel %vm13133_vm2, %v1148_v2, %v1625_v10  ;;  %v1629_v63 = vsel %vm13133_vm2, %v9668_v49, %v1628_v32  ;;  %1621 = vst [vmem:[#allocation2 + $0x73] sm:$0x1] %v1620_v16  ;;  %v2333_v41 = vcombine.high %v2331_v36, %v2331_v36  ;;  %v2449_v12 = vunpack.i.h.s16 %v2331_v36 }
 0x231   : > { %1627 = vst [vmem:[#allocation2 + $0x75] sm:$0x1] %v1626_v21  ;;  %1630 = vst [vmem:[#allocation2 + $0x76] sm:$0x1] %v1629_v63  ;;  %v1632_v51 = vsel %vm13133_vm2, %v1150_v37, %v1631_v13  ;;  %v2451_v3 = vunpack.i.h.s16 %v2332_v6  ;;  %v9764_v9 = vpack.i.b16 %v2324_v24, %v2324_v24  ;;  %v2567_v47 = vpack.i.b16 %v2447_v1, %v2447_v1 }
 0x232   : > { %1633 = vst [vmem:[#allocation2 + $0x77] sm:$0x1] %v1632_v51  ;;  %v2453_v22 = vunpack.i.h.s16 %v2333_v41  ;;  %v9765_v55 = vpack.i.b16 %v2331_v36, %v2331_v36  ;;  %v9766_v20 = vpack.i.b16 %v2332_v6, %v2332_v6  ;;  %v2569_v48 = vpack.i.b16 %v2449_v12, %v2449_v12 }
 0x233   : > { %v2571_v18 = vpack.i.b16 %v2451_v3, %v2451_v3  ;;  %v9767_v27 = vpack.i.b16 %v2333_v41, %v2333_v41 }
 0x234   : > { %v3032_v53 = vld [vmem:[#allocation2 + $0x70] sm:$0x1]  ;;  %v2573_v43 = vpack.i.b16 %v2453_v22, %v2453_v22 }
 0x235   : > { %v3033_v23 = vsel %vm13266_vm4, %v9764_v9, %v3032_v53 }
 0x236   : > { %3034 = vst [vmem:[#allocation2 + $0x70] sm:$0x1] %v3033_v23  ;;  %v3035_v4 = vld [vmem:[#allocation2 + $0x71] sm:$0x1]  ;;  %v3038_v56 = vld [vmem:[#allocation2 + $0x72] sm:$0x1] }
 0x237   : > { %v3044_v7 = vld [vmem:[#allocation2 + $0x74] sm:$0x1]  ;;  %v3036_v28 = vsel %vm13266_vm4, %v2567_v47, %v3035_v4  ;;  %v3039_v33 = vsel %vm13266_vm4, %v9765_v55, %v3038_v56  ;;  %v3041_v35 = vld [vmem:[#allocation2 + $0x73] sm:$0x1] }
 0x238   : > { %v3045_v40 = vsel %vm13266_vm4, %v9766_v20, %v3044_v7  ;;  %v3047_v17 = vld [vmem:[#allocation2 + $0x75] sm:$0x1]  ;;  %v3050_v58 = vld [vmem:[#allocation2 + $0x76] sm:$0x1]  ;;  %3037 = vst [vmem:[#allocation2 + $0x71] sm:$0x1] %v3036_v28  ;;  %v3042_v5 = vsel %vm13266_vm4, %v2569_v48, %v3041_v35 }
 0x239   : > { %3040 = vst [vmem:[#allocation2 + $0x72] sm:$0x1] %v3039_v33  ;;  %3046 = vst [vmem:[#allocation2 + $0x74] sm:$0x1] %v3045_v40  ;;  %v3048_v42 = vsel %vm13266_vm4, %v2571_v18, %v3047_v17  ;;  %v3051_v25 = vsel %vm13266_vm4, %v9767_v27, %v3050_v58  ;;  %v3053_v34 = vld [vmem:[#allocation2 + $0x77] sm:$0x1] }
 0x23a   : > { %3043 = vst [vmem:[#allocation2 + $0x73] sm:$0x1] %v3042_v5  ;;  %3049 = vst [vmem:[#allocation2 + $0x75] sm:$0x1] %v3048_v42  ;;  %v3054_v11 = vsel %vm13266_vm4, %v2573_v43, %v3053_v34 }
 0x23b   : > { %3052 = vst [vmem:[#allocation2 + $0x76] sm:$0x1] %v3051_v25  ;;  %3055 = vst [vmem:[#allocation2 + $0x77] sm:$0x1] %v3054_v11 }
 0x23c PF: > { %v12278_v0 = vld [vmem:[%s13076_s24 + $0x38] sm:$0xff]   ;;  %v12919_v38 = vmov 0.0   ;;  %v12280_v60 = vld [vmem:[%s13076_s24 + $0x30] sm:$0xff]   ;;  %vm12920_vm5 = vmmov 0   ;;  %v12282_v52 = vld [vmem:[%s13076_s24 + $0x28] sm:$0xff]   ;;  %s3056_s22 = smul.u32 60, %s12961_s16 }
 0x23d   : > { %10923 = vmatprep.subr.bf16.mxu0 %v12919_v38  ;;  %10943 = vmatprep.subr.bf16.mxu1 %v12919_v38  ;;  %v12279_v19 = vld [vmem:[%s13076_s24 + $0x78] sm:$0xff]   ;;  %v12281_v31 = vld [vmem:[%s13076_s24 + $0x70] sm:$0xff]   ;;  %v12283_v24 = vld [vmem:[%s13076_s24 + $0x68] sm:$0xff]   ;;  %vm9359_vm6 = vcmask 1041408   ;;  %s12921_s28 = smov [#allocation9]   ;;  %p12155_p2 = scmp.eq.s32.totalorder %s12961_s16, 1 }
 0x23e   : > { %10924 = vmatpush3.bf16.msra.mxu0 %v12278_v0  ;;  %10939 = vmatprep.mubr.msk.bf16.mxu0 %vm12920_vm5, %v12919_v38  ;;  %v12284_v30 = vld [vmem:[%s13076_s24 + $0x20] sm:$0xff]   ;;  %v12286_v26 = vld [vmem:[%s13076_s24 + $0x18] sm:$0xff]   ;;  %v12288_v15 = vld [vmem:[%s13076_s24 + $0x10] sm:$0xff]   ;;  %s14445_s25 = scalar_lea.vmem [#allocation2], %s3056_s22  ;;  %s9488_s29 = sshll.u32 %s12921_s28, 4  ;;  %s9489_s29 = int_to_ptr.vmem [resolvable:$true] %s9488_s29 }
 0x23f   : > { %10944 = vmatpush3.bf16.msra.mxu1 %v12279_v19  ;;  %10925 = vmatprep.subr.bf16.mxu0 %v12919_v38  ;;  %v12285_v45 = vld [vmem:[%s13076_s24 + $0x60] sm:$0xff]   ;;  %v12287_v62 = vld [vmem:[%s13076_s24 + $0x58] sm:$0xff]   ;;  %v12289_v44 = vld [vmem:[%s13076_s24 + $0x50] sm:$0xff]   ;;  %s12838_s26 = scalar_lea.vmem %s9489_s29, 32  ;;  %p12845_p6 = scmp.lt.s32.totalorder %s9489_s29, %s9489_s29 }
 0x240   : > { %10945 = vmatprep.subr.bf16.mxu1 %v12919_v38  ;;  %10959 = vmatprep.mubr.msk.bf16.mxu1 %vm12920_vm5, %v12919_v38  ;;  %v12290_v61 = vld [vmem:[%s13076_s24 + $0x8] sm:$0xff]   ;;  %v12292_v39 = vld [vmem:[%s13076_s24] sm:$0xff]   ;;  %v12294_v32 = vld [vmem:[%s13076_s24 + $0xb8] sm:$0xff]   ;;  %p12839_p9 = scmp.ne.s32.totalorder %s9489_s29, %s12838_s26  ;;  %p12846_p12 = scmp.lt.s32.totalorder %s12838_s26, %s12838_s26 }
 0x241   : > { %v12291_v50 = vld [vmem:[%s13076_s24 + $0x48] sm:$0xff]   ;;  %v12293_v46 = vld [vmem:[%s13076_s24 + $0x40] sm:$0xff]   ;;  %v12295_v36 = vld [vmem:[%s13076_s24 + $0xf8] sm:$0xff]  }
 0x242   : > { %10926 = vmatpush3.bf16.msra.mxu0 %v12280_v60  ;;  %v3058_v29 = vld [vmem:[%s14445_s25] sm:$0x1]  ;;  %v3059_v10 = vld [vmem:[%s14445_s25 + $0x1] sm:$0x1]  ;;  %v12296_v14 = vld [vmem:[%s13076_s24 + $0xb0] sm:$0xff]   ;;  %p12840_p5 = pnand %p12839_p9, %p12155_p2  ;;  %p12847_p7 = por %p12846_p12, %p12845_p6 }
 0x243   : > { %10946 = vmatpush3.bf16.msra.mxu1 %v12281_v31  ;;  %10927 = vmatprep.subr.bf16.mxu0 %v12919_v38  ;;  %v12297_v57 = vld [vmem:[%s13076_s24 + $0xf0] sm:$0xff]   ;;  %v12298_v2 = vld [vmem:[%s13076_s24 + $0xa8] sm:$0xff]   ;;  %v12300_v54 = vld [vmem:[%s13076_s24 + $0xa0] sm:$0xff]  }
 0x244   : > { %10947 = vmatprep.subr.bf16.mxu1 %v12919_v38  ;;  %v12299_v49 = vld [vmem:[%s13076_s24 + $0xe8] sm:$0xff]   ;;  %v12301_v8 = vld [vmem:[%s13076_s24 + $0xe0] sm:$0xff]   ;;  %v12302_v59 = vld [vmem:[%s13076_s24 + $0x98] sm:$0xff]   ;;  %p12841_p3 = pneg %p12840_p5 }
 0x245   : > { %v12303_v13 = vld [vmem:[%s13076_s24 + $0xd8] sm:$0xff]   ;;  %v12304_v6 = vld [vmem:[%s13076_s24 + $0x90] sm:$0xff]   ;;  %v12306_v16 = vld [vmem:[%s13076_s24 + $0x88] sm:$0xff]  }
 0x246   : > { %10928 = vmatpush3.bf16.msra.mxu0 %v12282_v52  ;;  %v12305_v37 = vld [vmem:[%s13076_s24 + $0xd0] sm:$0xff]   ;;  %v12307_v21 = vld [vmem:[%s13076_s24 + $0xc8] sm:$0xff]   ;;  %v12308_v63 = vld [vmem:[%s13076_s24 + $0x80] sm:$0xff]   ;;  %p12848_p1 = pnand %p12847_p7, %p12841_p3 }
 0x247   : > { %10948 = vmatpush3.bf16.msra.mxu1 %v12283_v24  ;;  %10929 = vmatprep.subr.bf16.mxu0 %v12919_v38  ;;  %v12309_v41 = vld [vmem:[%s13076_s24 + $0xc0] sm:$0xff]   ;;  %v3060_v51 = vld [vmem:[%s14445_s25 + $0x2] sm:$0x1]  ;;  %v3061_v1 = vld [vmem:[%s14445_s25 + $0x3] sm:$0x1] }
 0x248   : > { %10949 = vmatprep.subr.bf16.mxu1 %v12919_v38  ;;  %v12310_v12 = vld [vmem:[%s13076_s24 + $0x138] sm:$0xff]   ;;  %v12312_v9 = vld [vmem:[%s13076_s24 + $0x130] sm:$0xff]   ;;  %v12314_v53 = vld [vmem:[%s13076_s24 + $0x128] sm:$0xff]  }
 0x249   : > { %v12311_v3 = vld [vmem:[%s13076_s24 + $0x178] sm:$0xff]   ;;  %v12313_v22 = vld [vmem:[%s13076_s24 + $0x170] sm:$0xff]   ;;  %v12315_v47 = vld [vmem:[%s13076_s24 + $0x168] sm:$0xff]  }
 0x24a   : > { %10930 = vmatpush3.bf16.msra.mxu0 %v12284_v30  ;;  %v12316_v55 = vld [vmem:[%s13076_s24 + $0x120] sm:$0xff]   ;;  %v12318_v23 = vld [vmem:[%s13076_s24 + $0x118] sm:$0xff]   ;;  %v12320_v18 = vld [vmem:[%s13076_s24 + $0x110] sm:$0xff]  }
 0x24b   : > { %10950 = vmatpush3.bf16.msra.mxu1 %v12285_v45  ;;  %10931 = vmatprep.subr.bf16.mxu0 %v12919_v38  ;;  %v12317_v20 = vld [vmem:[%s13076_s24 + $0x160] sm:$0xff]   ;;  %v12319_v48 = vld [vmem:[%s13076_s24 + $0x158] sm:$0xff]   ;;  %v12321_v27 = vld [vmem:[%s13076_s24 + $0x150] sm:$0xff]  }
 0x24c   : > { %10951 = vmatprep.subr.bf16.mxu1 %v12919_v38  ;;  %v12322_v4 = vld [vmem:[%s13076_s24 + $0x108] sm:$0xff]   ;;  %v12324_v7 = vld [vmem:[%s13076_s24 + $0x100] sm:$0xff]   ;;  %v3062_v33 = vld [vmem:[%s14445_s25 + $0x4] sm:$0x1] }
 0x24d   : > { %v12323_v56 = vld [vmem:[%s13076_s24 + $0x148] sm:$0xff]   ;;  %v12325_v28 = vld [vmem:[%s13076_s24 + $0x140] sm:$0xff]   ;;  %v3063_v35 = vld [vmem:[%s14445_s25 + $0x5] sm:$0x1] }
 0x24e   : > { %10932 = vmatpush3.bf16.msra.mxu0 %v12286_v26  ;;  %v12326_v40 = vld [vmem:[%s13076_s24 + $0x1b8] sm:$0xff]   ;;  %v12328_v58 = vld [vmem:[%s13076_s24 + $0x1b0] sm:$0xff]   ;;  %v12330_v5 = vld [vmem:[%s13076_s24 + $0x1a8] sm:$0xff]  }
 0x24f   : > { %10952 = vmatpush3.bf16.msra.mxu1 %v12287_v62  ;;  %10933 = vmatprep.subr.bf16.mxu0 %v12919_v38  ;;  %v12327_v17 = vld [vmem:[%s13076_s24 + $0x1f8] sm:$0xff]   ;;  %v12329_v43 = vld [vmem:[%s13076_s24 + $0x1f0] sm:$0xff]   ;;  %v12331_v42 = vld [vmem:[%s13076_s24 + $0x1e8] sm:$0xff]  }
 0x250   : > { %10953 = vmatprep.subr.bf16.mxu1 %v12919_v38  ;;  %v12332_v25 = vld [vmem:[%s13076_s24 + $0x1a0] sm:$0xff]   ;;  %v12334_v11 = vld [vmem:[%s13076_s24 + $0x198] sm:$0xff]   ;;  %v12336_v19 = vld [vmem:[%s13076_s24 + $0x190] sm:$0xff]  }
 0x251   : > { %v12333_v34 = vld [vmem:[%s13076_s24 + $0x1e0] sm:$0xff]   ;;  %v12335_v0 = vld [vmem:[%s13076_s24 + $0x1d8] sm:$0xff]   ;;  %v12337_v60 = vld [vmem:[%s13076_s24 + $0x1d0] sm:$0xff]  }
 0x252   : > { %10934 = vmatpush3.bf16.msra.mxu0 %v12288_v15  ;;  %v12338_v31 = vld [vmem:[%s13076_s24 + $0x188] sm:$0xff]   ;;  %v12340_v24 = vld [vmem:[%s13076_s24 + $0x180] sm:$0xff]   ;;  %v3064_v45 = vld [vmem:[%s14445_s25 + $0x6] sm:$0x1] }
 0x253   : > { %10954 = vmatpush3.bf16.msra.mxu1 %v12289_v44  ;;  %10935 = vmatprep.subr.bf16.mxu0 %v12919_v38  ;;  %v12339_v52 = vld [vmem:[%s13076_s24 + $0x1c8] sm:$0xff]   ;;  %v12341_v30 = vld [vmem:[%s13076_s24 + $0x1c0] sm:$0xff]   ;;  %v3065_v26 = vld [vmem:[%s14445_s25 + $0x7] sm:$0x1] }
 0x254   : > { %10955 = vmatprep.subr.bf16.mxu1 %v12919_v38  ;;  %v12342_v62 = vld [vmem:[%s13076_s24 + $0x238] sm:$0xff]   ;;  %v12344_v44 = vld [vmem:[%s13076_s24 + $0x230] sm:$0xff]  }
 0x255   : > { %v12343_v15 = vld [vmem:[%s13076_s24 + $0x278] sm:$0xff]  }
 0x256   : > { %10936 = vmatpush3.bf16.msra.mxu0 %v12290_v61  ;;  %v12345_v61 = vld [vmem:[%s13076_s24 + $0x270] sm:$0xff]  }
 0x257   : > { %10956 = vmatpush3.bf16.msra.mxu1 %v12291_v50  ;;  %10937 = vmatprep.subr.bf16.mxu0 %v12919_v38  ;;  %v12346_v50 = vld [vmem:[%s13076_s24 + $0x228] sm:$0xff]  }
 0x258   : > { %10957 = vmatprep.subr.bf16.mxu1 %v12919_v38 }
 0x25a   : > { %10938 = vmatpush3.bf16.msra.mxu0 %v12292_v39  ;;  %v12347_v39 = vld [vmem:[%s13076_s24 + $0x268] sm:$0xff]  }
 0x25b   : > { %10958 = vmatpush3.bf16.msra.mxu1 %v12293_v46  ;;  %10963 = vmatprep.subr.bf16.mxu0 %v12919_v38  ;;  %v12348_v46 = vld [vmem:[%s13076_s24 + $0x220] sm:$0xff]  }
 0x25c   : > { %10983 = vmatprep.subr.bf16.mxu1 %v12919_v38 }
 0x25d   : > { %10940 = vmatmul.mubr.bf16.vlgmr.msra.gmra.mxu0 %v3058_v29  ;;  %v12349_v29 = vld [vmem:[%s13076_s24 + $0x260] sm:$0xff]  }
 0x25e   : > { %10960 = vmatmul.mubr.bf16.vlgmr.msra.gmra.mxu1 %v3059_v10  ;;  %10964 = vmatpush3.bf16.msra.mxu0 %v12294_v32  ;;  %v12350_v10 = vld [vmem:[%s13076_s24 + $0x218] sm:$0xff]  }
 0x25f   : > { %10984 = vmatpush3.bf16.msra.mxu1 %v12295_v36  ;;  %10965 = vmatprep.subr.bf16.mxu0 %v12919_v38  ;;  %v12351_v32 = vld [vmem:[%s13076_s24 + $0x258] sm:$0xff]   ;;  %v12352_v36 = vld [vmem:[%s13076_s24 + $0x210] sm:$0xff]  }
 0x260   : > { %10985 = vmatprep.subr.bf16.mxu1 %v12919_v38  ;;  %10979 = vmatprep.mubr.msk.bf16.mxu0 %vm12920_vm5, %v12919_v38 }
 0x261   : > { %10999 = vmatprep.mubr.msk.bf16.mxu1 %vm12920_vm5, %v12919_v38 }
 0x262   : > { %10966 = vmatpush3.bf16.msra.mxu0 %v12296_v14  ;;  %v12353_v14 = vld [vmem:[%s13076_s24 + $0x250] sm:$0xff]  }
 0x263   : > { %10986 = vmatpush3.bf16.msra.mxu1 %v12297_v57  ;;  %10967 = vmatprep.subr.bf16.mxu0 %v12919_v38  ;;  %v12354_v57 = vld [vmem:[%s13076_s24 + $0x208] sm:$0xff]  }
 0x264   : > { %10987 = vmatprep.subr.bf16.mxu1 %v12919_v38 }
 0x266   : > { %10968 = vmatpush3.bf16.msra.mxu0 %v12298_v2  ;;  %v12355_v2 = vld [vmem:[%s13076_s24 + $0x248] sm:$0xff]  }
 0x267   : > { %10988 = vmatpush3.bf16.msra.mxu1 %v12299_v49  ;;  %10969 = vmatprep.subr.bf16.mxu0 %v12919_v38  ;;  %v12356_v49 = vld [vmem:[%s13076_s24 + $0x200] sm:$0xff]  }
 0x268   : > { %10989 = vmatprep.subr.bf16.mxu1 %v12919_v38 }
 0x26a   : > { %10970 = vmatpush3.bf16.msra.mxu0 %v12300_v54  ;;  %v12357_v54 = vld [vmem:[%s13076_s24 + $0x240] sm:$0xff]  }
 0x26b   : > { %10990 = vmatpush3.bf16.msra.mxu1 %v12301_v8  ;;  %10971 = vmatprep.subr.bf16.mxu0 %v12919_v38  ;;  %v3066_v8 = vld [vmem:[%s14445_s25 + $0x8] sm:$0x1] }
 0x26c   : > { %10991 = vmatprep.subr.bf16.mxu1 %v12919_v38 }
 0x26e   : > { %10972 = vmatpush3.bf16.msra.mxu0 %v12302_v59  ;;  %v12358_v59 = vld [vmem:[%s13076_s24 + $0x2b8] sm:$0xff]  }
 0x26f   : > { %10992 = vmatpush3.bf16.msra.mxu1 %v12303_v13  ;;  %10973 = vmatprep.subr.bf16.mxu0 %v12919_v38  ;;  %v3067_v13 = vld [vmem:[%s14445_s25 + $0x9] sm:$0x1] }
 0x270   : > { %10993 = vmatprep.subr.bf16.mxu1 %v12919_v38 }
 0x272   : > { %10974 = vmatpush3.bf16.msra.mxu0 %v12304_v6  ;;  %v12359_v6 = vld [vmem:[%s13076_s24 + $0x2f8] sm:$0xff]  }
 0x273   : > { %10994 = vmatpush3.bf16.msra.mxu1 %v12305_v37  ;;  %10975 = vmatprep.subr.bf16.mxu0 %v12919_v38  ;;  %v12360_v37 = vld [vmem:[%s13076_s24 + $0x2b0] sm:$0xff]  }
 0x274   : > { %10995 = vmatprep.subr.bf16.mxu1 %v12919_v38 }
 0x276   : > { %10976 = vmatpush3.bf16.msra.mxu0 %v12306_v16  ;;  %v12361_v16 = vld [vmem:[%s13076_s24 + $0x2f0] sm:$0xff]  }
 0x277   : > { %10996 = vmatpush3.bf16.msra.mxu1 %v12307_v21  ;;  %10977 = vmatprep.subr.bf16.mxu0 %v12919_v38  ;;  %v12362_v21 = vld [vmem:[%s13076_s24 + $0x2a8] sm:$0xff]  }
 0x278   : > { %10997 = vmatprep.subr.bf16.mxu1 %v12919_v38 }
 0x27a   : > { %10978 = vmatpush3.bf16.msra.mxu0 %v12308_v63  ;;  %v12363_v63 = vld [vmem:[%s13076_s24 + $0x2e8] sm:$0xff]  }
 0x27b   : > { %10998 = vmatpush3.bf16.msra.mxu1 %v12309_v41  ;;  %11003 = vmatprep.subr.bf16.mxu0 %v12919_v38  ;;  %v12364_v41 = vld [vmem:[%s13076_s24 + $0x2a0] sm:$0xff]  }
 0x27c   : > { %11023 = vmatprep.subr.bf16.mxu1 %v12919_v38 }
 0x27d   : > { %10980 = vmatmul.mubr.bf16.vlgmr.msra.gmra.mxu0 %v3060_v51  ;;  %v12365_v51 = vld [vmem:[%s13076_s24 + $0x2e0] sm:$0xff]  }
 0x27e   : > { %11000 = vmatmul.mubr.bf16.vlgmr.msra.gmra.mxu1 %v3061_v1  ;;  %11004 = vmatpush3.bf16.msra.mxu0 %v12310_v12  ;;  %v12366_v1 = vld [vmem:[%s13076_s24 + $0x298] sm:$0xff]  }
 0x27f   : > { %11024 = vmatpush3.bf16.msra.mxu1 %v12311_v3  ;;  %11005 = vmatprep.subr.bf16.mxu0 %v12919_v38  ;;  %v12367_v12 = vld [vmem:[%s13076_s24 + $0x2d8] sm:$0xff]   ;;  %v12368_v3 = vld [vmem:[%s13076_s24 + $0x290] sm:$0xff]  }
 0x280   : > { %11025 = vmatprep.subr.bf16.mxu1 %v12919_v38  ;;  %11019 = vmatprep.mubr.msk.bf16.mxu0 %vm12920_vm5, %v12919_v38 }
 0x281   : > { %11039 = vmatprep.mubr.msk.bf16.mxu1 %vm12920_vm5, %v12919_v38 }
 0x282   : > { %11006 = vmatpush3.bf16.msra.mxu0 %v12312_v9  ;;  %v12369_v9 = vld [vmem:[%s13076_s24 + $0x2d0] sm:$0xff]  }
 0x283   : > { %11026 = vmatpush3.bf16.msra.mxu1 %v12313_v22  ;;  %11007 = vmatprep.subr.bf16.mxu0 %v12919_v38  ;;  %v12370_v22 = vld [vmem:[%s13076_s24 + $0x288] sm:$0xff]  }
 0x284   : > { %11027 = vmatprep.subr.bf16.mxu1 %v12919_v38 }
 0x286   : > { %11008 = vmatpush3.bf16.msra.mxu0 %v12314_v53  ;;  %v12371_v53 = vld [vmem:[%s13076_s24 + $0x2c8] sm:$0xff]  }
 0x287   : > { %11028 = vmatpush3.bf16.msra.mxu1 %v12315_v47  ;;  %11009 = vmatprep.subr.bf16.mxu0 %v12919_v38  ;;  %v12372_v47 = vld [vmem:[%s13076_s24 + $0x280] sm:$0xff]  }
 0x288   : > { %11029 = vmatprep.subr.bf16.mxu1 %v12919_v38 }
 0x28a   : > { %11010 = vmatpush3.bf16.msra.mxu0 %v12316_v55  ;;  %v12373_v55 = vld [vmem:[%s13076_s24 + $0x2c0] sm:$0xff]  }
 0x28b   : > { %11030 = vmatpush3.bf16.msra.mxu1 %v12317_v20  ;;  %11011 = vmatprep.subr.bf16.mxu0 %v12919_v38  ;;  %v3068_v20 = vld [vmem:[%s14445_s25 + $0xa] sm:$0x1] }
 0x28c   : > { %11031 = vmatprep.subr.bf16.mxu1 %v12919_v38 }
 0x28e   : > { %11012 = vmatpush3.bf16.msra.mxu0 %v12318_v23  ;;  %v12374_v23 = vld [vmem:[%s13076_s24 + $0x338] sm:$0xff]  }
 0x28f   : > { %11032 = vmatpush3.bf16.msra.mxu1 %v12319_v48  ;;  %11013 = vmatprep.subr.bf16.mxu0 %v12919_v38  ;;  %v3069_v48 = vld [vmem:[%s14445_s25 + $0xb] sm:$0x1] }
 0x290   : > { %11033 = vmatprep.subr.bf16.mxu1 %v12919_v38 }
 0x292   : > { %11014 = vmatpush3.bf16.msra.mxu0 %v12320_v18  ;;  %v12375_v18 = vld [vmem:[%s13076_s24 + $0x378] sm:$0xff]  }
 0x293   : > { %11034 = vmatpush3.bf16.msra.mxu1 %v12321_v27  ;;  %11015 = vmatprep.subr.bf16.mxu0 %v12919_v38  ;;  %v12376_v27 = vld [vmem:[%s13076_s24 + $0x330] sm:$0xff]  }
 0x294   : > { %11035 = vmatprep.subr.bf16.mxu1 %v12919_v38 }
 0x296   : > { %11016 = vmatpush3.bf16.msra.mxu0 %v12322_v4  ;;  %v12377_v4 = vld [vmem:[%s13076_s24 + $0x370] sm:$0xff]  }
 0x297   : > { %11036 = vmatpush3.bf16.msra.mxu1 %v12323_v56  ;;  %11017 = vmatprep.subr.bf16.mxu0 %v12919_v38  ;;  %v12378_v56 = vld [vmem:[%s13076_s24 + $0x328] sm:$0xff]  }
 0x298   : > { %11037 = vmatprep.subr.bf16.mxu1 %v12919_v38 }
 0x29a   : > { %11018 = vmatpush3.bf16.msra.mxu0 %v12324_v7  ;;  %v12379_v7 = vld [vmem:[%s13076_s24 + $0x368] sm:$0xff]  }
 0x29b   : > { %11038 = vmatpush3.bf16.msra.mxu1 %v12325_v28  ;;  %11043 = vmatprep.subr.bf16.mxu0 %v12919_v38  ;;  %v12380_v28 = vld [vmem:[%s13076_s24 + $0x320] sm:$0xff]  }
 0x29c   : > { %11063 = vmatprep.subr.bf16.mxu1 %v12919_v38 }
 0x29d   : > { %11020 = vmatmul.mubr.bf16.vlgmr.msra.gmra.mxu0 %v3062_v33  ;;  %v12381_v33 = vld [vmem:[%s13076_s24 + $0x360] sm:$0xff]  }
 0x29e   : > { %11040 = vmatmul.mubr.bf16.vlgmr.msra.gmra.mxu1 %v3063_v35  ;;  %11044 = vmatpush3.bf16.msra.mxu0 %v12326_v40  ;;  %v12382_v35 = vld [vmem:[%s13076_s24 + $0x318] sm:$0xff]  }
 0x29f   : > { %11064 = vmatpush3.bf16.msra.mxu1 %v12327_v17  ;;  %11045 = vmatprep.subr.bf16.mxu0 %v12919_v38  ;;  %v12383_v40 = vld [vmem:[%s13076_s24 + $0x358] sm:$0xff]   ;;  %v12384_v17 = vld [vmem:[%s13076_s24 + $0x310] sm:$0xff]  }
 0x2a0   : > { %11065 = vmatprep.subr.bf16.mxu1 %v12919_v38  ;;  %11059 = vmatprep.mubr.msk.bf16.mxu0 %vm12920_vm5, %v12919_v38 }
 0x2a1   : > { %11079 = vmatprep.mubr.msk.bf16.mxu1 %vm12920_vm5, %v12919_v38 }
 0x2a2   : > { %11046 = vmatpush3.bf16.msra.mxu0 %v12328_v58  ;;  %v12385_v58 = vld [vmem:[%s13076_s24 + $0x350] sm:$0xff]  }
 0x2a3   : > { %11066 = vmatpush3.bf16.msra.mxu1 %v12329_v43  ;;  %11047 = vmatprep.subr.bf16.mxu0 %v12919_v38  ;;  %v12386_v43 = vld [vmem:[%s13076_s24 + $0x308] sm:$0xff]  }
 0x2a4   : > { %11067 = vmatprep.subr.bf16.mxu1 %v12919_v38 }
 0x2a6   : > { %11048 = vmatpush3.bf16.msra.mxu0 %v12330_v5  ;;  %v12387_v5 = vld [vmem:[%s13076_s24 + $0x348] sm:$0xff]  }
 0x2a7   : > { %11068 = vmatpush3.bf16.msra.mxu1 %v12331_v42  ;;  %11049 = vmatprep.subr.bf16.mxu0 %v12919_v38  ;;  %v12388_v42 = vld [vmem:[%s13076_s24 + $0x300] sm:$0xff]  }
 0x2a8   : > { %11069 = vmatprep.subr.bf16.mxu1 %v12919_v38 }
 0x2aa   : > { %11050 = vmatpush3.bf16.msra.mxu0 %v12332_v25  ;;  %v12389_v25 = vld [vmem:[%s13076_s24 + $0x340] sm:$0xff]  }
 0x2ab   : > { %11070 = vmatpush3.bf16.msra.mxu1 %v12333_v34  ;;  %11051 = vmatprep.subr.bf16.mxu0 %v12919_v38  ;;  %v3070_v34 = vld [vmem:[%s14445_s25 + $0xc] sm:$0x1] }
 0x2ac   : > { %11071 = vmatprep.subr.bf16.mxu1 %v12919_v38 }
 0x2ae   : > { %11052 = vmatpush3.bf16.msra.mxu0 %v12334_v11  ;;  %v12390_v11 = vld [vmem:[%s13076_s24 + $0x3b8] sm:$0xff]  }
 0x2af   : > { %11072 = vmatpush3.bf16.msra.mxu1 %v12335_v0  ;;  %11053 = vmatprep.subr.bf16.mxu0 %v12919_v38  ;;  %v3071_v0 = vld [vmem:[%s14445_s25 + $0xd] sm:$0x1] }
 0x2b0   : > { %11073 = vmatprep.subr.bf16.mxu1 %v12919_v38 }
 0x2b2   : > { %11054 = vmatpush3.bf16.msra.mxu0 %v12336_v19  ;;  %v12391_v19 = vld [vmem:[%s13076_s24 + $0x3f8] sm:$0xff]  }
 0x2b3   : > { %11074 = vmatpush3.bf16.msra.mxu1 %v12337_v60  ;;  %11055 = vmatprep.subr.bf16.mxu0 %v12919_v38 }
 0x2b4   : > { %11075 = vmatprep.subr.bf16.mxu1 %v12919_v38 }
 0x2b6   : > { %11056 = vmatpush3.bf16.msra.mxu0 %v12338_v31 }
 0x2b7   : > { %11076 = vmatpush3.bf16.msra.mxu1 %v12339_v52  ;;  %11057 = vmatprep.subr.bf16.mxu0 %v12919_v38 }
 0x2b8   : > { %11077 = vmatprep.subr.bf16.mxu1 %v12919_v38 }
 0x2ba   : > { %11058 = vmatpush3.bf16.msra.mxu0 %v12340_v24  ;;  %v12392_v24 = vld [vmem:[%s13076_s24 + $0x3b0] sm:$0xff]  }
 0x2bb   : > { %11078 = vmatpush3.bf16.msra.mxu1 %v12341_v30  ;;  %11083 = vmatprep.subr.bf16.mxu0 %v12919_v38 }
 0x2bc   : > { %11103 = vmatprep.subr.bf16.mxu1 %v12919_v38 }
 0x2bd   : > { %11060 = vmatmul.mubr.bf16.vlgmr.msra.gmra.mxu0 %v3064_v45 }
 0x2be   : > { %11080 = vmatmul.mubr.bf16.vlgmr.msra.gmra.mxu1 %v3065_v26  ;;  %11084 = vmatpush3.bf16.msra.mxu0 %v12342_v62  ;;  %v12393_v26 = vld [vmem:[%s13076_s24 + $0x3f0] sm:$0xff]  }
 0x2bf   : > { %11104 = vmatpush3.bf16.msra.mxu1 %v12343_v15  ;;  %11085 = vmatprep.subr.bf16.mxu0 %v12919_v38 }
 0x2c0   : > { %11105 = vmatprep.subr.bf16.mxu1 %v12919_v38  ;;  %11099 = vmatprep.mubr.msk.bf16.mxu0 %vm12920_vm5, %v12919_v38 }
 0x2c1   : > { %11119 = vmatprep.mubr.msk.bf16.mxu1 %vm12920_vm5, %v12919_v38 }
 0x2c2   : > { %11086 = vmatpush3.bf16.msra.mxu0 %v12344_v44 }
 0x2c3   : > { %11106 = vmatpush3.bf16.msra.mxu1 %v12345_v61  ;;  %11087 = vmatprep.subr.bf16.mxu0 %v12919_v38  ;;  %v12394_v61 = vld [vmem:[%s13076_s24 + $0x3a8] sm:$0xff]  }
 0x2c4   : > { %11107 = vmatprep.subr.bf16.mxu1 %v12919_v38 }
 0x2c6   : > { %11088 = vmatpush3.bf16.msra.mxu0 %v12346_v50  ;;  %v12395_v50 = vld [vmem:[%s13076_s24 + $0x3e8] sm:$0xff]  }
 0x2c7   : > { %11108 = vmatpush3.bf16.msra.mxu1 %v12347_v39  ;;  %11089 = vmatprep.subr.bf16.mxu0 %v12919_v38 }
 0x2c8   : > { %11109 = vmatprep.subr.bf16.mxu1 %v12919_v38 }
 0x2ca   : > { %11090 = vmatpush3.bf16.msra.mxu0 %v12348_v46 }
 0x2cb   : > { %11110 = vmatpush3.bf16.msra.mxu1 %v12349_v29  ;;  %11091 = vmatprep.subr.bf16.mxu0 %v12919_v38 }
 0x2cc   : > { %11111 = vmatprep.subr.bf16.mxu1 %v12919_v38 }
 0x2ce   : > { %11092 = vmatpush3.bf16.msra.mxu0 %v12350_v10  ;;  %v12396_v10 = vld [vmem:[%s13076_s24 + $0x3a0] sm:$0xff]  }
 0x2cf   : > { %11112 = vmatpush3.bf16.msra.mxu1 %v12351_v32  ;;  %11093 = vmatprep.subr.bf16.mxu0 %v12919_v38  ;;  %v12397_v32 = vld [vmem:[%s13076_s24 + $0x3e0] sm:$0xff]  }
 0x2d0   : > { %11113 = vmatprep.subr.bf16.mxu1 %v12919_v38 }
 0x2d2   : > { %11094 = vmatpush3.bf16.msra.mxu0 %v12352_v36  ;;  %v12398_v36 = vld [vmem:[%s13076_s24 + $0x398] sm:$0xff]  }
 0x2d3   : > { %11114 = vmatpush3.bf16.msra.mxu1 %v12353_v14  ;;  %11095 = vmatprep.subr.bf16.mxu0 %v12919_v38  ;;  %v12399_v14 = vld [vmem:[%s13076_s24 + $0x3d8] sm:$0xff]  }
 0x2d4   : > { %11115 = vmatprep.subr.bf16.mxu1 %v12919_v38 }
 0x2d6   : > { %11096 = vmatpush3.bf16.msra.mxu0 %v12354_v57  ;;  %v12400_v57 = vld [vmem:[%s13076_s24 + $0x390] sm:$0xff]  }
 0x2d7   : > { %11116 = vmatpush3.bf16.msra.mxu1 %v12355_v2  ;;  %11097 = vmatprep.subr.bf16.mxu0 %v12919_v38  ;;  %v12401_v2 = vld [vmem:[%s13076_s24 + $0x3d0] sm:$0xff]  }
 0x2d8   : > { %11117 = vmatprep.subr.bf16.mxu1 %v12919_v38 }
 0x2da   : > { %11098 = vmatpush3.bf16.msra.mxu0 %v12356_v49  ;;  %v12402_v49 = vld [vmem:[%s13076_s24 + $0x388] sm:$0xff]  }
 0x2db   : > { %11118 = vmatpush3.bf16.msra.mxu1 %v12357_v54  ;;  %11123 = vmatprep.subr.bf16.mxu0 %v12919_v38  ;;  %v12403_v54 = vld [vmem:[%s13076_s24 + $0x3c8] sm:$0xff]  }
 0x2dc   : > { %11143 = vmatprep.subr.bf16.mxu1 %v12919_v38 }
 0x2dd   : > { %11100 = vmatmul.mubr.bf16.vlgmr.msra.gmra.mxu0 %v3066_v8  ;;  %v12404_v8 = vld [vmem:[%s13076_s24 + $0x380] sm:$0xff]  }
 0x2de   : > { %11120 = vmatmul.mubr.bf16.vlgmr.msra.gmra.mxu1 %v3067_v13  ;;  %11124 = vmatpush3.bf16.msra.mxu0 %v12358_v59  ;;  %v12405_v59 = vld [vmem:[%s13076_s24 + $0x3c0] sm:$0xff]  }
 0x2df   : > { %11144 = vmatpush3.bf16.msra.mxu1 %v12359_v6  ;;  %11125 = vmatprep.subr.bf16.mxu0 %v12919_v38  ;;  %v3072_v13 = vld [vmem:[%s14445_s25 + $0xe] sm:$0x1]  ;;  %v12406_v6 = vld [vmem:[%s13076_s24 + $0x438] sm:$0xff]  }
 0x2e0   : > { %11145 = vmatprep.subr.bf16.mxu1 %v12919_v38  ;;  %11139 = vmatprep.mubr.msk.bf16.mxu0 %vm12920_vm5, %v12919_v38 }
 0x2e1   : > { %11159 = vmatprep.mubr.msk.bf16.mxu1 %vm12920_vm5, %v12919_v38 }
 0x2e2   : > { %11126 = vmatpush3.bf16.msra.mxu0 %v12360_v37  ;;  %v3073_v37 = vld [vmem:[%s14445_s25 + $0xf] sm:$0x1] }
 0x2e3   : > { %11146 = vmatpush3.bf16.msra.mxu1 %v12361_v16  ;;  %11127 = vmatprep.subr.bf16.mxu0 %v12919_v38  ;;  %v12407_v16 = vld [vmem:[%s13076_s24 + $0x478] sm:$0xff]  }
 0x2e4   : > { %11147 = vmatprep.subr.bf16.mxu1 %v12919_v38 }
 0x2e6   : > { %11128 = vmatpush3.bf16.msra.mxu0 %v12362_v21 }
 0x2e7   : > { %11148 = vmatpush3.bf16.msra.mxu1 %v12363_v63  ;;  %11129 = vmatprep.subr.bf16.mxu0 %v12919_v38 }
 0x2e8   : > { %11149 = vmatprep.subr.bf16.mxu1 %v12919_v38 }
 0x2ea   : > { %11130 = vmatpush3.bf16.msra.mxu0 %v12364_v41 }
 0x2eb   : > { %11150 = vmatpush3.bf16.msra.mxu1 %v12365_v51  ;;  %11131 = vmatprep.subr.bf16.mxu0 %v12919_v38  ;;  %v12408_v51 = vld [vmem:[%s13076_s24 + $0x430] sm:$0xff]  }
 0x2ec   : > { %11151 = vmatprep.subr.bf16.mxu1 %v12919_v38 }
 0x2ee   : > { %11132 = vmatpush3.bf16.msra.mxu0 %v12366_v1 }
 0x2ef   : > { %11152 = vmatpush3.bf16.msra.mxu1 %v12367_v12  ;;  %11133 = vmatprep.subr.bf16.mxu0 %v12919_v38 }
 0x2f0   : > { %11153 = vmatprep.subr.bf16.mxu1 %v12919_v38 }
 0x2f2   : > { %11134 = vmatpush3.bf16.msra.mxu0 %v12368_v3 }
 0x2f3   : > { %11154 = vmatpush3.bf16.msra.mxu1 %v12369_v9  ;;  %11135 = vmatprep.subr.bf16.mxu0 %v12919_v38  ;;  %v12409_v9 = vld [vmem:[%s13076_s24 + $0x470] sm:$0xff]  }
 0x2f4   : > { %11155 = vmatprep.subr.bf16.mxu1 %v12919_v38 }
 0x2f6   : > { %11136 = vmatpush3.bf16.msra.mxu0 %v12370_v22 }
 0x2f7   : > { %11156 = vmatpush3.bf16.msra.mxu1 %v12371_v53  ;;  %11137 = vmatprep.subr.bf16.mxu0 %v12919_v38 }
 0x2f8   : > { %11157 = vmatprep.subr.bf16.mxu1 %v12919_v38 }
 0x2fa   : > { %11138 = vmatpush3.bf16.msra.mxu0 %v12372_v47 }
 0x2fb   : > { %11158 = vmatpush3.bf16.msra.mxu1 %v12373_v55  ;;  %11163 = vmatprep.subr.bf16.mxu0 %v12919_v38  ;;  %v12410_v55 = vld [vmem:[%s13076_s24 + $0x428] sm:$0xff]  }
 0x2fc   : > { %11183 = vmatprep.subr.bf16.mxu1 %v12919_v38 }
 0x2fd   : > { %11140 = vmatmul.mubr.bf16.vlgmr.msra.gmra.mxu0 %v3068_v20  ;;  %v12411_v20 = vld [vmem:[%s13076_s24 + $0x468] sm:$0xff]  }
 0x2fe   : > { %11160 = vmatmul.mubr.bf16.vlgmr.msra.gmra.mxu1 %v3069_v48  ;;  %11164 = vmatpush3.bf16.msra.mxu0 %v12374_v23 }
 0x2ff   : > { %11184 = vmatpush3.bf16.msra.mxu1 %v12375_v18  ;;  %11165 = vmatprep.subr.bf16.mxu0 %v12919_v38 }
 0x300   : > { %11185 = vmatprep.subr.bf16.mxu1 %v12919_v38  ;;  %11179 = vmatprep.mubr.msk.bf16.mxu0 %vm12920_vm5, %v12919_v38 }
 0x301   : > { %11199 = vmatprep.mubr.msk.bf16.mxu1 %vm12920_vm5, %v12919_v38 }
 0x302   : > { %11166 = vmatpush3.bf16.msra.mxu0 %v12376_v27  ;;  %v12412_v27 = vld [vmem:[%s13076_s24 + $0x420] sm:$0xff]  }
 0x303   : > { %11186 = vmatpush3.bf16.msra.mxu1 %v12377_v4  ;;  %11167 = vmatprep.subr.bf16.mxu0 %v12919_v38  ;;  %v12413_v4 = vld [vmem:[%s13076_s24 + $0x460] sm:$0xff]  }
 0x304   : > { %11187 = vmatprep.subr.bf16.mxu1 %v12919_v38 }
 0x306   : > { %11168 = vmatpush3.bf16.msra.mxu0 %v12378_v56  ;;  %v12414_v56 = vld [vmem:[%s13076_s24 + $0x418] sm:$0xff]  }
 0x307   : > { %11188 = vmatpush3.bf16.msra.mxu1 %v12379_v7  ;;  %11169 = vmatprep.subr.bf16.mxu0 %v12919_v38  ;;  %v12415_v7 = vld [vmem:[%s13076_s24 + $0x458] sm:$0xff]  }
 0x308   : > { %11189 = vmatprep.subr.bf16.mxu1 %v12919_v38 }
 0x30a   : > { %11170 = vmatpush3.bf16.msra.mxu0 %v12380_v28  ;;  %v12416_v28 = vld [vmem:[%s13076_s24 + $0x410] sm:$0xff]  }
 0x30b   : > { %11190 = vmatpush3.bf16.msra.mxu1 %v12381_v33  ;;  %11171 = vmatprep.subr.bf16.mxu0 %v12919_v38  ;;  %v12417_v33 = vld [vmem:[%s13076_s24 + $0x450] sm:$0xff]  }
 0x30c   : > { %11191 = vmatprep.subr.bf16.mxu1 %v12919_v38 }
 0x30e   : > { %11172 = vmatpush3.bf16.msra.mxu0 %v12382_v35  ;;  %v12418_v35 = vld [vmem:[%s13076_s24 + $0x408] sm:$0xff]  }
 0x30f   : > { %11192 = vmatpush3.bf16.msra.mxu1 %v12383_v40  ;;  %11173 = vmatprep.subr.bf16.mxu0 %v12919_v38  ;;  %v12419_v40 = vld [vmem:[%s13076_s24 + $0x448] sm:$0xff]  }
 0x310   : > { %11193 = vmatprep.subr.bf16.mxu1 %v12919_v38 }
 0x312   : > { %11174 = vmatpush3.bf16.msra.mxu0 %v12384_v17  ;;  %v12420_v17 = vld [vmem:[%s13076_s24 + $0x400] sm:$0xff]  }
 0x313   : > { %11194 = vmatpush3.bf16.msra.mxu1 %v12385_v58  ;;  %11175 = vmatprep.subr.bf16.mxu0 %v12919_v38  ;;  %v12421_v58 = vld [vmem:[%s13076_s24 + $0x440] sm:$0xff]  }
 0x314   : > { %11195 = vmatprep.subr.bf16.mxu1 %v12919_v38 }
 0x316   : > { %11176 = vmatpush3.bf16.msra.mxu0 %v12386_v43  ;;  %v3074_v43 = vld [vmem:[%s14445_s25 + $0x10] sm:$0x1] }
 0x317   : > { %11196 = vmatpush3.bf16.msra.mxu1 %v12387_v5  ;;  %11177 = vmatprep.subr.bf16.mxu0 %v12919_v38  ;;  %v12422_v5 = vld [vmem:[%s13076_s24 + $0x4b8] sm:$0xff]  }
 0x318   : > { %11197 = vmatprep.subr.bf16.mxu1 %v12919_v38 }
 0x31a   : > { %11178 = vmatpush3.bf16.msra.mxu0 %v12388_v42  ;;  %v3075_v42 = vld [vmem:[%s14445_s25 + $0x11] sm:$0x1] }
 0x31b   : > { %11198 = vmatpush3.bf16.msra.mxu1 %v12389_v25  ;;  %11203 = vmatprep.subr.bf16.mxu0 %v12919_v38  ;;  %v12423_v25 = vld [vmem:[%s13076_s24 + $0x4f8] sm:$0xff]  }
 0x31c   : > { %11223 = vmatprep.subr.bf16.mxu1 %v12919_v38 }
 0x31d   : > { %v4160_v60 = vpop.f32.mrf.mxu0  ;;  %11180 = vmatmul.mubr.bf16.vlgmr.msra.gmra.mxu0 %v3070_v34 }
 0x31e   : > { %v9360_v31 = vsel %vm9359_vm6, %v4160_v60, 0.0  ;;  %v4248_v52 = vpop.f32.mrf.mxu1  ;;  %11200 = vmatmul.mubr.bf16.vlgmr.msra.gmra.mxu1 %v3071_v0  ;;  %11204 = vmatpush3.bf16.msra.mxu0 %v12390_v11 }
 0x31f   : > { %v9361_v30 = vsel %vm9359_vm6, %v4248_v52, 0.0  ;;  %11224 = vmatpush3.bf16.msra.mxu1 %v12391_v19  ;;  %v10941_v45 = vpop.f32.mrf.mxu0  ;;  %11205 = vmatprep.subr.bf16.mxu0 %v12919_v38  ;;  %v12424_v19 = vld [vmem:[%s13076_s24 + $0x4b0] sm:$0xff]  }
 0x320   : > { %v9362_v62 = vadd.f32 %v9361_v30, %v9360_v31  ;;  %v10961_v15 = vpop.f32.mrf.mxu1  ;;  %11225 = vmatprep.subr.bf16.mxu1 %v12919_v38  ;;  %11219 = vmatprep.mubr.msk.bf16.mxu0 %vm12920_vm5, %v12919_v38 }
 0x321   : > { %v4163_v44 = vpop.f32.mrf.mxu0  ;;  %11239 = vmatprep.mubr.msk.bf16.mxu1 %vm12920_vm5, %v12919_v38  ;;  %v12427_v15 = vld [vmem:[%s13076_s24 + $0x4e8] sm:$0xff]  }
 0x322   : > { %v4251_v39 = vpop.f32.mrf.mxu1  ;;  %11206 = vmatpush3.bf16.msra.mxu0 %v12392_v24  ;;  %v12425_v24 = vld [vmem:[%s13076_s24 + $0x4f0] sm:$0xff]  }
 0x323   : > { %11226 = vmatpush3.bf16.msra.mxu1 %v12393_v26  ;;  %v10942_v46 = vpop.f32.mrf.mxu0  ;;  %11207 = vmatprep.subr.bf16.mxu0 %v12919_v38  ;;  %v12428_v39 = vld [vmem:[%s13076_s24 + $0x4a0] sm:$0xff]  }
 0x324   : > { %v10962_v29 = vpop.f32.mrf.mxu1  ;;  %11227 = vmatprep.subr.bf16.mxu1 %v12919_v38  ;;  %v12429_v46 = vld [vmem:[%s13076_s24 + $0x4e0] sm:$0xff]  }
 0x325   : > { %v12430_v29 = vld [vmem:[%s13076_s24 + $0x498] sm:$0xff]  }
 0x326   : > { %11208 = vmatpush3.bf16.msra.mxu0 %v12394_v61 }
 0x327   : > { %11228 = vmatpush3.bf16.msra.mxu1 %v12395_v50  ;;  %11209 = vmatprep.subr.bf16.mxu0 %v12919_v38 }
 0x328   : > { %11229 = vmatprep.subr.bf16.mxu1 %v12919_v38 }
 0x32a   : > { %11210 = vmatpush3.bf16.msra.mxu0 %v12396_v10  ;;  %v12431_v10 = vld [vmem:[%s13076_s24 + $0x4d8] sm:$0xff]  }
 0x32b   : > { %11230 = vmatpush3.bf16.msra.mxu1 %v12397_v32  ;;  %11211 = vmatprep.subr.bf16.mxu0 %v12919_v38  ;;  %v12432_v32 = vld [vmem:[%s13076_s24 + $0x490] sm:$0xff]  }
 0x32c   : > { %11231 = vmatprep.subr.bf16.mxu1 %v12919_v38 }
 0x32e   : > { %11212 = vmatpush3.bf16.msra.mxu0 %v12398_v36  ;;  %v12433_v36 = vld [vmem:[%s13076_s24 + $0x4d0] sm:$0xff]  }
 0x32f   : > { %11232 = vmatpush3.bf16.msra.mxu1 %v12399_v14  ;;  %11213 = vmatprep.subr.bf16.mxu0 %v12919_v38  ;;  %v12434_v14 = vld [vmem:[%s13076_s24 + $0x488] sm:$0xff]  }
 0x330   : > { %11233 = vmatprep.subr.bf16.mxu1 %v12919_v38 }
 0x332   : > { %11214 = vmatpush3.bf16.msra.mxu0 %v12400_v57  ;;  %v12435_v57 = vld [vmem:[%s13076_s24 + $0x4c8] sm:$0xff]  }
 0x333   : > { %11234 = vmatpush3.bf16.msra.mxu1 %v12401_v2  ;;  %11215 = vmatprep.subr.bf16.mxu0 %v12919_v38  ;;  %v12436_v2 = vld [vmem:[%s13076_s24 + $0x480] sm:$0xff]  }
 0x334   : > { %11235 = vmatprep.subr.bf16.mxu1 %v12919_v38 }
 0x336   : > { %11216 = vmatpush3.bf16.msra.mxu0 %v12402_v49  ;;  %v12437_v49 = vld [vmem:[%s13076_s24 + $0x4c0] sm:$0xff]  }
 0x337   : > { %11236 = vmatpush3.bf16.msra.mxu1 %v12403_v54  ;;  %11217 = vmatprep.subr.bf16.mxu0 %v12919_v38  ;;  %v3076_v54 = vld [vmem:[%s14445_s25 + $0x12] sm:$0x1] }
 0x338   : > { %11237 = vmatprep.subr.bf16.mxu1 %v12919_v38 }
 0x33a   : > { %11218 = vmatpush3.bf16.msra.mxu0 %v12404_v8  ;;  %v12438_v8 = vld [vmem:[%s13076_s24 + $0x538] sm:$0xff]  }
 0x33b   : > { %11238 = vmatpush3.bf16.msra.mxu1 %v12405_v59  ;;  %11243 = vmatprep.subr.bf16.mxu0 %v12919_v38  ;;  %v3077_v59 = vld [vmem:[%s14445_s25 + $0x13] sm:$0x1] }
 0x33c   : > { %11263 = vmatprep.subr.bf16.mxu1 %v12919_v38 }
 0x33d   : > { %v4336_v21 = vpop.f32.mrf.mxu0  ;;  %11220 = vmatmul.mubr.bf16.vlgmr.msra.gmra.mxu0 %v3072_v13  ;;  %v12439_v13 = vld [vmem:[%s13076_s24 + $0x578] sm:$0xff]  }
 0x33e   : > { %v9363_v63 = vsel %vm9359_vm6, %v4336_v21, 0.0  ;;  %v4424_v41 = vpop.f32.mrf.mxu1  ;;  %11240 = vmatmul.mubr.bf16.vlgmr.msra.gmra.mxu1 %v3073_v37  ;;  %11244 = vmatpush3.bf16.msra.mxu0 %v12406_v6  ;;  %v12440_v21 = vld [vmem:[%s13076_s24 + $0x530] sm:$0xff]  }
 0x33f   : > { %v9364_v1 = vadd.f32 %v9363_v63, %v9362_v62  ;;  %v9365_v12 = vsel %vm9359_vm6, %v4424_v41, 0.0  ;;  %11264 = vmatpush3.bf16.msra.mxu1 %v12407_v16  ;;  %v10981_v3 = vpop.f32.mrf.mxu0  ;;  %11245 = vmatprep.subr.bf16.mxu0 %v12919_v38  ;;  %v12426_v62 = vld [vmem:[%s13076_s24 + $0x4a8] sm:$0xff]  }
 0x340   : > { %v11001_v22 = vpop.f32.mrf.mxu1  ;;  %11265 = vmatprep.subr.bf16.mxu1 %v12919_v38  ;;  %11259 = vmatprep.mubr.msk.bf16.mxu0 %vm12920_vm5, %v12919_v38 }
 0x341   : > { %v9366_v53 = vadd.f32 %v9365_v12, %v9364_v1  ;;  %v4339_v47 = vpop.f32.mrf.mxu0  ;;  %11279 = vmatprep.mubr.msk.bf16.mxu1 %vm12920_vm5, %v12919_v38  ;;  %v12441_v1 = vld [vmem:[%s13076_s24 + $0x570] sm:$0xff]   ;;  %v12442_v22 = vld [vmem:[%s13076_s24 + $0x528] sm:$0xff]  }
 0x342   : > { %v4427_v23 = vpop.f32.mrf.mxu1  ;;  %11246 = vmatpush3.bf16.msra.mxu0 %v12408_v51 }
 0x343   : > { %11266 = vmatpush3.bf16.msra.mxu1 %v12409_v9  ;;  %v10982_v48 = vpop.f32.mrf.mxu0  ;;  %11247 = vmatprep.subr.bf16.mxu0 %v12919_v38  ;;  %v12444_v23 = vld [vmem:[%s13076_s24 + $0x520] sm:$0xff]  }
 0x344   : > { %v11002_v18 = vpop.f32.mrf.mxu1  ;;  %11267 = vmatprep.subr.bf16.mxu1 %v12919_v38  ;;  %v12445_v48 = vld [vmem:[%s13076_s24 + $0x560] sm:$0xff]  }
 0x345   : > { %v12446_v18 = vld [vmem:[%s13076_s24 + $0x518] sm:$0xff]  }
 0x346   : > { %11248 = vmatpush3.bf16.msra.mxu0 %v12410_v55 }
 0x347   : > { %11268 = vmatpush3.bf16.msra.mxu1 %v12411_v20  ;;  %11249 = vmatprep.subr.bf16.mxu0 %v12919_v38 }
 0x348   : > { %11269 = vmatprep.subr.bf16.mxu1 %v12919_v38 }
 0x34a   : > { %11250 = vmatpush3.bf16.msra.mxu0 %v12412_v27  ;;  %v12447_v27 = vld [vmem:[%s13076_s24 + $0x558] sm:$0xff]  }
 0x34b   : > { %11270 = vmatpush3.bf16.msra.mxu1 %v12413_v4  ;;  %11251 = vmatprep.subr.bf16.mxu0 %v12919_v38  ;;  %v12448_v4 = vld [vmem:[%s13076_s24 + $0x510] sm:$0xff]  }
 0x34c   : > { %11271 = vmatprep.subr.bf16.mxu1 %v12919_v38 }
 0x34e   : > { %11252 = vmatpush3.bf16.msra.mxu0 %v12414_v56  ;;  %v12449_v56 = vld [vmem:[%s13076_s24 + $0x550] sm:$0xff]  }
 0x34f   : > { %11272 = vmatpush3.bf16.msra.mxu1 %v12415_v7  ;;  %11253 = vmatprep.subr.bf16.mxu0 %v12919_v38  ;;  %v12450_v7 = vld [vmem:[%s13076_s24 + $0x508] sm:$0xff]  }
 0x350   : > { %11273 = vmatprep.subr.bf16.mxu1 %v12919_v38 }
 0x352   : > { %11254 = vmatpush3.bf16.msra.mxu0 %v12416_v28  ;;  %v12451_v28 = vld [vmem:[%s13076_s24 + $0x548] sm:$0xff]  }
 0x353   : > { %11274 = vmatpush3.bf16.msra.mxu1 %v12417_v33  ;;  %11255 = vmatprep.subr.bf16.mxu0 %v12919_v38  ;;  %v12452_v33 = vld [vmem:[%s13076_s24 + $0x500] sm:$0xff]  }
 0x354   : > { %11275 = vmatprep.subr.bf16.mxu1 %v12919_v38 }
 0x356   : > { %11256 = vmatpush3.bf16.msra.mxu0 %v12418_v35  ;;  %v12453_v35 = vld [vmem:[%s13076_s24 + $0x540] sm:$0xff]  }
 0x357   : > { %11276 = vmatpush3.bf16.msra.mxu1 %v12419_v40  ;;  %11257 = vmatprep.subr.bf16.mxu0 %v12919_v38  ;;  %v3078_v40 = vld [vmem:[%s14445_s25 + $0x14] sm:$0x1] }
 0x358   : > { %11277 = vmatprep.subr.bf16.mxu1 %v12919_v38 }
 0x35a   : > { %11258 = vmatpush3.bf16.msra.mxu0 %v12420_v17  ;;  %v12454_v17 = vld [vmem:[%s13076_s24 + $0x5b8] sm:$0xff]  }
 0x35b   : > { %11278 = vmatpush3.bf16.msra.mxu1 %v12421_v58  ;;  %11283 = vmatprep.subr.bf16.mxu0 %v12919_v38  ;;  %v3079_v58 = vld [vmem:[%s14445_s25 + $0x15] sm:$0x1] }
 0x35c   : > { %11303 = vmatprep.subr.bf16.mxu1 %v12919_v38 }
 0x35d   : > { %v4512_v34 = vpop.f32.mrf.mxu0  ;;  %11260 = vmatmul.mubr.bf16.vlgmr.msra.gmra.mxu0 %v3074_v43  ;;  %v12455_v43 = vld [vmem:[%s13076_s24 + $0x5f8] sm:$0xff]  }
 0x35e   : > { %v9367_v11 = vsel %vm9359_vm6, %v4512_v34, 0.0  ;;  %v4600_v0 = vpop.f32.mrf.mxu1  ;;  %11280 = vmatmul.mubr.bf16.vlgmr.msra.gmra.mxu1 %v3075_v42  ;;  %11284 = vmatpush3.bf16.msra.mxu0 %v12422_v5  ;;  %v12456_v34 = vld [vmem:[%s13076_s24 + $0x5b0] sm:$0xff]  }
 0x35f   : > { %v9368_v60 = vadd.f32 %v9367_v11, %v9366_v53  ;;  %v9369_v31 = vsel %vm9359_vm6, %v4600_v0, 0.0  ;;  %11304 = vmatpush3.bf16.msra.mxu1 %v12423_v25  ;;  %v11021_v52 = vpop.f32.mrf.mxu0  ;;  %11285 = vmatprep.subr.bf16.mxu0 %v12919_v38  ;;  %v12443_v53 = vld [vmem:[%s13076_s24 + $0x568] sm:$0xff]  }
 0x360   : > { %v11041_v30 = vpop.f32.mrf.mxu1  ;;  %11305 = vmatprep.subr.bf16.mxu1 %v12919_v38  ;;  %11299 = vmatprep.mubr.msk.bf16.mxu0 %vm12920_vm5, %v12919_v38 }
 0x361   : > { %v9370_v45 = vadd.f32 %v9369_v31, %v9368_v60  ;;  %v4515_v26 = vpop.f32.mrf.mxu0  ;;  %11319 = vmatprep.mubr.msk.bf16.mxu1 %vm12920_vm5, %v12919_v38  ;;  %v12457_v60 = vld [vmem:[%s13076_s24 + $0x5f0] sm:$0xff]   ;;  %v12458_v30 = vld [vmem:[%s13076_s24 + $0x5a8] sm:$0xff]  }
 0x362   : > { %v4603_v44 = vpop.f32.mrf.mxu1  ;;  %11286 = vmatpush3.bf16.msra.mxu0 %v12424_v19 }
 0x363   : > { %11306 = vmatpush3.bf16.msra.mxu1 %v12425_v24  ;;  %v11022_v61 = vpop.f32.mrf.mxu0  ;;  %11287 = vmatprep.subr.bf16.mxu0 %v12919_v38  ;;  %v12460_v44 = vld [vmem:[%s13076_s24 + $0x5a0] sm:$0xff]  }
 0x364   : > { %v11042_v50 = vpop.f32.mrf.mxu1  ;;  %11307 = vmatprep.subr.bf16.mxu1 %v12919_v38  ;;  %v12461_v61 = vld [vmem:[%s13076_s24 + $0x5e0] sm:$0xff]  }
 0x365   : > { %v12462_v50 = vld [vmem:[%s13076_s24 + $0x598] sm:$0xff]  }
 0x366   : > { %11288 = vmatpush3.bf16.msra.mxu0 %v12426_v62 }
 0x367   : > { %11308 = vmatpush3.bf16.msra.mxu1 %v12427_v15  ;;  %11289 = vmatprep.subr.bf16.mxu0 %v12919_v38 }
 0x368   : > { %11309 = vmatprep.subr.bf16.mxu1 %v12919_v38 }
 0x36a   : > { %11290 = vmatpush3.bf16.msra.mxu0 %v12428_v39  ;;  %v12463_v39 = vld [vmem:[%s13076_s24 + $0x5d8] sm:$0xff]  }
 0x36b   : > { %11310 = vmatpush3.bf16.msra.mxu1 %v12429_v46  ;;  %11291 = vmatprep.subr.bf16.mxu0 %v12919_v38  ;;  %v12464_v46 = vld [vmem:[%s13076_s24 + $0x590] sm:$0xff]  }
 0x36c   : > { %11311 = vmatprep.subr.bf16.mxu1 %v12919_v38 }
 0x36e   : > { %11292 = vmatpush3.bf16.msra.mxu0 %v12430_v29  ;;  %v12465_v29 = vld [vmem:[%s13076_s24 + $0x5d0] sm:$0xff]  }
 0x36f   : > { %11312 = vmatpush3.bf16.msra.mxu1 %v12431_v10  ;;  %11293 = vmatprep.subr.bf16.mxu0 %v12919_v38  ;;  %v12466_v10 = vld [vmem:[%s13076_s24 + $0x588] sm:$0xff]  }
 0x370   : > { %11313 = vmatprep.subr.bf16.mxu1 %v12919_v38 }
 0x372   : > { %11294 = vmatpush3.bf16.msra.mxu0 %v12432_v32  ;;  %v12467_v32 = vld [vmem:[%s13076_s24 + $0x5c8] sm:$0xff]  }
 0x373   : > { %11314 = vmatpush3.bf16.msra.mxu1 %v12433_v36  ;;  %11295 = vmatprep.subr.bf16.mxu0 %v12919_v38  ;;  %v12468_v36 = vld [vmem:[%s13076_s24 + $0x580] sm:$0xff]  }
 0x374   : > { %11315 = vmatprep.subr.bf16.mxu1 %v12919_v38 }
 0x376   : > { %11296 = vmatpush3.bf16.msra.mxu0 %v12434_v14  ;;  %v12469_v14 = vld [vmem:[%s13076_s24 + $0x5c0] sm:$0xff]  }
 0x377   : > { %11316 = vmatpush3.bf16.msra.mxu1 %v12435_v57  ;;  %11297 = vmatprep.subr.bf16.mxu0 %v12919_v38  ;;  %v3080_v57 = vld [vmem:[%s14445_s25 + $0x16] sm:$0x1] }
 0x378   : > { %11317 = vmatprep.subr.bf16.mxu1 %v12919_v38 }
 0x37a   : > { %11298 = vmatpush3.bf16.msra.mxu0 %v12436_v2  ;;  %v12470_v2 = vld [vmem:[%s13076_s24 + $0x638] sm:$0xff]  }
 0x37b   : > { %11318 = vmatpush3.bf16.msra.mxu1 %v12437_v49  ;;  %11323 = vmatprep.subr.bf16.mxu0 %v12919_v38  ;;  %v3081_v49 = vld [vmem:[%s14445_s25 + $0x17] sm:$0x1] }
 0x37c   : > { %11343 = vmatprep.subr.bf16.mxu1 %v12919_v38 }
 0x37d   : > { %v4688_v6 = vpop.f32.mrf.mxu0  ;;  %11300 = vmatmul.mubr.bf16.vlgmr.msra.gmra.mxu0 %v3076_v54  ;;  %v12471_v54 = vld [vmem:[%s13076_s24 + $0x678] sm:$0xff]  }
 0x37e   : > { %v9371_v37 = vsel %vm9359_vm6, %v4688_v6, 0.0  ;;  %v4776_v16 = vpop.f32.mrf.mxu1  ;;  %11320 = vmatmul.mubr.bf16.vlgmr.msra.gmra.mxu1 %v3077_v59  ;;  %11324 = vmatpush3.bf16.msra.mxu0 %v12438_v8  ;;  %v12472_v6 = vld [vmem:[%s13076_s24 + $0x630] sm:$0xff]  }
 0x37f   : > { %v9372_v63 = vadd.f32 %v9371_v37, %v9370_v45  ;;  %v9373_v41 = vsel %vm9359_vm6, %v4776_v16, 0.0  ;;  %11344 = vmatpush3.bf16.msra.mxu1 %v12439_v13  ;;  %v11061_v51 = vpop.f32.mrf.mxu0  ;;  %11325 = vmatprep.subr.bf16.mxu0 %v12919_v38  ;;  %v12459_v45 = vld [vmem:[%s13076_s24 + $0x5e8] sm:$0xff]  }
 0x380   : > { %v11081_v12 = vpop.f32.mrf.mxu1  ;;  %11345 = vmatprep.subr.bf16.mxu1 %v12919_v38  ;;  %11339 = vmatprep.mubr.msk.bf16.mxu0 %vm12920_vm5, %v12919_v38 }
 0x381   : > { %v9374_v3 = vadd.f32 %v9373_v41, %v9372_v63  ;;  %v4691_v9 = vpop.f32.mrf.mxu0  ;;  %11359 = vmatprep.mubr.msk.bf16.mxu1 %vm12920_vm5, %v12919_v38  ;;  %v12473_v63 = vld [vmem:[%s13076_s24 + $0x670] sm:$0xff]   ;;  %v12474_v12 = vld [vmem:[%s13076_s24 + $0x628] sm:$0xff]  }
 0x382   : > { %v4779_v47 = vpop.f32.mrf.mxu1  ;;  %11326 = vmatpush3.bf16.msra.mxu0 %v12440_v21 }
 0x383   : > { %11346 = vmatpush3.bf16.msra.mxu1 %v12441_v1  ;;  %v11062_v55 = vpop.f32.mrf.mxu0  ;;  %11327 = vmatprep.subr.bf16.mxu0 %v12919_v38  ;;  %v12476_v47 = vld [vmem:[%s13076_s24 + $0x620] sm:$0xff]  }
 0x384   : > { %v11082_v20 = vpop.f32.mrf.mxu1  ;;  %11347 = vmatprep.subr.bf16.mxu1 %v12919_v38  ;;  %v12477_v55 = vld [vmem:[%s13076_s24 + $0x660] sm:$0xff]  }
 0x385   : > { %v12478_v20 = vld [vmem:[%s13076_s24 + $0x618] sm:$0xff]  }
 0x386   : > { %11328 = vmatpush3.bf16.msra.mxu0 %v12442_v22 }
 0x387   : > { %11348 = vmatpush3.bf16.msra.mxu1 %v12443_v53  ;;  %11329 = vmatprep.subr.bf16.mxu0 %v12919_v38 }
 0x388   : > { %11349 = vmatprep.subr.bf16.mxu1 %v12919_v38 }
 0x38a   : > { %11330 = vmatpush3.bf16.msra.mxu0 %v12444_v23  ;;  %v12479_v23 = vld [vmem:[%s13076_s24 + $0x658] sm:$0xff]  }
 0x38b   : > { %11350 = vmatpush3.bf16.msra.mxu1 %v12445_v48  ;;  %11331 = vmatprep.subr.bf16.mxu0 %v12919_v38  ;;  %v12480_v48 = vld [vmem:[%s13076_s24 + $0x610] sm:$0xff]  }
 0x38c   : > { %11351 = vmatprep.subr.bf16.mxu1 %v12919_v38 }
 0x38e   : > { %11332 = vmatpush3.bf16.msra.mxu0 %v12446_v18  ;;  %v12481_v18 = vld [vmem:[%s13076_s24 + $0x650] sm:$0xff]  }
 0x38f   : > { %11352 = vmatpush3.bf16.msra.mxu1 %v12447_v27  ;;  %11333 = vmatprep.subr.bf16.mxu0 %v12919_v38  ;;  %v12482_v27 = vld [vmem:[%s13076_s24 + $0x608] sm:$0xff]  }
 0x390   : > { %11353 = vmatprep.subr.bf16.mxu1 %v12919_v38 }
 0x392   : > { %11334 = vmatpush3.bf16.msra.mxu0 %v12448_v4  ;;  %v12483_v4 = vld [vmem:[%s13076_s24 + $0x648] sm:$0xff]  }
 0x393   : > { %11354 = vmatpush3.bf16.msra.mxu1 %v12449_v56  ;;  %11335 = vmatprep.subr.bf16.mxu0 %v12919_v38  ;;  %v12484_v56 = vld [vmem:[%s13076_s24 + $0x600] sm:$0xff]  }
 0x394   : > { %11355 = vmatprep.subr.bf16.mxu1 %v12919_v38 }
 0x396   : > { %11336 = vmatpush3.bf16.msra.mxu0 %v12450_v7  ;;  %v12485_v7 = vld [vmem:[%s13076_s24 + $0x640] sm:$0xff]  }
 0x397   : > { %11356 = vmatpush3.bf16.msra.mxu1 %v12451_v28  ;;  %11337 = vmatprep.subr.bf16.mxu0 %v12919_v38  ;;  %v3082_v28 = vld [vmem:[%s14445_s25 + $0x18] sm:$0x1] }
 0x398   : > { %11357 = vmatprep.subr.bf16.mxu1 %v12919_v38 }
 0x39a   : > { %11338 = vmatpush3.bf16.msra.mxu0 %v12452_v33  ;;  %v12486_v33 = vld [vmem:[%s13076_s24 + $0x6b8] sm:$0xff]  }
 0x39b   : > { %11358 = vmatpush3.bf16.msra.mxu1 %v12453_v35  ;;  %11363 = vmatprep.subr.bf16.mxu0 %v12919_v38  ;;  %v3083_v35 = vld [vmem:[%s14445_s25 + $0x19] sm:$0x1] }
 0x39c   : > { %11383 = vmatprep.subr.bf16.mxu1 %v12919_v38 }
 0x39d   : > { %v4864_v5 = vpop.f32.mrf.mxu0  ;;  %11340 = vmatmul.mubr.bf16.vlgmr.msra.gmra.mxu0 %v3078_v40  ;;  %v12487_v40 = vld [vmem:[%s13076_s24 + $0x6f8] sm:$0xff]  }
 0x39e   : > { %v9375_v42 = vsel %vm9359_vm6, %v4864_v5, 0.0  ;;  %v4952_v25 = vpop.f32.mrf.mxu1  ;;  %11360 = vmatmul.mubr.bf16.vlgmr.msra.gmra.mxu1 %v3079_v58  ;;  %11364 = vmatpush3.bf16.msra.mxu0 %v12454_v17  ;;  %v12488_v5 = vld [vmem:[%s13076_s24 + $0x6b0] sm:$0xff]  }
 0x39f   : > { %v9376_v11 = vadd.f32 %v9375_v42, %v9374_v3  ;;  %v9377_v0 = vsel %vm9359_vm6, %v4952_v25, 0.0  ;;  %11384 = vmatpush3.bf16.msra.mxu1 %v12455_v43  ;;  %v11101_v19 = vpop.f32.mrf.mxu0  ;;  %11365 = vmatprep.subr.bf16.mxu0 %v12919_v38  ;;  %v12475_v3 = vld [vmem:[%s13076_s24 + $0x668] sm:$0xff]  }
 0x3a0   : > { %v11121_v31 = vpop.f32.mrf.mxu1  ;;  %11385 = vmatprep.subr.bf16.mxu1 %v12919_v38  ;;  %11379 = vmatprep.mubr.msk.bf16.mxu0 %vm12920_vm5, %v12919_v38 }
 0x3a1   : > { %v9378_v52 = vadd.f32 %v9377_v0, %v9376_v11  ;;  %v4867_v24 = vpop.f32.mrf.mxu0  ;;  %11399 = vmatprep.mubr.msk.bf16.mxu1 %vm12920_vm5, %v12919_v38  ;;  %v12489_v11 = vld [vmem:[%s13076_s24 + $0x6f0] sm:$0xff]   ;;  %v12490_v31 = vld [vmem:[%s13076_s24 + $0x6a8] sm:$0xff]  }
 0x3a2   : > { %v4955_v26 = vpop.f32.mrf.mxu1  ;;  %11366 = vmatpush3.bf16.msra.mxu0 %v12456_v34 }
 0x3a3   : > { %11386 = vmatpush3.bf16.msra.mxu1 %v12457_v60  ;;  %v11102_v62 = vpop.f32.mrf.mxu0  ;;  %11367 = vmatprep.subr.bf16.mxu0 %v12919_v38  ;;  %v12492_v26 = vld [vmem:[%s13076_s24 + $0x6a0] sm:$0xff]  }
 0x3a4   : > { %v11122_v15 = vpop.f32.mrf.mxu1  ;;  %11387 = vmatprep.subr.bf16.mxu1 %v12919_v38  ;;  %v12493_v62 = vld [vmem:[%s13076_s24 + $0x6e0] sm:$0xff]  }
 0x3a5   : > { %v12494_v15 = vld [vmem:[%s13076_s24 + $0x698] sm:$0xff]  }
 0x3a6   : > { %11368 = vmatpush3.bf16.msra.mxu0 %v12458_v30 }
 0x3a7   : > { %11388 = vmatpush3.bf16.msra.mxu1 %v12459_v45  ;;  %11369 = vmatprep.subr.bf16.mxu0 %v12919_v38 }
 0x3a8   : > { %11389 = vmatprep.subr.bf16.mxu1 %v12919_v38 }
 0x3aa   : > { %11370 = vmatpush3.bf16.msra.mxu0 %v12460_v44  ;;  %v12495_v44 = vld [vmem:[%s13076_s24 + $0x6d8] sm:$0xff]  }
 0x3ab   : > { %11390 = vmatpush3.bf16.msra.mxu1 %v12461_v61  ;;  %11371 = vmatprep.subr.bf16.mxu0 %v12919_v38  ;;  %v12496_v61 = vld [vmem:[%s13076_s24 + $0x690] sm:$0xff]  }
 0x3ac   : > { %11391 = vmatprep.subr.bf16.mxu1 %v12919_v38 }
 0x3ae   : > { %11372 = vmatpush3.bf16.msra.mxu0 %v12462_v50  ;;  %v12497_v50 = vld [vmem:[%s13076_s24 + $0x6d0] sm:$0xff]  }
 0x3af   : > { %11392 = vmatpush3.bf16.msra.mxu1 %v12463_v39  ;;  %11373 = vmatprep.subr.bf16.mxu0 %v12919_v38  ;;  %v12498_v39 = vld [vmem:[%s13076_s24 + $0x688] sm:$0xff]  }
 0x3b0   : > { %11393 = vmatprep.subr.bf16.mxu1 %v12919_v38 }
 0x3b2   : > { %11374 = vmatpush3.bf16.msra.mxu0 %v12464_v46  ;;  %v12499_v46 = vld [vmem:[%s13076_s24 + $0x6c8] sm:$0xff]  }
 0x3b3   : > { %11394 = vmatpush3.bf16.msra.mxu1 %v12465_v29  ;;  %11375 = vmatprep.subr.bf16.mxu0 %v12919_v38  ;;  %v12500_v29 = vld [vmem:[%s13076_s24 + $0x680] sm:$0xff]  }
 0x3b4   : > { %11395 = vmatprep.subr.bf16.mxu1 %v12919_v38 }
 0x3b6   : > { %11376 = vmatpush3.bf16.msra.mxu0 %v12466_v10  ;;  %v12501_v10 = vld [vmem:[%s13076_s24 + $0x6c0] sm:$0xff]  }
 0x3b7   : > { %11396 = vmatpush3.bf16.msra.mxu1 %v12467_v32  ;;  %11377 = vmatprep.subr.bf16.mxu0 %v12919_v38  ;;  %v3084_v32 = vld [vmem:[%s14445_s25 + $0x1a] sm:$0x1] }
 0x3b8   : > { %11397 = vmatprep.subr.bf16.mxu1 %v12919_v38 }
 0x3ba   : > { %11378 = vmatpush3.bf16.msra.mxu0 %v12468_v36  ;;  %v12502_v36 = vld [vmem:[%s13076_s24 + $0x738] sm:$0xff]  }
 0x3bb   : > { %11398 = vmatpush3.bf16.msra.mxu1 %v12469_v14  ;;  %11403 = vmatprep.subr.bf16.mxu0 %v12919_v38  ;;  %v3085_v14 = vld [vmem:[%s14445_s25 + $0x1b] sm:$0x1] }
 0x3bc   : > { %11423 = vmatprep.subr.bf16.mxu1 %v12919_v38 }
 0x3bd   : > { %v5040_v8 = vpop.f32.mrf.mxu0  ;;  %11380 = vmatmul.mubr.bf16.vlgmr.msra.gmra.mxu0 %v3080_v57  ;;  %v12503_v57 = vld [vmem:[%s13076_s24 + $0x778] sm:$0xff]  }
 0x3be   : > { %v9379_v59 = vsel %vm9359_vm6, %v5040_v8, 0.0  ;;  %v5128_v13 = vpop.f32.mrf.mxu1  ;;  %11400 = vmatmul.mubr.bf16.vlgmr.msra.gmra.mxu1 %v3081_v49  ;;  %11404 = vmatpush3.bf16.msra.mxu0 %v12470_v2  ;;  %v12504_v8 = vld [vmem:[%s13076_s24 + $0x730] sm:$0xff]  }
 0x3bf   : > { %v9380_v37 = vadd.f32 %v9379_v59, %v9378_v52  ;;  %v9381_v16 = vsel %vm9359_vm6, %v5128_v13, 0.0  ;;  %11424 = vmatpush3.bf16.msra.mxu1 %v12471_v54  ;;  %v11141_v21 = vpop.f32.mrf.mxu0  ;;  %11405 = vmatprep.subr.bf16.mxu0 %v12919_v38  ;;  %v12491_v52 = vld [vmem:[%s13076_s24 + $0x6e8] sm:$0xff]  }
 0x3c0   : > { %v11161_v41 = vpop.f32.mrf.mxu1  ;;  %11425 = vmatprep.subr.bf16.mxu1 %v12919_v38  ;;  %11419 = vmatprep.mubr.msk.bf16.mxu0 %vm12920_vm5, %v12919_v38 }
 0x3c1   : > { %v9382_v51 = vadd.f32 %v9381_v16, %v9380_v37  ;;  %v5043_v1 = vpop.f32.mrf.mxu0  ;;  %11439 = vmatprep.mubr.msk.bf16.mxu1 %vm12920_vm5, %v12919_v38  ;;  %v12505_v37 = vld [vmem:[%s13076_s24 + $0x770] sm:$0xff]  }
 0x3c2   : > { %v5131_v9 = vpop.f32.mrf.mxu1  ;;  %11406 = vmatpush3.bf16.msra.mxu0 %v12472_v6 }
 0x3c3   : > { %11426 = vmatpush3.bf16.msra.mxu1 %v12473_v63  ;;  %v11142_v22 = vpop.f32.mrf.mxu0  ;;  %11407 = vmatprep.subr.bf16.mxu0 %v12919_v38  ;;  %v12508_v9 = vld [vmem:[%s13076_s24 + $0x720] sm:$0xff]  }
 0x3c4   : > { %v11162_v53 = vpop.f32.mrf.mxu1  ;;  %11427 = vmatprep.subr.bf16.mxu1 %v12919_v38  ;;  %v12509_v22 = vld [vmem:[%s13076_s24 + $0x760] sm:$0xff]  }
 0x3c5   : > { %v12510_v53 = vld [vmem:[%s13076_s24 + $0x718] sm:$0xff]  }
 0x3c6   : > { %11408 = vmatpush3.bf16.msra.mxu0 %v12474_v12  ;;  %v12507_v12 = vld [vmem:[%s13076_s24 + $0x768] sm:$0xff]  }
 0x3c7   : > { %11428 = vmatpush3.bf16.msra.mxu1 %v12475_v3  ;;  %11409 = vmatprep.subr.bf16.mxu0 %v12919_v38 }
 0x3c8   : > { %11429 = vmatprep.subr.bf16.mxu1 %v12919_v38 }
 0x3ca   : > { %11410 = vmatpush3.bf16.msra.mxu0 %v12476_v47  ;;  %v12511_v47 = vld [vmem:[%s13076_s24 + $0x758] sm:$0xff]  }
 0x3cb   : > { %11430 = vmatpush3.bf16.msra.mxu1 %v12477_v55  ;;  %11411 = vmatprep.subr.bf16.mxu0 %v12919_v38  ;;  %v12512_v55 = vld [vmem:[%s13076_s24 + $0x710] sm:$0xff]  }
 0x3cc   : > { %11431 = vmatprep.subr.bf16.mxu1 %v12919_v38 }
 0x3ce   : > { %11412 = vmatpush3.bf16.msra.mxu0 %v12478_v20  ;;  %v12513_v20 = vld [vmem:[%s13076_s24 + $0x750] sm:$0xff]  }
 0x3cf   : > { %11432 = vmatpush3.bf16.msra.mxu1 %v12479_v23  ;;  %11413 = vmatprep.subr.bf16.mxu0 %v12919_v38  ;;  %v12514_v23 = vld [vmem:[%s13076_s24 + $0x708] sm:$0xff]  }
 0x3d0   : > { %11433 = vmatprep.subr.bf16.mxu1 %v12919_v38 }
 0x3d2   : > { %11414 = vmatpush3.bf16.msra.mxu0 %v12480_v48  ;;  %v12515_v48 = vld [vmem:[%s13076_s24 + $0x748] sm:$0xff]  }
 0x3d3   : > { %11434 = vmatpush3.bf16.msra.mxu1 %v12481_v18  ;;  %11415 = vmatprep.subr.bf16.mxu0 %v12919_v38  ;;  %v12516_v18 = vld [vmem:[%s13076_s24 + $0x700] sm:$0xff]  }
 0x3d4   : > { %11435 = vmatprep.subr.bf16.mxu1 %v12919_v38 }
 0x3d6   : > { %11416 = vmatpush3.bf16.msra.mxu0 %v12482_v27  ;;  %v12517_v27 = vld [vmem:[%s13076_s24 + $0x740] sm:$0xff]  }
 0x3d7   : > { %11436 = vmatpush3.bf16.msra.mxu1 %v12483_v4  ;;  %11417 = vmatprep.subr.bf16.mxu0 %v12919_v38  ;;  %v3086_v4 = vld [vmem:[%s14445_s25 + $0x1c] sm:$0x1] }
 0x3d8   : > { %11437 = vmatprep.subr.bf16.mxu1 %v12919_v38 }
 0x3da   : > { %11418 = vmatpush3.bf16.msra.mxu0 %v12484_v56  ;;  %v12518_v56 = vld [vmem:[%s13076_s24 + $0x7b8] sm:$0xff]  }
 0x3db   : > { %11438 = vmatpush3.bf16.msra.mxu1 %v12485_v7  ;;  %11443 = vmatprep.subr.bf16.mxu0 %v12919_v38  ;;  %v3087_v7 = vld [vmem:[%s14445_s25 + $0x1d] sm:$0x1] }
 0x3dc   : > { %11463 = vmatprep.subr.bf16.mxu1 %v12919_v38 }
 0x3dd   : > { %v5216_v17 = vpop.f32.mrf.mxu0  ;;  %11420 = vmatmul.mubr.bf16.vlgmr.msra.gmra.mxu0 %v3082_v28  ;;  %v12519_v28 = vld [vmem:[%s13076_s24 + $0x7f8] sm:$0xff]  }
 0x3de   : > { %v9383_v58 = vsel %vm9359_vm6, %v5216_v17, 0.0  ;;  %v5304_v43 = vpop.f32.mrf.mxu1  ;;  %11440 = vmatmul.mubr.bf16.vlgmr.msra.gmra.mxu1 %v3083_v35  ;;  %11444 = vmatpush3.bf16.msra.mxu0 %v12486_v33  ;;  %v12520_v17 = vld [vmem:[%s13076_s24 + $0x7b0] sm:$0xff]  }
 0x3df   : > { %v9384_v42 = vadd.f32 %v9383_v58, %v9382_v51  ;;  %v9385_v25 = vsel %vm9359_vm6, %v5304_v43, 0.0  ;;  %11464 = vmatpush3.bf16.msra.mxu1 %v12487_v40  ;;  %v11181_v34 = vpop.f32.mrf.mxu0  ;;  %11445 = vmatprep.subr.bf16.mxu0 %v12919_v38  ;;  %v12506_v51 = vld [vmem:[%s13076_s24 + $0x728] sm:$0xff]  }
 0x3e0   : > { %v11201_v0 = vpop.f32.mrf.mxu1  ;;  %11465 = vmatprep.subr.bf16.mxu1 %v12919_v38  ;;  %11459 = vmatprep.mubr.msk.bf16.mxu0 %vm12920_vm5, %v12919_v38 }
 0x3e1   : > { %v9386_v19 = vadd.f32 %v9385_v25, %v9384_v42  ;;  %v5219_v60 = vpop.f32.mrf.mxu0  ;;  %11479 = vmatprep.mubr.msk.bf16.mxu1 %vm12920_vm5, %v12919_v38  ;;  %v12521_v42 = vld [vmem:[%s13076_s24 + $0x7f0] sm:$0xff]  }
 0x3e2   : > { %v5307_v24 = vpop.f32.mrf.mxu1  ;;  %11446 = vmatpush3.bf16.msra.mxu0 %v12488_v5 }
 0x3e3   : > { %11466 = vmatpush3.bf16.msra.mxu1 %v12489_v11  ;;  %v11182_v30 = vpop.f32.mrf.mxu0  ;;  %11447 = vmatprep.subr.bf16.mxu0 %v12919_v38  ;;  %v12524_v24 = vld [vmem:[%s13076_s24 + $0x7a0] sm:$0xff]  }
 0x3e4   : > { %v11202_v45 = vpop.f32.mrf.mxu1  ;;  %11467 = vmatprep.subr.bf16.mxu1 %v12919_v38  ;;  %v12525_v30 = vld [vmem:[%s13076_s24 + $0x7e0] sm:$0xff]  }
 0x3e5   : > { %v12526_v45 = vld [vmem:[%s13076_s24 + $0x798] sm:$0xff]  }
 0x3e6   : > { %11448 = vmatpush3.bf16.msra.mxu0 %v12490_v31  ;;  %v12523_v31 = vld [vmem:[%s13076_s24 + $0x7e8] sm:$0xff]  }
 0x3e7   : > { %11468 = vmatpush3.bf16.msra.mxu1 %v12491_v52  ;;  %11449 = vmatprep.subr.bf16.mxu0 %v12919_v38 }
 0x3e8   : > { %11469 = vmatprep.subr.bf16.mxu1 %v12919_v38 }
 0x3ea   : > { %11450 = vmatpush3.bf16.msra.mxu0 %v12492_v26  ;;  %v12527_v26 = vld [vmem:[%s13076_s24 + $0x7d8] sm:$0xff]  }
 0x3eb   : > { %11470 = vmatpush3.bf16.msra.mxu1 %v12493_v62  ;;  %11451 = vmatprep.subr.bf16.mxu0 %v12919_v38  ;;  %v12528_v62 = vld [vmem:[%s13076_s24 + $0x790] sm:$0xff]  }
 0x3ec   : > { %11471 = vmatprep.subr.bf16.mxu1 %v12919_v38 }
 0x3ee   : > { %11452 = vmatpush3.bf16.msra.mxu0 %v12494_v15  ;;  %v12529_v15 = vld [vmem:[%s13076_s24 + $0x7d0] sm:$0xff]  }
 0x3ef   : > { %11472 = vmatpush3.bf16.msra.mxu1 %v12495_v44  ;;  %11453 = vmatprep.subr.bf16.mxu0 %v12919_v38  ;;  %v12530_v44 = vld [vmem:[%s13076_s24 + $0x788] sm:$0xff]  }
 0x3f0   : > { %11473 = vmatprep.subr.bf16.mxu1 %v12919_v38 }
 0x3f2   : > { %11454 = vmatpush3.bf16.msra.mxu0 %v12496_v61  ;;  %v12531_v61 = vld [vmem:[%s13076_s24 + $0x7c8] sm:$0xff]  }
 0x3f3   : > { %11474 = vmatpush3.bf16.msra.mxu1 %v12497_v50  ;;  %11455 = vmatprep.subr.bf16.mxu0 %v12919_v38  ;;  %v12532_v50 = vld [vmem:[%s13076_s24 + $0x780] sm:$0xff]  }
 0x3f4   : > { %11475 = vmatprep.subr.bf16.mxu1 %v12919_v38 }
 0x3f6   : > { %11456 = vmatpush3.bf16.msra.mxu0 %v12498_v39  ;;  %v12533_v39 = vld [vmem:[%s13076_s24 + $0x7c0] sm:$0xff]  }
 0x3f7   : > { %11476 = vmatpush3.bf16.msra.mxu1 %v12499_v46  ;;  %11457 = vmatprep.subr.bf16.mxu0 %v12919_v38  ;;  %v3088_v46 = vld [vmem:[%s14445_s25 + $0x1e] sm:$0x1] }
 0x3f8   : > { %11477 = vmatprep.subr.bf16.mxu1 %v12919_v38 }
 0x3fa   : > { %11458 = vmatpush3.bf16.msra.mxu0 %v12500_v29  ;;  %v12534_v29 = vld [vmem:[%s13076_s24 + $0x838] sm:$0xff]  }
 0x3fb   : > { %11478 = vmatpush3.bf16.msra.mxu1 %v12501_v10  ;;  %11483 = vmatprep.subr.bf16.mxu0 %v12919_v38  ;;  %v3089_v10 = vld [vmem:[%s14445_s25 + $0x1f] sm:$0x1] }
 0x3fc   : > { %11503 = vmatprep.subr.bf16.mxu1 %v12919_v38 }
 0x3fd   : > { %v5392_v2 = vpop.f32.mrf.mxu0  ;;  %11460 = vmatmul.mubr.bf16.vlgmr.msra.gmra.mxu0 %v3084_v32  ;;  %v12535_v32 = vld [vmem:[%s13076_s24 + $0x878] sm:$0xff]  }
 0x3fe   : > { %v9387_v49 = vsel %vm9359_vm6, %v5392_v2, 0.0  ;;  %v5480_v54 = vpop.f32.mrf.mxu1  ;;  %11480 = vmatmul.mubr.bf16.vlgmr.msra.gmra.mxu1 %v3085_v14  ;;  %11484 = vmatpush3.bf16.msra.mxu0 %v12502_v36  ;;  %v12536_v2 = vld [vmem:[%s13076_s24 + $0x830] sm:$0xff]  }
 0x3ff   : > { %v9388_v59 = vadd.f32 %v9387_v49, %v9386_v19  ;;  %v9389_v13 = vsel %vm9359_vm6, %v5480_v54, 0.0  ;;  %11504 = vmatpush3.bf16.msra.mxu1 %v12503_v57  ;;  %v11221_v6 = vpop.f32.mrf.mxu0  ;;  %11485 = vmatprep.subr.bf16.mxu0 %v12919_v38  ;;  %v12522_v19 = vld [vmem:[%s13076_s24 + $0x7a8] sm:$0xff]  }
 0x400   : > { %v11241_v16 = vpop.f32.mrf.mxu1  ;;  %11505 = vmatprep.subr.bf16.mxu1 %v12919_v38  ;;  %11499 = vmatprep.mubr.msk.bf16.mxu0 %vm12920_vm5, %v12919_v38 }
 0x401   : > { %v9390_v21 = vadd.f32 %v9389_v13, %v9388_v59  ;;  %v5395_v63 = vpop.f32.mrf.mxu0  ;;  %11519 = vmatprep.mubr.msk.bf16.mxu1 %vm12920_vm5, %v12919_v38  ;;  %v12537_v59 = vld [vmem:[%s13076_s24 + $0x870] sm:$0xff]  }
 0x402   : > { %v5483_v41 = vpop.f32.mrf.mxu1  ;;  %11486 = vmatpush3.bf16.msra.mxu0 %v12504_v8 }
 0x403   : > { %11506 = vmatpush3.bf16.msra.mxu1 %v12505_v37  ;;  %v11222_v1 = vpop.f32.mrf.mxu0  ;;  %11487 = vmatprep.subr.bf16.mxu0 %v12919_v38  ;;  %v12539_v41 = vld [vmem:[%s13076_s24 + $0x868] sm:$0xff]  }
 0x404   : > { %v11242_v3 = vpop.f32.mrf.mxu1  ;;  %11507 = vmatprep.subr.bf16.mxu1 %v12919_v38  ;;  %v12540_v1 = vld [vmem:[%s13076_s24 + $0x820] sm:$0xff]  }
 0x405   : > { %v12542_v3 = vld [vmem:[%s13076_s24 + $0x818] sm:$0xff]  }
 0x406   : > { %11488 = vmatpush3.bf16.msra.mxu0 %v12506_v51 }
 0x407   : > { %11508 = vmatpush3.bf16.msra.mxu1 %v12507_v12  ;;  %11489 = vmatprep.subr.bf16.mxu0 %v12919_v38  ;;  %v12541_v12 = vld [vmem:[%s13076_s24 + $0x860] sm:$0xff]  }
 0x408   : > { %11509 = vmatprep.subr.bf16.mxu1 %v12919_v38 }
 0x40a   : > { %11490 = vmatpush3.bf16.msra.mxu0 %v12508_v9  ;;  %v12543_v9 = vld [vmem:[%s13076_s24 + $0x858] sm:$0xff]  }
 0x40b   : > { %11510 = vmatpush3.bf16.msra.mxu1 %v12509_v22  ;;  %11491 = vmatprep.subr.bf16.mxu0 %v12919_v38  ;;  %v12544_v22 = vld [vmem:[%s13076_s24 + $0x810] sm:$0xff]  }
 0x40c   : > { %11511 = vmatprep.subr.bf16.mxu1 %v12919_v38 }
 0x40e   : > { %11492 = vmatpush3.bf16.msra.mxu0 %v12510_v53  ;;  %v12545_v53 = vld [vmem:[%s13076_s24 + $0x850] sm:$0xff]  }
 0x40f   : > { %11512 = vmatpush3.bf16.msra.mxu1 %v12511_v47  ;;  %11493 = vmatprep.subr.bf16.mxu0 %v12919_v38  ;;  %v12546_v47 = vld [vmem:[%s13076_s24 + $0x808] sm:$0xff]  }
 0x410   : > { %11513 = vmatprep.subr.bf16.mxu1 %v12919_v38 }
 0x412   : > { %11494 = vmatpush3.bf16.msra.mxu0 %v12512_v55  ;;  %v12547_v55 = vld [vmem:[%s13076_s24 + $0x848] sm:$0xff]  }
 0x413   : > { %11514 = vmatpush3.bf16.msra.mxu1 %v12513_v20  ;;  %11495 = vmatprep.subr.bf16.mxu0 %v12919_v38  ;;  %v12548_v20 = vld [vmem:[%s13076_s24 + $0x800] sm:$0xff]  }
 0x414   : > { %11515 = vmatprep.subr.bf16.mxu1 %v12919_v38 }
 0x416   : > { %11496 = vmatpush3.bf16.msra.mxu0 %v12514_v23  ;;  %v12549_v23 = vld [vmem:[%s13076_s24 + $0x840] sm:$0xff]  }
 0x417   : > { %11516 = vmatpush3.bf16.msra.mxu1 %v12515_v48  ;;  %11497 = vmatprep.subr.bf16.mxu0 %v12919_v38  ;;  %v3090_v48 = vld [vmem:[%s14445_s25 + $0x20] sm:$0x1] }
 0x418   : > { %11517 = vmatprep.subr.bf16.mxu1 %v12919_v38 }
 0x41a   : > { %11498 = vmatpush3.bf16.msra.mxu0 %v12516_v18  ;;  %v12550_v18 = vld [vmem:[%s13076_s24 + $0x8b8] sm:$0xff]  }
 0x41b   : > { %11518 = vmatpush3.bf16.msra.mxu1 %v12517_v27  ;;  %11523 = vmatprep.subr.bf16.mxu0 %v12919_v38  ;;  %v3091_v27 = vld [vmem:[%s14445_s25 + $0x21] sm:$0x1] }
 0x41c   : > { %11543 = vmatprep.subr.bf16.mxu1 %v12919_v38 }
 0x41d   : > { %v5568_v33 = vpop.f32.mrf.mxu0  ;;  %11500 = vmatmul.mubr.bf16.vlgmr.msra.gmra.mxu0 %v3086_v4  ;;  %v12551_v4 = vld [vmem:[%s13076_s24 + $0x8f8] sm:$0xff]  }
 0x41e   : > { %v9391_v35 = vsel %vm9359_vm6, %v5568_v33, 0.0  ;;  %v5656_v40 = vpop.f32.mrf.mxu1  ;;  %11520 = vmatmul.mubr.bf16.vlgmr.msra.gmra.mxu1 %v3087_v7  ;;  %11524 = vmatpush3.bf16.msra.mxu0 %v12518_v56  ;;  %v12552_v33 = vld [vmem:[%s13076_s24 + $0x8b0] sm:$0xff]  }
 0x41f   : > { %v9392_v58 = vadd.f32 %v9391_v35, %v9390_v21  ;;  %v9393_v43 = vsel %vm9359_vm6, %v5656_v40, 0.0  ;;  %11544 = vmatpush3.bf16.msra.mxu1 %v12519_v28  ;;  %v11261_v5 = vpop.f32.mrf.mxu0  ;;  %11525 = vmatprep.subr.bf16.mxu0 %v12919_v38  ;;  %v12538_v21 = vld [vmem:[%s13076_s24 + $0x828] sm:$0xff]  }
 0x420   : > { %v11281_v25 = vpop.f32.mrf.mxu1  ;;  %11545 = vmatprep.subr.bf16.mxu1 %v12919_v38  ;;  %11539 = vmatprep.mubr.msk.bf16.mxu0 %vm12920_vm5, %v12919_v38 }
 0x421   : > { %v9394_v34 = vadd.f32 %v9393_v43, %v9392_v58  ;;  %v5571_v11 = vpop.f32.mrf.mxu0  ;;  %11559 = vmatprep.mubr.msk.bf16.mxu1 %vm12920_vm5, %v12919_v38  ;;  %v12553_v58 = vld [vmem:[%s13076_s24 + $0x8f0] sm:$0xff]  }
 0x422   : > { %v5659_v0 = vpop.f32.mrf.mxu1  ;;  %11526 = vmatpush3.bf16.msra.mxu0 %v12520_v17 }
 0x423   : > { %11546 = vmatpush3.bf16.msra.mxu1 %v12521_v42  ;;  %v11262_v60 = vpop.f32.mrf.mxu0  ;;  %11527 = vmatprep.subr.bf16.mxu0 %v12919_v38  ;;  %v12555_v0 = vld [vmem:[%s13076_s24 + $0x8e8] sm:$0xff]  }
 0x424   : > { %v11282_v52 = vpop.f32.mrf.mxu1  ;;  %11547 = vmatprep.subr.bf16.mxu1 %v12919_v38  ;;  %v12556_v60 = vld [vmem:[%s13076_s24 + $0x8a0] sm:$0xff]  }
 0x425   : > { %v12558_v52 = vld [vmem:[%s13076_s24 + $0x898] sm:$0xff]  }
 0x426   : > { %11528 = vmatpush3.bf16.msra.mxu0 %v12522_v19 }
 0x427   : > { %11548 = vmatpush3.bf16.msra.mxu1 %v12523_v31  ;;  %11529 = vmatprep.subr.bf16.mxu0 %v12919_v38  ;;  %v12557_v31 = vld [vmem:[%s13076_s24 + $0x8e0] sm:$0xff]  }
 0x428   : > { %11549 = vmatprep.subr.bf16.mxu1 %v12919_v38 }
 0x42a   : > { %11530 = vmatpush3.bf16.msra.mxu0 %v12524_v24  ;;  %v12559_v24 = vld [vmem:[%s13076_s24 + $0x8d8] sm:$0xff]  }
 0x42b   : > { %11550 = vmatpush3.bf16.msra.mxu1 %v12525_v30  ;;  %11531 = vmatprep.subr.bf16.mxu0 %v12919_v38  ;;  %v12560_v30 = vld [vmem:[%s13076_s24 + $0x890] sm:$0xff]  }
 0x42c   : > { %11551 = vmatprep.subr.bf16.mxu1 %v12919_v38 }
 0x42e   : > { %11532 = vmatpush3.bf16.msra.mxu0 %v12526_v45  ;;  %v12561_v45 = vld [vmem:[%s13076_s24 + $0x8d0] sm:$0xff]  }
 0x42f   : > { %11552 = vmatpush3.bf16.msra.mxu1 %v12527_v26  ;;  %11533 = vmatprep.subr.bf16.mxu0 %v12919_v38  ;;  %v12562_v26 = vld [vmem:[%s13076_s24 + $0x888] sm:$0xff]  }
 0x430   : > { %11553 = vmatprep.subr.bf16.mxu1 %v12919_v38 }
 0x432   : > { %11534 = vmatpush3.bf16.msra.mxu0 %v12528_v62  ;;  %v12563_v62 = vld [vmem:[%s13076_s24 + $0x8c8] sm:$0xff]  }
 0x433   : > { %11554 = vmatpush3.bf16.msra.mxu1 %v12529_v15  ;;  %11535 = vmatprep.subr.bf16.mxu0 %v12919_v38  ;;  %v12564_v15 = vld [vmem:[%s13076_s24 + $0x880] sm:$0xff]  }
 0x434   : > { %11555 = vmatprep.subr.bf16.mxu1 %v12919_v38 }
 0x436   : > { %11536 = vmatpush3.bf16.msra.mxu0 %v12530_v44  ;;  %v12565_v44 = vld [vmem:[%s13076_s24 + $0x8c0] sm:$0xff]  }
 0x437   : > { %11556 = vmatpush3.bf16.msra.mxu1 %v12531_v61  ;;  %11537 = vmatprep.subr.bf16.mxu0 %v12919_v38  ;;  %v3092_v61 = vld [vmem:[%s14445_s25 + $0x22] sm:$0x1] }
 0x438   : > { %11557 = vmatprep.subr.bf16.mxu1 %v12919_v38 }
 0x43a   : > { %11538 = vmatpush3.bf16.msra.mxu0 %v12532_v50  ;;  %v12566_v50 = vld [vmem:[%s13076_s24 + $0x938] sm:$0xff]  }
 0x43b   : > { %11558 = vmatpush3.bf16.msra.mxu1 %v12533_v39  ;;  %11563 = vmatprep.subr.bf16.mxu0 %v12919_v38  ;;  %v3093_v39 = vld [vmem:[%s14445_s25 + $0x23] sm:$0x1] }
 0x43c   : > { %11583 = vmatprep.subr.bf16.mxu1 %v12919_v38 }
 0x43d   : > { %v5744_v36 = vpop.f32.mrf.mxu0  ;;  %11540 = vmatmul.mubr.bf16.vlgmr.msra.gmra.mxu0 %v3088_v46  ;;  %v12567_v46 = vld [vmem:[%s13076_s24 + $0x978] sm:$0xff]  }
 0x43e   : > { %v9395_v14 = vsel %vm9359_vm6, %v5744_v36, 0.0  ;;  %v5832_v57 = vpop.f32.mrf.mxu1  ;;  %11560 = vmatmul.mubr.bf16.vlgmr.msra.gmra.mxu1 %v3089_v10  ;;  %11564 = vmatpush3.bf16.msra.mxu0 %v12534_v29  ;;  %v12568_v36 = vld [vmem:[%s13076_s24 + $0x930] sm:$0xff]  }
 0x43f   : > { %v9396_v49 = vadd.f32 %v9395_v14, %v9394_v34  ;;  %v9397_v54 = vsel %vm9359_vm6, %v5832_v57, 0.0  ;;  %11584 = vmatpush3.bf16.msra.mxu1 %v12535_v32  ;;  %v11301_v8 = vpop.f32.mrf.mxu0  ;;  %11565 = vmatprep.subr.bf16.mxu0 %v12919_v38  ;;  %v12554_v34 = vld [vmem:[%s13076_s24 + $0x8a8] sm:$0xff]  }
 0x440   : > { %v11321_v13 = vpop.f32.mrf.mxu1  ;;  %11585 = vmatprep.subr.bf16.mxu1 %v12919_v38  ;;  %11579 = vmatprep.mubr.msk.bf16.mxu0 %vm12920_vm5, %v12919_v38 }
 0x441   : > { %v9398_v6 = vadd.f32 %v9397_v54, %v9396_v49  ;;  %v5747_v37 = vpop.f32.mrf.mxu0  ;;  %11599 = vmatprep.mubr.msk.bf16.mxu1 %vm12920_vm5, %v12919_v38  ;;  %v12569_v49 = vld [vmem:[%s13076_s24 + $0x970] sm:$0xff]  }
 0x442   : > { %v5835_v16 = vpop.f32.mrf.mxu1  ;;  %11566 = vmatpush3.bf16.msra.mxu0 %v12536_v2 }
 0x443   : > { %11586 = vmatpush3.bf16.msra.mxu1 %v12537_v59  ;;  %v11302_v63 = vpop.f32.mrf.mxu0  ;;  %11567 = vmatprep.subr.bf16.mxu0 %v12919_v38  ;;  %v12571_v16 = vld [vmem:[%s13076_s24 + $0x968] sm:$0xff]  }
 0x444   : > { %v11322_v51 = vpop.f32.mrf.mxu1  ;;  %11587 = vmatprep.subr.bf16.mxu1 %v12919_v38  ;;  %v12572_v63 = vld [vmem:[%s13076_s24 + $0x920] sm:$0xff]  }
 0x445   : > { %v12574_v51 = vld [vmem:[%s13076_s24 + $0x918] sm:$0xff]  }
 0x446   : > { %11568 = vmatpush3.bf16.msra.mxu0 %v12538_v21 }
 0x447   : > { %11588 = vmatpush3.bf16.msra.mxu1 %v12539_v41  ;;  %11569 = vmatprep.subr.bf16.mxu0 %v12919_v38  ;;  %v12573_v41 = vld [vmem:[%s13076_s24 + $0x960] sm:$0xff]  }
 0x448   : > { %11589 = vmatprep.subr.bf16.mxu1 %v12919_v38 }
 0x44a   : > { %11570 = vmatpush3.bf16.msra.mxu0 %v12540_v1  ;;  %v12575_v1 = vld [vmem:[%s13076_s24 + $0x958] sm:$0xff]  }
 0x44b   : > { %11590 = vmatpush3.bf16.msra.mxu1 %v12541_v12  ;;  %11571 = vmatprep.subr.bf16.mxu0 %v12919_v38  ;;  %v12576_v12 = vld [vmem:[%s13076_s24 + $0x910] sm:$0xff]  }
 0x44c   : > { %11591 = vmatprep.subr.bf16.mxu1 %v12919_v38 }
 0x44e   : > { %11572 = vmatpush3.bf16.msra.mxu0 %v12542_v3  ;;  %v12577_v3 = vld [vmem:[%s13076_s24 + $0x950] sm:$0xff]  }
 0x44f   : > { %11592 = vmatpush3.bf16.msra.mxu1 %v12543_v9  ;;  %11573 = vmatprep.subr.bf16.mxu0 %v12919_v38  ;;  %v12578_v9 = vld [vmem:[%s13076_s24 + $0x908] sm:$0xff]  }
 0x450   : > { %11593 = vmatprep.subr.bf16.mxu1 %v12919_v38 }
 0x452   : > { %11574 = vmatpush3.bf16.msra.mxu0 %v12544_v22  ;;  %v12579_v22 = vld [vmem:[%s13076_s24 + $0x948] sm:$0xff]  }
 0x453   : > { %11594 = vmatpush3.bf16.msra.mxu1 %v12545_v53  ;;  %11575 = vmatprep.subr.bf16.mxu0 %v12919_v38  ;;  %v12580_v53 = vld [vmem:[%s13076_s24 + $0x900] sm:$0xff]  }
 0x454   : > { %11595 = vmatprep.subr.bf16.mxu1 %v12919_v38 }
 0x456   : > { %11576 = vmatpush3.bf16.msra.mxu0 %v12546_v47  ;;  %v12581_v47 = vld [vmem:[%s13076_s24 + $0x940] sm:$0xff]  }
 0x457   : > { %11596 = vmatpush3.bf16.msra.mxu1 %v12547_v55  ;;  %11577 = vmatprep.subr.bf16.mxu0 %v12919_v38  ;;  %v3094_v55 = vld [vmem:[%s14445_s25 + $0x24] sm:$0x1] }
 0x458   : > { %11597 = vmatprep.subr.bf16.mxu1 %v12919_v38 }
 0x45a   : > { %11578 = vmatpush3.bf16.msra.mxu0 %v12548_v20  ;;  %v12582_v20 = vld [vmem:[%s13076_s24 + $0x9b8] sm:$0xff]  }
 0x45b   : > { %11598 = vmatpush3.bf16.msra.mxu1 %v12549_v23  ;;  %11603 = vmatprep.subr.bf16.mxu0 %v12919_v38  ;;  %v3095_v23 = vld [vmem:[%s14445_s25 + $0x25] sm:$0x1] }
 0x45c   : > { %11623 = vmatprep.subr.bf16.mxu1 %v12919_v38 }
 0x45d   : > { %v5920_v56 = vpop.f32.mrf.mxu0  ;;  %11580 = vmatmul.mubr.bf16.vlgmr.msra.gmra.mxu0 %v3090_v48  ;;  %v12583_v48 = vld [vmem:[%s13076_s24 + $0x9f8] sm:$0xff]  }
 0x45e   : > { %v9399_v7 = vsel %vm9359_vm6, %v5920_v56, 0.0  ;;  %v6008_v28 = vpop.f32.mrf.mxu1  ;;  %11600 = vmatmul.mubr.bf16.vlgmr.msra.gmra.mxu1 %v3091_v27  ;;  %11604 = vmatpush3.bf16.msra.mxu0 %v12550_v18  ;;  %v12584_v56 = vld [vmem:[%s13076_s24 + $0x9b0] sm:$0xff]  }
 0x45f   : > { %v9400_v35 = vadd.f32 %v9399_v7, %v9398_v6  ;;  %v9401_v40 = vsel %vm9359_vm6, %v6008_v28, 0.0  ;;  %11624 = vmatpush3.bf16.msra.mxu1 %v12551_v4  ;;  %v11341_v17 = vpop.f32.mrf.mxu0  ;;  %11605 = vmatprep.subr.bf16.mxu0 %v12919_v38  ;;  %v12570_v6 = vld [vmem:[%s13076_s24 + $0x928] sm:$0xff]  }
 0x460   : > { %v11361_v43 = vpop.f32.mrf.mxu1  ;;  %11625 = vmatprep.subr.bf16.mxu1 %v12919_v38  ;;  %11619 = vmatprep.mubr.msk.bf16.mxu0 %vm12920_vm5, %v12919_v38 }
 0x461   : > { %v9402_v5 = vadd.f32 %v9401_v40, %v9400_v35  ;;  %v5923_v42 = vpop.f32.mrf.mxu0  ;;  %11639 = vmatprep.mubr.msk.bf16.mxu1 %vm12920_vm5, %v12919_v38  ;;  %v12585_v35 = vld [vmem:[%s13076_s24 + $0x9f0] sm:$0xff]  }
 0x462   : > { %v6011_v25 = vpop.f32.mrf.mxu1  ;;  %11606 = vmatpush3.bf16.msra.mxu0 %v12552_v33 }
 0x463   : > { %11626 = vmatpush3.bf16.msra.mxu1 %v12553_v58  ;;  %v11342_v11 = vpop.f32.mrf.mxu0  ;;  %11607 = vmatprep.subr.bf16.mxu0 %v12919_v38  ;;  %v12587_v25 = vld [vmem:[%s13076_s24 + $0x9e8] sm:$0xff]  }
 0x464   : > { %v11362_v19 = vpop.f32.mrf.mxu1  ;;  %11627 = vmatprep.subr.bf16.mxu1 %v12919_v38  ;;  %v12588_v11 = vld [vmem:[%s13076_s24 + $0x9a0] sm:$0xff]  }
 0x465   : > { %v12590_v19 = vld [vmem:[%s13076_s24 + $0x998] sm:$0xff]  }
 0x466   : > { %11608 = vmatpush3.bf16.msra.mxu0 %v12554_v34 }
 0x467   : > { %11628 = vmatpush3.bf16.msra.mxu1 %v12555_v0  ;;  %11609 = vmatprep.subr.bf16.mxu0 %v12919_v38  ;;  %v12589_v0 = vld [vmem:[%s13076_s24 + $0x9e0] sm:$0xff]  }
 0x468   : > { %11629 = vmatprep.subr.bf16.mxu1 %v12919_v38 }
 0x46a   : > { %11610 = vmatpush3.bf16.msra.mxu0 %v12556_v60  ;;  %v12591_v60 = vld [vmem:[%s13076_s24 + $0x9d8] sm:$0xff]  }
 0x46b   : > { %11630 = vmatpush3.bf16.msra.mxu1 %v12557_v31  ;;  %11611 = vmatprep.subr.bf16.mxu0 %v12919_v38  ;;  %v12592_v31 = vld [vmem:[%s13076_s24 + $0x990] sm:$0xff]  }
 0x46c   : > { %11631 = vmatprep.subr.bf16.mxu1 %v12919_v38 }
 0x46e   : > { %11612 = vmatpush3.bf16.msra.mxu0 %v12558_v52  ;;  %v12593_v52 = vld [vmem:[%s13076_s24 + $0x9d0] sm:$0xff]  }
 0x46f   : > { %11632 = vmatpush3.bf16.msra.mxu1 %v12559_v24  ;;  %11613 = vmatprep.subr.bf16.mxu0 %v12919_v38  ;;  %v12594_v24 = vld [vmem:[%s13076_s24 + $0x988] sm:$0xff]  }
 0x470   : > { %11633 = vmatprep.subr.bf16.mxu1 %v12919_v38 }
 0x472   : > { %11614 = vmatpush3.bf16.msra.mxu0 %v12560_v30  ;;  %v12595_v30 = vld [vmem:[%s13076_s24 + $0x9c8] sm:$0xff]  }
 0x473   : > { %11634 = vmatpush3.bf16.msra.mxu1 %v12561_v45  ;;  %11615 = vmatprep.subr.bf16.mxu0 %v12919_v38  ;;  %v12596_v45 = vld [vmem:[%s13076_s24 + $0x980] sm:$0xff]  }
 0x474   : > { %11635 = vmatprep.subr.bf16.mxu1 %v12919_v38 }
 0x476   : > { %11616 = vmatpush3.bf16.msra.mxu0 %v12562_v26  ;;  %v12597_v26 = vld [vmem:[%s13076_s24 + $0x9c0] sm:$0xff]  }
 0x477   : > { %11636 = vmatpush3.bf16.msra.mxu1 %v12563_v62  ;;  %11617 = vmatprep.subr.bf16.mxu0 %v12919_v38  ;;  %v3096_v62 = vld [vmem:[%s14445_s25 + $0x26] sm:$0x1] }
 0x478   : > { %11637 = vmatprep.subr.bf16.mxu1 %v12919_v38 }
 0x47a   : > { %11618 = vmatpush3.bf16.msra.mxu0 %v12564_v15  ;;  %v12598_v15 = vld [vmem:[%s13076_s24 + $0xa38] sm:$0xff]  }
 0x47b   : > { %11638 = vmatpush3.bf16.msra.mxu1 %v12565_v44  ;;  %11643 = vmatprep.subr.bf16.mxu0 %v12919_v38  ;;  %v3097_v44 = vld [vmem:[%s14445_s25 + $0x27] sm:$0x1] }
 0x47c   : > { %11663 = vmatprep.subr.bf16.mxu1 %v12919_v38 }
 0x47d   : > { %v6096_v29 = vpop.f32.mrf.mxu0  ;;  %11620 = vmatmul.mubr.bf16.vlgmr.msra.gmra.mxu0 %v3092_v61  ;;  %v12599_v61 = vld [vmem:[%s13076_s24 + $0xa78] sm:$0xff]  }
 0x47e   : > { %v9403_v10 = vsel %vm9359_vm6, %v6096_v29, 0.0  ;;  %v6184_v32 = vpop.f32.mrf.mxu1  ;;  %11640 = vmatmul.mubr.bf16.vlgmr.msra.gmra.mxu1 %v3093_v39  ;;  %11644 = vmatpush3.bf16.msra.mxu0 %v12566_v50  ;;  %v12600_v29 = vld [vmem:[%s13076_s24 + $0xa30] sm:$0xff]  }
 0x47f   : > { %v9404_v14 = vadd.f32 %v9403_v10, %v9402_v5  ;;  %v9405_v57 = vsel %vm9359_vm6, %v6184_v32, 0.0  ;;  %11664 = vmatpush3.bf16.msra.mxu1 %v12567_v46  ;;  %v11381_v2 = vpop.f32.mrf.mxu0  ;;  %11645 = vmatprep.subr.bf16.mxu0 %v12919_v38  ;;  %v12586_v5 = vld [vmem:[%s13076_s24 + $0x9a8] sm:$0xff]  }
 0x480   : > { %v11401_v54 = vpop.f32.mrf.mxu1  ;;  %11665 = vmatprep.subr.bf16.mxu1 %v12919_v38  ;;  %11659 = vmatprep.mubr.msk.bf16.mxu0 %vm12920_vm5, %v12919_v38 }
 0x481   : > { %v9406_v8 = vadd.f32 %v9405_v57, %v9404_v14  ;;  %v6099_v59 = vpop.f32.mrf.mxu0  ;;  %11679 = vmatprep.mubr.msk.bf16.mxu1 %vm12920_vm5, %v12919_v38  ;;  %v12601_v14 = vld [vmem:[%s13076_s24 + $0xa70] sm:$0xff]  }
 0x482   : > { %v6187_v13 = vpop.f32.mrf.mxu1  ;;  %11646 = vmatpush3.bf16.msra.mxu0 %v12568_v36 }
 0x483   : > { %11666 = vmatpush3.bf16.msra.mxu1 %v12569_v49  ;;  %v11382_v37 = vpop.f32.mrf.mxu0  ;;  %11647 = vmatprep.subr.bf16.mxu0 %v12919_v38  ;;  %v12603_v13 = vld [vmem:[%s13076_s24 + $0xa68] sm:$0xff]  }
 0x484   : > { %v11402_v21 = vpop.f32.mrf.mxu1  ;;  %11667 = vmatprep.subr.bf16.mxu1 %v12919_v38  ;;  %v12604_v37 = vld [vmem:[%s13076_s24 + $0xa20] sm:$0xff]  }
 0x485   : > { %v12606_v21 = vld [vmem:[%s13076_s24 + $0xa18] sm:$0xff]  }
 0x486   : > { %11648 = vmatpush3.bf16.msra.mxu0 %v12570_v6 }
 0x487   : > { %11668 = vmatpush3.bf16.msra.mxu1 %v12571_v16  ;;  %11649 = vmatprep.subr.bf16.mxu0 %v12919_v38  ;;  %v12605_v16 = vld [vmem:[%s13076_s24 + $0xa60] sm:$0xff]  }
 0x488   : > { %11669 = vmatprep.subr.bf16.mxu1 %v12919_v38 }
 0x48a   : > { %11650 = vmatpush3.bf16.msra.mxu0 %v12572_v63  ;;  %v12607_v63 = vld [vmem:[%s13076_s24 + $0xa58] sm:$0xff]  }
 0x48b   : > { %11670 = vmatpush3.bf16.msra.mxu1 %v12573_v41  ;;  %11651 = vmatprep.subr.bf16.mxu0 %v12919_v38  ;;  %v12608_v41 = vld [vmem:[%s13076_s24 + $0xa10] sm:$0xff]  }
 0x48c   : > { %11671 = vmatprep.subr.bf16.mxu1 %v12919_v38 }
 0x48e   : > { %11652 = vmatpush3.bf16.msra.mxu0 %v12574_v51  ;;  %v12609_v51 = vld [vmem:[%s13076_s24 + $0xa50] sm:$0xff]  }
 0x48f   : > { %11672 = vmatpush3.bf16.msra.mxu1 %v12575_v1  ;;  %11653 = vmatprep.subr.bf16.mxu0 %v12919_v38  ;;  %v12610_v1 = vld [vmem:[%s13076_s24 + $0xa08] sm:$0xff]  }
 0x490   : > { %11673 = vmatprep.subr.bf16.mxu1 %v12919_v38 }
 0x492   : > { %11654 = vmatpush3.bf16.msra.mxu0 %v12576_v12  ;;  %v12611_v12 = vld [vmem:[%s13076_s24 + $0xa48] sm:$0xff]  }
 0x493   : > { %11674 = vmatpush3.bf16.msra.mxu1 %v12577_v3  ;;  %11655 = vmatprep.subr.bf16.mxu0 %v12919_v38  ;;  %v12612_v3 = vld [vmem:[%s13076_s24 + $0xa00] sm:$0xff]  }
 0x494   : > { %11675 = vmatprep.subr.bf16.mxu1 %v12919_v38 }
 0x496   : > { %11656 = vmatpush3.bf16.msra.mxu0 %v12578_v9  ;;  %v12613_v9 = vld [vmem:[%s13076_s24 + $0xa40] sm:$0xff]  }
 0x497   : > { %11676 = vmatpush3.bf16.msra.mxu1 %v12579_v22  ;;  %11657 = vmatprep.subr.bf16.mxu0 %v12919_v38  ;;  %v3098_v22 = vld [vmem:[%s14445_s25 + $0x28] sm:$0x1] }
 0x498   : > { %11677 = vmatprep.subr.bf16.mxu1 %v12919_v38 }
 0x49a   : > { %11658 = vmatpush3.bf16.msra.mxu0 %v12580_v53  ;;  %v12614_v53 = vld [vmem:[%s13076_s24 + $0xab8] sm:$0xff]  }
 0x49b   : > { %11678 = vmatpush3.bf16.msra.mxu1 %v12581_v47  ;;  %11683 = vmatprep.subr.bf16.mxu0 %v12919_v38  ;;  %v3099_v47 = vld [vmem:[%s14445_s25 + $0x29] sm:$0x1] }
 0x49c   : > { %11703 = vmatprep.subr.bf16.mxu1 %v12919_v38 }
 0x49d   : > { %v6272_v18 = vpop.f32.mrf.mxu0  ;;  %11660 = vmatmul.mubr.bf16.vlgmr.msra.gmra.mxu0 %v3094_v55  ;;  %v12615_v55 = vld [vmem:[%s13076_s24 + $0xaf8] sm:$0xff]  }
 0x49e   : > { %v9407_v27 = vsel %vm9359_vm6, %v6272_v18, 0.0  ;;  %v6360_v4 = vpop.f32.mrf.mxu1  ;;  %11680 = vmatmul.mubr.bf16.vlgmr.msra.gmra.mxu1 %v3095_v23  ;;  %11684 = vmatpush3.bf16.msra.mxu0 %v12582_v20  ;;  %v12616_v18 = vld [vmem:[%s13076_s24 + $0xab0] sm:$0xff]  }
 0x49f   : > { %v9408_v7 = vadd.f32 %v9407_v27, %v9406_v8  ;;  %v9409_v28 = vsel %vm9359_vm6, %v6360_v4, 0.0  ;;  %11704 = vmatpush3.bf16.msra.mxu1 %v12583_v48  ;;  %v11421_v33 = vpop.f32.mrf.mxu0  ;;  %11685 = vmatprep.subr.bf16.mxu0 %v12919_v38  ;;  %v12602_v8 = vld [vmem:[%s13076_s24 + $0xa28] sm:$0xff]  }
 0x4a0   : > { %v11441_v40 = vpop.f32.mrf.mxu1  ;;  %11705 = vmatprep.subr.bf16.mxu1 %v12919_v38  ;;  %11699 = vmatprep.mubr.msk.bf16.mxu0 %vm12920_vm5, %v12919_v38 }
 0x4a1   : > { %v9410_v17 = vadd.f32 %v9409_v28, %v9408_v7  ;;  %v6275_v58 = vpop.f32.mrf.mxu0  ;;  %11719 = vmatprep.mubr.msk.bf16.mxu1 %vm12920_vm5, %v12919_v38  ;;  %v12617_v7 = vld [vmem:[%s13076_s24 + $0xaf0] sm:$0xff]  }
 0x4a2   : > { %v6363_v43 = vpop.f32.mrf.mxu1  ;;  %11686 = vmatpush3.bf16.msra.mxu0 %v12584_v56 }
 0x4a3   : > { %11706 = vmatpush3.bf16.msra.mxu1 %v12585_v35  ;;  %v11422_v42 = vpop.f32.mrf.mxu0  ;;  %11687 = vmatprep.subr.bf16.mxu0 %v12919_v38  ;;  %v12619_v43 = vld [vmem:[%s13076_s24 + $0xae8] sm:$0xff]  }
 0x4a4   : > { %v11442_v34 = vpop.f32.mrf.mxu1  ;;  %11707 = vmatprep.subr.bf16.mxu1 %v12919_v38  ;;  %v12620_v42 = vld [vmem:[%s13076_s24 + $0xaa0] sm:$0xff]  }
 0x4a5   : > { %v12622_v34 = vld [vmem:[%s13076_s24 + $0xa98] sm:$0xff]  }
 0x4a6   : > { %11688 = vmatpush3.bf16.msra.mxu0 %v12586_v5 }
 0x4a7   : > { %11708 = vmatpush3.bf16.msra.mxu1 %v12587_v25  ;;  %11689 = vmatprep.subr.bf16.mxu0 %v12919_v38  ;;  %v12621_v25 = vld [vmem:[%s13076_s24 + $0xae0] sm:$0xff]  }
 0x4a8   : > { %11709 = vmatprep.subr.bf16.mxu1 %v12919_v38 }
 0x4aa   : > { %11690 = vmatpush3.bf16.msra.mxu0 %v12588_v11  ;;  %v12623_v11 = vld [vmem:[%s13076_s24 + $0xad8] sm:$0xff]  }
 0x4ab   : > { %11710 = vmatpush3.bf16.msra.mxu1 %v12589_v0  ;;  %11691 = vmatprep.subr.bf16.mxu0 %v12919_v38  ;;  %v12624_v0 = vld [vmem:[%s13076_s24 + $0xa90] sm:$0xff]  }
 0x4ac   : > { %11711 = vmatprep.subr.bf16.mxu1 %v12919_v38 }
 0x4ae   : > { %11692 = vmatpush3.bf16.msra.mxu0 %v12590_v19  ;;  %v12625_v19 = vld [vmem:[%s13076_s24 + $0xad0] sm:$0xff]  }
 0x4af   : > { %11712 = vmatpush3.bf16.msra.mxu1 %v12591_v60  ;;  %11693 = vmatprep.subr.bf16.mxu0 %v12919_v38  ;;  %v12626_v60 = vld [vmem:[%s13076_s24 + $0xa88] sm:$0xff]  }
 0x4b0   : > { %11713 = vmatprep.subr.bf16.mxu1 %v12919_v38 }
 0x4b2   : > { %11694 = vmatpush3.bf16.msra.mxu0 %v12592_v31  ;;  %v12627_v31 = vld [vmem:[%s13076_s24 + $0xac8] sm:$0xff]  }
 0x4b3   : > { %11714 = vmatpush3.bf16.msra.mxu1 %v12593_v52  ;;  %11695 = vmatprep.subr.bf16.mxu0 %v12919_v38  ;;  %v12628_v52 = vld [vmem:[%s13076_s24 + $0xa80] sm:$0xff]  }
 0x4b4   : > { %11715 = vmatprep.subr.bf16.mxu1 %v12919_v38 }
 0x4b6   : > { %11696 = vmatpush3.bf16.msra.mxu0 %v12594_v24  ;;  %v12629_v24 = vld [vmem:[%s13076_s24 + $0xac0] sm:$0xff]  }
 0x4b7   : > { %11716 = vmatpush3.bf16.msra.mxu1 %v12595_v30  ;;  %11697 = vmatprep.subr.bf16.mxu0 %v12919_v38  ;;  %v3100_v30 = vld [vmem:[%s14445_s25 + $0x2a] sm:$0x1] }
 0x4b8   : > { %11717 = vmatprep.subr.bf16.mxu1 %v12919_v38 }
 0x4ba   : > { %11698 = vmatpush3.bf16.msra.mxu0 %v12596_v45  ;;  %v12630_v45 = vld [vmem:[%s13076_s24 + $0xb38] sm:$0xff]  }
 0x4bb   : > { %11718 = vmatpush3.bf16.msra.mxu1 %v12597_v26  ;;  %11723 = vmatprep.subr.bf16.mxu0 %v12919_v38  ;;  %v3101_v26 = vld [vmem:[%s14445_s25 + $0x2b] sm:$0x1] }
 0x4bc   : > { %11743 = vmatprep.subr.bf16.mxu1 %v12919_v38 }
 0x4bd   : > { %v6448_v50 = vpop.f32.mrf.mxu0  ;;  %11700 = vmatmul.mubr.bf16.vlgmr.msra.gmra.mxu0 %v3096_v62  ;;  %v12631_v62 = vld [vmem:[%s13076_s24 + $0xb78] sm:$0xff]  }
 0x4be   : > { %v9411_v39 = vsel %vm9359_vm6, %v6448_v50, 0.0  ;;  %v6536_v46 = vpop.f32.mrf.mxu1  ;;  %11720 = vmatmul.mubr.bf16.vlgmr.msra.gmra.mxu1 %v3097_v44  ;;  %11724 = vmatpush3.bf16.msra.mxu0 %v12598_v15  ;;  %v12632_v50 = vld [vmem:[%s13076_s24 + $0xb30] sm:$0xff]  }
 0x4bf   : > { %v9412_v10 = vadd.f32 %v9411_v39, %v9410_v17  ;;  %v9413_v32 = vsel %vm9359_vm6, %v6536_v46, 0.0  ;;  %11744 = vmatpush3.bf16.msra.mxu1 %v12599_v61  ;;  %v11461_v36 = vpop.f32.mrf.mxu0  ;;  %11725 = vmatprep.subr.bf16.mxu0 %v12919_v38  ;;  %v12618_v17 = vld [vmem:[%s13076_s24 + $0xaa8] sm:$0xff]  }
 0x4c0   : > { %v11481_v57 = vpop.f32.mrf.mxu1  ;;  %11745 = vmatprep.subr.bf16.mxu1 %v12919_v38  ;;  %11739 = vmatprep.mubr.msk.bf16.mxu0 %vm12920_vm5, %v12919_v38 }
 0x4c1   : > { %v9414_v2 = vadd.f32 %v9413_v32, %v9412_v10  ;;  %v6451_v49 = vpop.f32.mrf.mxu0  ;;  %11759 = vmatprep.mubr.msk.bf16.mxu1 %vm12920_vm5, %v12919_v38  ;;  %v12633_v10 = vld [vmem:[%s13076_s24 + $0xb70] sm:$0xff]  }
 0x4c2   : > { %v6539_v54 = vpop.f32.mrf.mxu1  ;;  %11726 = vmatpush3.bf16.msra.mxu0 %v12600_v29 }
 0x4c3   : > { %11746 = vmatpush3.bf16.msra.mxu1 %v12601_v14  ;;  %v11462_v59 = vpop.f32.mrf.mxu0  ;;  %11727 = vmatprep.subr.bf16.mxu0 %v12919_v38  ;;  %v12635_v54 = vld [vmem:[%s13076_s24 + $0xb68] sm:$0xff]  }
 0x4c4   : > { %v11482_v6 = vpop.f32.mrf.mxu1  ;;  %11747 = vmatprep.subr.bf16.mxu1 %v12919_v38  ;;  %v12636_v59 = vld [vmem:[%s13076_s24 + $0xb20] sm:$0xff]  }
 0x4c5   : > { %v12638_v6 = vld [vmem:[%s13076_s24 + $0xb18] sm:$0xff]  }
 0x4c6   : > { %11728 = vmatpush3.bf16.msra.mxu0 %v12602_v8 }
 0x4c7   : > { %11748 = vmatpush3.bf16.msra.mxu1 %v12603_v13  ;;  %11729 = vmatprep.subr.bf16.mxu0 %v12919_v38  ;;  %v12637_v13 = vld [vmem:[%s13076_s24 + $0xb60] sm:$0xff]  }
 0x4c8   : > { %11749 = vmatprep.subr.bf16.mxu1 %v12919_v38 }
 0x4ca   : > { %11730 = vmatpush3.bf16.msra.mxu0 %v12604_v37  ;;  %v12639_v37 = vld [vmem:[%s13076_s24 + $0xb58] sm:$0xff]  }
 0x4cb   : > { %11750 = vmatpush3.bf16.msra.mxu1 %v12605_v16  ;;  %11731 = vmatprep.subr.bf16.mxu0 %v12919_v38  ;;  %v12640_v16 = vld [vmem:[%s13076_s24 + $0xb10] sm:$0xff]  }
 0x4cc   : > { %11751 = vmatprep.subr.bf16.mxu1 %v12919_v38 }
 0x4ce   : > { %11732 = vmatpush3.bf16.msra.mxu0 %v12606_v21  ;;  %v12641_v21 = vld [vmem:[%s13076_s24 + $0xb50] sm:$0xff]  }
 0x4cf   : > { %11752 = vmatpush3.bf16.msra.mxu1 %v12607_v63  ;;  %11733 = vmatprep.subr.bf16.mxu0 %v12919_v38  ;;  %v12642_v63 = vld [vmem:[%s13076_s24 + $0xb08] sm:$0xff]  }
 0x4d0   : > { %11753 = vmatprep.subr.bf16.mxu1 %v12919_v38 }
 0x4d2   : > { %11734 = vmatpush3.bf16.msra.mxu0 %v12608_v41  ;;  %v12643_v41 = vld [vmem:[%s13076_s24 + $0xb48] sm:$0xff]  }
 0x4d3   : > { %11754 = vmatpush3.bf16.msra.mxu1 %v12609_v51  ;;  %11735 = vmatprep.subr.bf16.mxu0 %v12919_v38  ;;  %v12644_v51 = vld [vmem:[%s13076_s24 + $0xb00] sm:$0xff]  }
 0x4d4   : > { %11755 = vmatprep.subr.bf16.mxu1 %v12919_v38 }
 0x4d6   : > { %11736 = vmatpush3.bf16.msra.mxu0 %v12610_v1  ;;  %v12645_v1 = vld [vmem:[%s13076_s24 + $0xb40] sm:$0xff]  }
 0x4d7   : > { %11756 = vmatpush3.bf16.msra.mxu1 %v12611_v12  ;;  %11737 = vmatprep.subr.bf16.mxu0 %v12919_v38  ;;  %v3102_v12 = vld [vmem:[%s14445_s25 + $0x2c] sm:$0x1] }
 0x4d8   : > { %11757 = vmatprep.subr.bf16.mxu1 %v12919_v38 }
 0x4da   : > { %11738 = vmatpush3.bf16.msra.mxu0 %v12612_v3  ;;  %v12646_v3 = vld [vmem:[%s13076_s24 + $0xbb8] sm:$0xff]  }
 0x4db   : > { %11758 = vmatpush3.bf16.msra.mxu1 %v12613_v9  ;;  %11763 = vmatprep.subr.bf16.mxu0 %v12919_v38  ;;  %v3103_v9 = vld [vmem:[%s14445_s25 + $0x2d] sm:$0x1] }
 0x4dc   : > { %11783 = vmatprep.subr.bf16.mxu1 %v12919_v38 }
 0x4dd   : > { %v6624_v20 = vpop.f32.mrf.mxu0  ;;  %11740 = vmatmul.mubr.bf16.vlgmr.msra.gmra.mxu0 %v3098_v22  ;;  %v12647_v22 = vld [vmem:[%s13076_s24 + $0xbf8] sm:$0xff]  }
 0x4de   : > { %v9415_v23 = vsel %vm9359_vm6, %v6624_v20, 0.0  ;;  %v6712_v48 = vpop.f32.mrf.mxu1  ;;  %11760 = vmatmul.mubr.bf16.vlgmr.msra.gmra.mxu1 %v3099_v47  ;;  %11764 = vmatpush3.bf16.msra.mxu0 %v12614_v53  ;;  %v12648_v20 = vld [vmem:[%s13076_s24 + $0xbb0] sm:$0xff]  }
 0x4df   : > { %v9416_v27 = vadd.f32 %v9415_v23, %v9414_v2  ;;  %v9417_v4 = vsel %vm9359_vm6, %v6712_v48, 0.0  ;;  %11784 = vmatpush3.bf16.msra.mxu1 %v12615_v55  ;;  %v11501_v56 = vpop.f32.mrf.mxu0  ;;  %11765 = vmatprep.subr.bf16.mxu0 %v12919_v38  ;;  %v12634_v2 = vld [vmem:[%s13076_s24 + $0xb28] sm:$0xff]  }
 0x4e0   : > { %v11521_v28 = vpop.f32.mrf.mxu1  ;;  %11785 = vmatprep.subr.bf16.mxu1 %v12919_v38  ;;  %11779 = vmatprep.mubr.msk.bf16.mxu0 %vm12920_vm5, %v12919_v38 }
 0x4e1   : > { %v9418_v33 = vadd.f32 %v9417_v4, %v9416_v27  ;;  %v6627_v35 = vpop.f32.mrf.mxu0  ;;  %11799 = vmatprep.mubr.msk.bf16.mxu1 %vm12920_vm5, %v12919_v38  ;;  %v12649_v27 = vld [vmem:[%s13076_s24 + $0xbf0] sm:$0xff]  }
 0x4e2   : > { %v6715_v40 = vpop.f32.mrf.mxu1  ;;  %11766 = vmatpush3.bf16.msra.mxu0 %v12616_v18 }
 0x4e3   : > { %11786 = vmatpush3.bf16.msra.mxu1 %v12617_v7  ;;  %v11502_v58 = vpop.f32.mrf.mxu0  ;;  %11767 = vmatprep.subr.bf16.mxu0 %v12919_v38  ;;  %v12651_v40 = vld [vmem:[%s13076_s24 + $0xbe8] sm:$0xff]  }
 0x4e4   : > { %v11522_v5 = vpop.f32.mrf.mxu1  ;;  %11787 = vmatprep.subr.bf16.mxu1 %v12919_v38  ;;  %v12652_v58 = vld [vmem:[%s13076_s24 + $0xba0] sm:$0xff]  }
 0x4e5   : > { %v12654_v5 = vld [vmem:[%s13076_s24 + $0xb98] sm:$0xff]  }
 0x4e6   : > { %11768 = vmatpush3.bf16.msra.mxu0 %v12618_v17 }
 0x4e7   : > { %11788 = vmatpush3.bf16.msra.mxu1 %v12619_v43  ;;  %11769 = vmatprep.subr.bf16.mxu0 %v12919_v38  ;;  %v12653_v43 = vld [vmem:[%s13076_s24 + $0xbe0] sm:$0xff]  }
 0x4e8   : > { %11789 = vmatprep.subr.bf16.mxu1 %v12919_v38 }
 0x4ea   : > { %11770 = vmatpush3.bf16.msra.mxu0 %v12620_v42  ;;  %v12655_v42 = vld [vmem:[%s13076_s24 + $0xbd8] sm:$0xff]  }
 0x4eb   : > { %11790 = vmatpush3.bf16.msra.mxu1 %v12621_v25  ;;  %11771 = vmatprep.subr.bf16.mxu0 %v12919_v38  ;;  %v12656_v25 = vld [vmem:[%s13076_s24 + $0xb90] sm:$0xff]  }
 0x4ec   : > { %11791 = vmatprep.subr.bf16.mxu1 %v12919_v38 }
 0x4ee   : > { %11772 = vmatpush3.bf16.msra.mxu0 %v12622_v34  ;;  %v12657_v34 = vld [vmem:[%s13076_s24 + $0xbd0] sm:$0xff]  }
 0x4ef   : > { %11792 = vmatpush3.bf16.msra.mxu1 %v12623_v11  ;;  %11773 = vmatprep.subr.bf16.mxu0 %v12919_v38  ;;  %v12658_v11 = vld [vmem:[%s13076_s24 + $0xb88] sm:$0xff]  }
 0x4f0   : > { %11793 = vmatprep.subr.bf16.mxu1 %v12919_v38 }
 0x4f2   : > { %11774 = vmatpush3.bf16.msra.mxu0 %v12624_v0  ;;  %v12659_v0 = vld [vmem:[%s13076_s24 + $0xbc8] sm:$0xff]  }
 0x4f3   : > { %11794 = vmatpush3.bf16.msra.mxu1 %v12625_v19  ;;  %11775 = vmatprep.subr.bf16.mxu0 %v12919_v38  ;;  %v12660_v19 = vld [vmem:[%s13076_s24 + $0xb80] sm:$0xff]  }
 0x4f4   : > { %11795 = vmatprep.subr.bf16.mxu1 %v12919_v38 }
 0x4f6   : > { %11776 = vmatpush3.bf16.msra.mxu0 %v12626_v60  ;;  %v12661_v60 = vld [vmem:[%s13076_s24 + $0xbc0] sm:$0xff]  }
 0x4f7   : > { %11796 = vmatpush3.bf16.msra.mxu1 %v12627_v31  ;;  %11777 = vmatprep.subr.bf16.mxu0 %v12919_v38  ;;  %v3104_v31 = vld [vmem:[%s14445_s25 + $0x2e] sm:$0x1] }
 0x4f8   : > { %11797 = vmatprep.subr.bf16.mxu1 %v12919_v38 }
 0x4fa   : > { %11778 = vmatpush3.bf16.msra.mxu0 %v12628_v52  ;;  %v12662_v52 = vld [vmem:[%s13076_s24 + $0xc38] sm:$0xff]  }
 0x4fb   : > { %11798 = vmatpush3.bf16.msra.mxu1 %v12629_v24  ;;  %11803 = vmatprep.subr.bf16.mxu0 %v12919_v38  ;;  %v3105_v24 = vld [vmem:[%s14445_s25 + $0x2f] sm:$0x1] }
 0x4fc   : > { %11823 = vmatprep.subr.bf16.mxu1 %v12919_v38 }
 0x4fd   : > { %v6800_v15 = vpop.f32.mrf.mxu0  ;;  %11780 = vmatmul.mubr.bf16.vlgmr.msra.gmra.mxu0 %v3100_v30  ;;  %v12663_v30 = vld [vmem:[%s13076_s24 + $0xc78] sm:$0xff]  }
 0x4fe   : > { %v9419_v44 = vsel %vm9359_vm6, %v6800_v15, 0.0  ;;  %v6888_v61 = vpop.f32.mrf.mxu1  ;;  %11800 = vmatmul.mubr.bf16.vlgmr.msra.gmra.mxu1 %v3101_v26  ;;  %11804 = vmatpush3.bf16.msra.mxu0 %v12630_v45  ;;  %v12664_v15 = vld [vmem:[%s13076_s24 + $0xc30] sm:$0xff]  }
 0x4ff   : > { %v9420_v39 = vadd.f32 %v9419_v44, %v9418_v33  ;;  %v9421_v46 = vsel %vm9359_vm6, %v6888_v61, 0.0  ;;  %11824 = vmatpush3.bf16.msra.mxu1 %v12631_v62  ;;  %v11541_v29 = vpop.f32.mrf.mxu0  ;;  %11805 = vmatprep.subr.bf16.mxu0 %v12919_v38  ;;  %v12650_v33 = vld [vmem:[%s13076_s24 + $0xba8] sm:$0xff]  }
 0x500   : > { %v11561_v32 = vpop.f32.mrf.mxu1  ;;  %11825 = vmatprep.subr.bf16.mxu1 %v12919_v38  ;;  %11819 = vmatprep.mubr.msk.bf16.mxu0 %vm12920_vm5, %v12919_v38 }
 0x501   : > { %v9422_v36 = vadd.f32 %v9421_v46, %v9420_v39  ;;  %v6803_v14 = vpop.f32.mrf.mxu0  ;;  %11839 = vmatprep.mubr.msk.bf16.mxu1 %vm12920_vm5, %v12919_v38  ;;  %v12665_v39 = vld [vmem:[%s13076_s24 + $0xc70] sm:$0xff]  }
 0x502   : > { %v6891_v57 = vpop.f32.mrf.mxu1  ;;  %11806 = vmatpush3.bf16.msra.mxu0 %v12632_v50 }
 0x503   : > { %11826 = vmatpush3.bf16.msra.mxu1 %v12633_v10  ;;  %v11542_v49 = vpop.f32.mrf.mxu0  ;;  %11807 = vmatprep.subr.bf16.mxu0 %v12919_v38  ;;  %v12667_v57 = vld [vmem:[%s13076_s24 + $0xc68] sm:$0xff]  }
 0x504   : > { %v11562_v8 = vpop.f32.mrf.mxu1  ;;  %11827 = vmatprep.subr.bf16.mxu1 %v12919_v38  ;;  %v12668_v49 = vld [vmem:[%s13076_s24 + $0xc20] sm:$0xff]  }
 0x505   : > { %v12670_v8 = vld [vmem:[%s13076_s24 + $0xc18] sm:$0xff]  }
 0x506   : > { %11808 = vmatpush3.bf16.msra.mxu0 %v12634_v2 }
 0x507   : > { %11828 = vmatpush3.bf16.msra.mxu1 %v12635_v54  ;;  %11809 = vmatprep.subr.bf16.mxu0 %v12919_v38  ;;  %v12669_v54 = vld [vmem:[%s13076_s24 + $0xc60] sm:$0xff]  }
 0x508   : > { %11829 = vmatprep.subr.bf16.mxu1 %v12919_v38 }
 0x50a   : > { %11810 = vmatpush3.bf16.msra.mxu0 %v12636_v59  ;;  %v12671_v59 = vld [vmem:[%s13076_s24 + $0xc58] sm:$0xff]  }
 0x50b   : > { %11830 = vmatpush3.bf16.msra.mxu1 %v12637_v13  ;;  %11811 = vmatprep.subr.bf16.mxu0 %v12919_v38  ;;  %v12672_v13 = vld [vmem:[%s13076_s24 + $0xc10] sm:$0xff]  }
 0x50c   : > { %11831 = vmatprep.subr.bf16.mxu1 %v12919_v38 }
 0x50e   : > { %11812 = vmatpush3.bf16.msra.mxu0 %v12638_v6  ;;  %v12673_v6 = vld [vmem:[%s13076_s24 + $0xc50] sm:$0xff]  }
 0x50f   : > { %11832 = vmatpush3.bf16.msra.mxu1 %v12639_v37  ;;  %11813 = vmatprep.subr.bf16.mxu0 %v12919_v38  ;;  %v12674_v37 = vld [vmem:[%s13076_s24 + $0xc08] sm:$0xff]  }
 0x510   : > { %11833 = vmatprep.subr.bf16.mxu1 %v12919_v38 }
 0x512   : > { %11814 = vmatpush3.bf16.msra.mxu0 %v12640_v16  ;;  %v12675_v16 = vld [vmem:[%s13076_s24 + $0xc48] sm:$0xff]  }
 0x513   : > { %11834 = vmatpush3.bf16.msra.mxu1 %v12641_v21  ;;  %11815 = vmatprep.subr.bf16.mxu0 %v12919_v38  ;;  %v12676_v21 = vld [vmem:[%s13076_s24 + $0xc00] sm:$0xff]  }
 0x514   : > { %11835 = vmatprep.subr.bf16.mxu1 %v12919_v38 }
 0x516   : > { %11816 = vmatpush3.bf16.msra.mxu0 %v12642_v63  ;;  %v12677_v63 = vld [vmem:[%s13076_s24 + $0xc40] sm:$0xff]  }
 0x517   : > { %11836 = vmatpush3.bf16.msra.mxu1 %v12643_v41  ;;  %11817 = vmatprep.subr.bf16.mxu0 %v12919_v38  ;;  %v3106_v41 = vld [vmem:[%s14445_s25 + $0x30] sm:$0x1] }
 0x518   : > { %11837 = vmatprep.subr.bf16.mxu1 %v12919_v38 }
 0x51a   : > { %11818 = vmatpush3.bf16.msra.mxu0 %v12644_v51  ;;  %v12678_v51 = vld [vmem:[%s13076_s24 + $0xcb8] sm:$0xff]  }
 0x51b   : > { %11838 = vmatpush3.bf16.msra.mxu1 %v12645_v1  ;;  %11843 = vmatprep.subr.bf16.mxu0 %v12919_v38  ;;  %v3107_v1 = vld [vmem:[%s14445_s25 + $0x31] sm:$0x1] }
 0x51c   : > { %11863 = vmatprep.subr.bf16.mxu1 %v12919_v38 }
 0x51d   : > { %v6976_v53 = vpop.f32.mrf.mxu0  ;;  %11820 = vmatmul.mubr.bf16.vlgmr.msra.gmra.mxu0 %v3102_v12  ;;  %v12679_v12 = vld [vmem:[%s13076_s24 + $0xcf8] sm:$0xff]  }
 0x51e   : > { %v9423_v47 = vsel %vm9359_vm6, %v6976_v53, 0.0  ;;  %v7064_v55 = vpop.f32.mrf.mxu1  ;;  %11840 = vmatmul.mubr.bf16.vlgmr.msra.gmra.mxu1 %v3103_v9  ;;  %11844 = vmatpush3.bf16.msra.mxu0 %v12646_v3  ;;  %v12680_v53 = vld [vmem:[%s13076_s24 + $0xcb0] sm:$0xff]  }
 0x51f   : > { %v9424_v23 = vadd.f32 %v9423_v47, %v9422_v36  ;;  %v9425_v48 = vsel %vm9359_vm6, %v7064_v55, 0.0  ;;  %11864 = vmatpush3.bf16.msra.mxu1 %v12647_v22  ;;  %v11581_v18 = vpop.f32.mrf.mxu0  ;;  %11845 = vmatprep.subr.bf16.mxu0 %v12919_v38  ;;  %v12666_v36 = vld [vmem:[%s13076_s24 + $0xc28] sm:$0xff]  }
 0x520   : > { %v11601_v4 = vpop.f32.mrf.mxu1  ;;  %11865 = vmatprep.subr.bf16.mxu1 %v12919_v38  ;;  %11859 = vmatprep.mubr.msk.bf16.mxu0 %vm12920_vm5, %v12919_v38 }
 0x521   : > { %v9426_v56 = vadd.f32 %v9425_v48, %v9424_v23  ;;  %v6979_v7 = vpop.f32.mrf.mxu0  ;;  %11879 = vmatprep.mubr.msk.bf16.mxu1 %vm12920_vm5, %v12919_v38  ;;  %v12681_v23 = vld [vmem:[%s13076_s24 + $0xcf0] sm:$0xff]  }
 0x522   : > { %v7067_v28 = vpop.f32.mrf.mxu1  ;;  %11846 = vmatpush3.bf16.msra.mxu0 %v12648_v20 }
 0x523   : > { %11866 = vmatpush3.bf16.msra.mxu1 %v12649_v27  ;;  %v11582_v35 = vpop.f32.mrf.mxu0  ;;  %11847 = vmatprep.subr.bf16.mxu0 %v12919_v38  ;;  %v12683_v28 = vld [vmem:[%s13076_s24 + $0xce8] sm:$0xff]  }
 0x524   : > { %v11602_v17 = vpop.f32.mrf.mxu1  ;;  %11867 = vmatprep.subr.bf16.mxu1 %v12919_v38  ;;  %v12684_v35 = vld [vmem:[%s13076_s24 + $0xca0] sm:$0xff]  }
 0x525   : > { %v12686_v17 = vld [vmem:[%s13076_s24 + $0xc98] sm:$0xff]  }
 0x526   : > { %11848 = vmatpush3.bf16.msra.mxu0 %v12650_v33 }
 0x527   : > { %11868 = vmatpush3.bf16.msra.mxu1 %v12651_v40  ;;  %11849 = vmatprep.subr.bf16.mxu0 %v12919_v38  ;;  %v12685_v40 = vld [vmem:[%s13076_s24 + $0xce0] sm:$0xff]  }
 0x528   : > { %11869 = vmatprep.subr.bf16.mxu1 %v12919_v38 }
 0x52a   : > { %11850 = vmatpush3.bf16.msra.mxu0 %v12652_v58  ;;  %v12687_v58 = vld [vmem:[%s13076_s24 + $0xcd8] sm:$0xff]  }
 0x52b   : > { %11870 = vmatpush3.bf16.msra.mxu1 %v12653_v43  ;;  %11851 = vmatprep.subr.bf16.mxu0 %v12919_v38  ;;  %v12688_v43 = vld [vmem:[%s13076_s24 + $0xc90] sm:$0xff]  }
 0x52c   : > { %11871 = vmatprep.subr.bf16.mxu1 %v12919_v38 }
 0x52e   : > { %11852 = vmatpush3.bf16.msra.mxu0 %v12654_v5  ;;  %v12689_v5 = vld [vmem:[%s13076_s24 + $0xcd0] sm:$0xff]  }
 0x52f   : > { %11872 = vmatpush3.bf16.msra.mxu1 %v12655_v42  ;;  %11853 = vmatprep.subr.bf16.mxu0 %v12919_v38  ;;  %v12690_v42 = vld [vmem:[%s13076_s24 + $0xc88] sm:$0xff]  }
 0x530   : > { %11873 = vmatprep.subr.bf16.mxu1 %v12919_v38 }
 0x532   : > { %11854 = vmatpush3.bf16.msra.mxu0 %v12656_v25  ;;  %v12691_v25 = vld [vmem:[%s13076_s24 + $0xcc8] sm:$0xff]  }
 0x533   : > { %11874 = vmatpush3.bf16.msra.mxu1 %v12657_v34  ;;  %11855 = vmatprep.subr.bf16.mxu0 %v12919_v38  ;;  %v12692_v34 = vld [vmem:[%s13076_s24 + $0xc80] sm:$0xff]  }
 0x534   : > { %11875 = vmatprep.subr.bf16.mxu1 %v12919_v38 }
 0x536   : > { %11856 = vmatpush3.bf16.msra.mxu0 %v12658_v11  ;;  %v12693_v11 = vld [vmem:[%s13076_s24 + $0xcc0] sm:$0xff]  }
 0x537   : > { %11876 = vmatpush3.bf16.msra.mxu1 %v12659_v0  ;;  %11857 = vmatprep.subr.bf16.mxu0 %v12919_v38  ;;  %v3108_v0 = vld [vmem:[%s14445_s25 + $0x32] sm:$0x1] }
 0x538   : > { %11877 = vmatprep.subr.bf16.mxu1 %v12919_v38 }
 0x53a   : > { %11858 = vmatpush3.bf16.msra.mxu0 %v12660_v19  ;;  %v12694_v19 = vld [vmem:[%s13076_s24 + $0xd38] sm:$0xff]  }
 0x53b   : > { %11878 = vmatpush3.bf16.msra.mxu1 %v12661_v60  ;;  %11883 = vmatprep.subr.bf16.mxu0 %v12919_v38  ;;  %v3109_v60 = vld [vmem:[%s14445_s25 + $0x33] sm:$0x1] }
 0x53c   : > { %11903 = vmatprep.subr.bf16.mxu1 %v12919_v38 }
 0x53d   : > { %v7152_v45 = vpop.f32.mrf.mxu0  ;;  %11860 = vmatmul.mubr.bf16.vlgmr.msra.gmra.mxu0 %v3104_v31  ;;  %v12695_v31 = vld [vmem:[%s13076_s24 + $0xd78] sm:$0xff]  }
 0x53e   : > { %v9427_v26 = vsel %vm9359_vm6, %v7152_v45, 0.0  ;;  %v7240_v62 = vpop.f32.mrf.mxu1  ;;  %11880 = vmatmul.mubr.bf16.vlgmr.msra.gmra.mxu1 %v3105_v24  ;;  %11884 = vmatpush3.bf16.msra.mxu0 %v12662_v52  ;;  %v12696_v45 = vld [vmem:[%s13076_s24 + $0xd30] sm:$0xff]  }
 0x53f   : > { %v9428_v44 = vadd.f32 %v9427_v26, %v9426_v56  ;;  %v9429_v61 = vsel %vm9359_vm6, %v7240_v62, 0.0  ;;  %11904 = vmatpush3.bf16.msra.mxu1 %v12663_v30  ;;  %v11621_v50 = vpop.f32.mrf.mxu0  ;;  %11885 = vmatprep.subr.bf16.mxu0 %v12919_v38  ;;  %v12682_v56 = vld [vmem:[%s13076_s24 + $0xca8] sm:$0xff]  }
 0x540   : > { %v11641_v46 = vpop.f32.mrf.mxu1  ;;  %11905 = vmatprep.subr.bf16.mxu1 %v12919_v38  ;;  %11899 = vmatprep.mubr.msk.bf16.mxu0 %vm12920_vm5, %v12919_v38 }
 0x541   : > { %v9430_v29 = vadd.f32 %v9429_v61, %v9428_v44  ;;  %v7155_v10 = vpop.f32.mrf.mxu0  ;;  %11919 = vmatprep.mubr.msk.bf16.mxu1 %vm12920_vm5, %v12919_v38  ;;  %v12697_v44 = vld [vmem:[%s13076_s24 + $0xd70] sm:$0xff]  }
 0x542   : > { %v7243_v32 = vpop.f32.mrf.mxu1  ;;  %11886 = vmatpush3.bf16.msra.mxu0 %v12664_v15 }
 0x543   : > { %11906 = vmatpush3.bf16.msra.mxu1 %v12665_v39  ;;  %v11622_v14 = vpop.f32.mrf.mxu0  ;;  %11887 = vmatprep.subr.bf16.mxu0 %v12919_v38  ;;  %v12699_v32 = vld [vmem:[%s13076_s24 + $0xd68] sm:$0xff]  }
 0x544   : > { %v11642_v2 = vpop.f32.mrf.mxu1  ;;  %11907 = vmatprep.subr.bf16.mxu1 %v12919_v38  ;;  %v12700_v14 = vld [vmem:[%s13076_s24 + $0xd20] sm:$0xff]  }
 0x545   : > { %v12702_v2 = vld [vmem:[%s13076_s24 + $0xd18] sm:$0xff]  }
 0x546   : > { %11888 = vmatpush3.bf16.msra.mxu0 %v12666_v36 }
 0x547   : > { %11908 = vmatpush3.bf16.msra.mxu1 %v12667_v57  ;;  %11889 = vmatprep.subr.bf16.mxu0 %v12919_v38  ;;  %v12701_v57 = vld [vmem:[%s13076_s24 + $0xd60] sm:$0xff]  }
 0x548   : > { %11909 = vmatprep.subr.bf16.mxu1 %v12919_v38 }
 0x54a   : > { %11890 = vmatpush3.bf16.msra.mxu0 %v12668_v49  ;;  %v12703_v49 = vld [vmem:[%s13076_s24 + $0xd58] sm:$0xff]  }
 0x54b   : > { %11910 = vmatpush3.bf16.msra.mxu1 %v12669_v54  ;;  %11891 = vmatprep.subr.bf16.mxu0 %v12919_v38  ;;  %v12704_v54 = vld [vmem:[%s13076_s24 + $0xd10] sm:$0xff]  }
 0x54c   : > { %11911 = vmatprep.subr.bf16.mxu1 %v12919_v38 }
 0x54e   : > { %11892 = vmatpush3.bf16.msra.mxu0 %v12670_v8  ;;  %v12705_v8 = vld [vmem:[%s13076_s24 + $0xd50] sm:$0xff]  }
 0x54f   : > { %11912 = vmatpush3.bf16.msra.mxu1 %v12671_v59  ;;  %11893 = vmatprep.subr.bf16.mxu0 %v12919_v38  ;;  %v12706_v59 = vld [vmem:[%s13076_s24 + $0xd08] sm:$0xff]  }
 0x550   : > { %11913 = vmatprep.subr.bf16.mxu1 %v12919_v38 }
 0x552   : > { %11894 = vmatpush3.bf16.msra.mxu0 %v12672_v13  ;;  %v12707_v13 = vld [vmem:[%s13076_s24 + $0xd48] sm:$0xff]  }
 0x553   : > { %11914 = vmatpush3.bf16.msra.mxu1 %v12673_v6  ;;  %11895 = vmatprep.subr.bf16.mxu0 %v12919_v38  ;;  %v12708_v6 = vld [vmem:[%s13076_s24 + $0xd00] sm:$0xff]  }
 0x554   : > { %11915 = vmatprep.subr.bf16.mxu1 %v12919_v38 }
 0x556   : > { %11896 = vmatpush3.bf16.msra.mxu0 %v12674_v37  ;;  %v12709_v37 = vld [vmem:[%s13076_s24 + $0xd40] sm:$0xff]  }
 0x557   : > { %11916 = vmatpush3.bf16.msra.mxu1 %v12675_v16  ;;  %11897 = vmatprep.subr.bf16.mxu0 %v12919_v38  ;;  %v3110_v16 = vld [vmem:[%s14445_s25 + $0x34] sm:$0x1] }
 0x558   : > { %11917 = vmatprep.subr.bf16.mxu1 %v12919_v38 }
 0x55a   : > { %11898 = vmatpush3.bf16.msra.mxu0 %v12676_v21  ;;  %v12710_v21 = vld [vmem:[%s13076_s24 + $0xdb8] sm:$0xff]  }
 0x55b   : > { %11918 = vmatpush3.bf16.msra.mxu1 %v12677_v63  ;;  %11923 = vmatprep.subr.bf16.mxu0 %v12919_v38  ;;  %v3111_v63 = vld [vmem:[%s14445_s25 + $0x35] sm:$0x1] }
 0x55c   : > { %11943 = vmatprep.subr.bf16.mxu1 %v12919_v38 }
 0x55d   : > { %v7328_v3 = vpop.f32.mrf.mxu0  ;;  %11900 = vmatmul.mubr.bf16.vlgmr.msra.gmra.mxu0 %v3106_v41  ;;  %v12711_v41 = vld [vmem:[%s13076_s24 + $0xdf8] sm:$0xff]  }
 0x55e   : > { %v9431_v9 = vsel %vm9359_vm6, %v7328_v3, 0.0  ;;  %v7416_v22 = vpop.f32.mrf.mxu1  ;;  %11920 = vmatmul.mubr.bf16.vlgmr.msra.gmra.mxu1 %v3107_v1  ;;  %11924 = vmatpush3.bf16.msra.mxu0 %v12678_v51  ;;  %v12712_v3 = vld [vmem:[%s13076_s24 + $0xdb0] sm:$0xff]  }
 0x55f   : > { %v9432_v47 = vadd.f32 %v9431_v9, %v9430_v29  ;;  %v9433_v55 = vsel %vm9359_vm6, %v7416_v22, 0.0  ;;  %11944 = vmatpush3.bf16.msra.mxu1 %v12679_v12  ;;  %v11661_v20 = vpop.f32.mrf.mxu0  ;;  %11925 = vmatprep.subr.bf16.mxu0 %v12919_v38  ;;  %v12698_v29 = vld [vmem:[%s13076_s24 + $0xd28] sm:$0xff]  }
 0x560   : > { %v11681_v48 = vpop.f32.mrf.mxu1  ;;  %11945 = vmatprep.subr.bf16.mxu1 %v12919_v38  ;;  %11939 = vmatprep.mubr.msk.bf16.mxu0 %vm12920_vm5, %v12919_v38 }
 0x561   : > { %v9434_v18 = vadd.f32 %v9433_v55, %v9432_v47  ;;  %v7331_v27 = vpop.f32.mrf.mxu0  ;;  %11959 = vmatprep.mubr.msk.bf16.mxu1 %vm12920_vm5, %v12919_v38  ;;  %v12713_v47 = vld [vmem:[%s13076_s24 + $0xdf0] sm:$0xff]  }
 0x562   : > { %v7419_v4 = vpop.f32.mrf.mxu1  ;;  %11926 = vmatpush3.bf16.msra.mxu0 %v12680_v53 }
 0x563   : > { %11946 = vmatpush3.bf16.msra.mxu1 %v12681_v23  ;;  %v11662_v7 = vpop.f32.mrf.mxu0  ;;  %11927 = vmatprep.subr.bf16.mxu0 %v12919_v38  ;;  %v12715_v4 = vld [vmem:[%s13076_s24 + $0xde8] sm:$0xff]  }
 0x564   : > { %v11682_v33 = vpop.f32.mrf.mxu1  ;;  %11947 = vmatprep.subr.bf16.mxu1 %v12919_v38  ;;  %v12716_v7 = vld [vmem:[%s13076_s24 + $0xda0] sm:$0xff]  }
 0x565   : > { %v12718_v33 = vld [vmem:[%s13076_s24 + $0xd98] sm:$0xff]  }
 0x566   : > { %11928 = vmatpush3.bf16.msra.mxu0 %v12682_v56 }
 0x567   : > { %11948 = vmatpush3.bf16.msra.mxu1 %v12683_v28  ;;  %11929 = vmatprep.subr.bf16.mxu0 %v12919_v38  ;;  %v12717_v28 = vld [vmem:[%s13076_s24 + $0xde0] sm:$0xff]  }
 0x568   : > { %11949 = vmatprep.subr.bf16.mxu1 %v12919_v38 }
 0x56a   : > { %11930 = vmatpush3.bf16.msra.mxu0 %v12684_v35  ;;  %v12719_v35 = vld [vmem:[%s13076_s24 + $0xdd8] sm:$0xff]  }
 0x56b   : > { %11950 = vmatpush3.bf16.msra.mxu1 %v12685_v40  ;;  %11931 = vmatprep.subr.bf16.mxu0 %v12919_v38  ;;  %v12720_v40 = vld [vmem:[%s13076_s24 + $0xd90] sm:$0xff]  }
 0x56c   : > { %11951 = vmatprep.subr.bf16.mxu1 %v12919_v38 }
 0x56e   : > { %11932 = vmatpush3.bf16.msra.mxu0 %v12686_v17  ;;  %v12721_v17 = vld [vmem:[%s13076_s24 + $0xdd0] sm:$0xff]  }
 0x56f   : > { %11952 = vmatpush3.bf16.msra.mxu1 %v12687_v58  ;;  %11933 = vmatprep.subr.bf16.mxu0 %v12919_v38  ;;  %v12722_v58 = vld [vmem:[%s13076_s24 + $0xd88] sm:$0xff]  }
 0x570   : > { %11953 = vmatprep.subr.bf16.mxu1 %v12919_v38 }
 0x572   : > { %11934 = vmatpush3.bf16.msra.mxu0 %v12688_v43  ;;  %v12723_v43 = vld [vmem:[%s13076_s24 + $0xdc8] sm:$0xff]  }
 0x573   : > { %11954 = vmatpush3.bf16.msra.mxu1 %v12689_v5  ;;  %11935 = vmatprep.subr.bf16.mxu0 %v12919_v38  ;;  %v12724_v5 = vld [vmem:[%s13076_s24 + $0xd80] sm:$0xff]  }
 0x574   : > { %11955 = vmatprep.subr.bf16.mxu1 %v12919_v38 }
 0x576   : > { %11936 = vmatpush3.bf16.msra.mxu0 %v12690_v42  ;;  %v12725_v42 = vld [vmem:[%s13076_s24 + $0xdc0] sm:$0xff]  }
 0x577   : > { %11956 = vmatpush3.bf16.msra.mxu1 %v12691_v25  ;;  %11937 = vmatprep.subr.bf16.mxu0 %v12919_v38  ;;  %v3112_v25 = vld [vmem:[%s14445_s25 + $0x36] sm:$0x1] }
 0x578   : > { %11957 = vmatprep.subr.bf16.mxu1 %v12919_v38 }
 0x57a   : > { %11938 = vmatpush3.bf16.msra.mxu0 %v12692_v34  ;;  %v12726_v34 = vld [vmem:[%s13076_s24 + $0xe38] sm:$0xff]  }
 0x57b   : > { %11958 = vmatpush3.bf16.msra.mxu1 %v12693_v11  ;;  %11963 = vmatprep.subr.bf16.mxu0 %v12919_v38  ;;  %v3113_v11 = vld [vmem:[%s14445_s25 + $0x37] sm:$0x1] }
 0x57c   : > { %11983 = vmatprep.subr.bf16.mxu1 %v12919_v38 }
 0x57d   : > { %v7504_v52 = vpop.f32.mrf.mxu0  ;;  %11940 = vmatmul.mubr.bf16.vlgmr.msra.gmra.mxu0 %v3108_v0  ;;  %v12727_v0 = vld [vmem:[%s13076_s24 + $0xe78] sm:$0xff]  }
 0x57e   : > { %v9435_v24 = vsel %vm9359_vm6, %v7504_v52, 0.0  ;;  %v7592_v30 = vpop.f32.mrf.mxu1  ;;  %11960 = vmatmul.mubr.bf16.vlgmr.msra.gmra.mxu1 %v3109_v60  ;;  %11964 = vmatpush3.bf16.msra.mxu0 %v12694_v19  ;;  %v12728_v52 = vld [vmem:[%s13076_s24 + $0xe30] sm:$0xff]  }
 0x57f   : > { %v9436_v26 = vadd.f32 %v9435_v24, %v9434_v18  ;;  %v9437_v62 = vsel %vm9359_vm6, %v7592_v30, 0.0  ;;  %11984 = vmatpush3.bf16.msra.mxu1 %v12695_v31  ;;  %v11701_v15 = vpop.f32.mrf.mxu0  ;;  %11965 = vmatprep.subr.bf16.mxu0 %v12919_v38  ;;  %v12714_v18 = vld [vmem:[%s13076_s24 + $0xda8] sm:$0xff]  }
 0x580   : > { %v11721_v61 = vpop.f32.mrf.mxu1  ;;  %11985 = vmatprep.subr.bf16.mxu1 %v12919_v38  ;;  %11979 = vmatprep.mubr.msk.bf16.mxu0 %vm12920_vm5, %v12919_v38 }
 0x581   : > { %v9438_v50 = vadd.f32 %v9437_v62, %v9436_v26  ;;  %v7507_v39 = vpop.f32.mrf.mxu0  ;;  %11999 = vmatprep.mubr.msk.bf16.mxu1 %vm12920_vm5, %v12919_v38  ;;  %v12729_v26 = vld [vmem:[%s13076_s24 + $0xe70] sm:$0xff]  }
 0x582   : > { %v7595_v46 = vpop.f32.mrf.mxu1  ;;  %11966 = vmatpush3.bf16.msra.mxu0 %v12696_v45 }
 0x583   : > { %11986 = vmatpush3.bf16.msra.mxu1 %v12697_v44  ;;  %v11702_v10 = vpop.f32.mrf.mxu0  ;;  %11967 = vmatprep.subr.bf16.mxu0 %v12919_v38  ;;  %v12731_v46 = vld [vmem:[%s13076_s24 + $0xe68] sm:$0xff]  }
 0x584   : > { %v11722_v36 = vpop.f32.mrf.mxu1  ;;  %11987 = vmatprep.subr.bf16.mxu1 %v12919_v38  ;;  %v12732_v10 = vld [vmem:[%s13076_s24 + $0xe20] sm:$0xff]  }
 0x585   : > { %v12734_v36 = vld [vmem:[%s13076_s24 + $0xe18] sm:$0xff]  }
 0x586   : > { %11968 = vmatpush3.bf16.msra.mxu0 %v12698_v29 }
 0x587   : > { %11988 = vmatpush3.bf16.msra.mxu1 %v12699_v32  ;;  %11969 = vmatprep.subr.bf16.mxu0 %v12919_v38  ;;  %v12733_v32 = vld [vmem:[%s13076_s24 + $0xe60] sm:$0xff]  }
 0x588   : > { %11989 = vmatprep.subr.bf16.mxu1 %v12919_v38 }
 0x58a   : > { %11970 = vmatpush3.bf16.msra.mxu0 %v12700_v14  ;;  %v12735_v14 = vld [vmem:[%s13076_s24 + $0xe58] sm:$0xff]  }
 0x58b   : > { %11990 = vmatpush3.bf16.msra.mxu1 %v12701_v57  ;;  %11971 = vmatprep.subr.bf16.mxu0 %v12919_v38  ;;  %v12736_v57 = vld [vmem:[%s13076_s24 + $0xe10] sm:$0xff]  }
 0x58c   : > { %11991 = vmatprep.subr.bf16.mxu1 %v12919_v38 }
 0x58e   : > { %11972 = vmatpush3.bf16.msra.mxu0 %v12702_v2  ;;  %v12737_v2 = vld [vmem:[%s13076_s24 + $0xe50] sm:$0xff]  }
 0x58f   : > { %11992 = vmatpush3.bf16.msra.mxu1 %v12703_v49  ;;  %11973 = vmatprep.subr.bf16.mxu0 %v12919_v38  ;;  %v12738_v49 = vld [vmem:[%s13076_s24 + $0xe08] sm:$0xff]  }
 0x590   : > { %11993 = vmatprep.subr.bf16.mxu1 %v12919_v38 }
 0x592   : > { %11974 = vmatpush3.bf16.msra.mxu0 %v12704_v54  ;;  %v12739_v54 = vld [vmem:[%s13076_s24 + $0xe48] sm:$0xff]  }
 0x593   : > { %11994 = vmatpush3.bf16.msra.mxu1 %v12705_v8  ;;  %11975 = vmatprep.subr.bf16.mxu0 %v12919_v38  ;;  %v12740_v8 = vld [vmem:[%s13076_s24 + $0xe00] sm:$0xff]  }
 0x594   : > { %11995 = vmatprep.subr.bf16.mxu1 %v12919_v38 }
 0x596   : > { %11976 = vmatpush3.bf16.msra.mxu0 %v12706_v59  ;;  %v12741_v59 = vld [vmem:[%s13076_s24 + $0xe40] sm:$0xff]  }
 0x597   : > { %11996 = vmatpush3.bf16.msra.mxu1 %v12707_v13  ;;  %11977 = vmatprep.subr.bf16.mxu0 %v12919_v38  ;;  %v3114_v13 = vld [vmem:[%s14445_s25 + $0x38] sm:$0x1] }
 0x598   : > { %11997 = vmatprep.subr.bf16.mxu1 %v12919_v38 }
 0x59a   : > { %11978 = vmatpush3.bf16.msra.mxu0 %v12708_v6  ;;  %v12742_v6 = vld [vmem:[%s13076_s24 + $0xeb8] sm:$0xff]  }
 0x59b   : > { %11998 = vmatpush3.bf16.msra.mxu1 %v12709_v37  ;;  %12003 = vmatprep.subr.bf16.mxu0 %v12919_v38  ;;  %v3115_v37 = vld [vmem:[%s14445_s25 + $0x39] sm:$0x1] }
 0x59c   : > { %12023 = vmatprep.subr.bf16.mxu1 %v12919_v38 }
 0x59d   : > { %v7680_v51 = vpop.f32.mrf.mxu0  ;;  %11980 = vmatmul.mubr.bf16.vlgmr.msra.gmra.mxu0 %v3110_v16  ;;  %v12743_v16 = vld [vmem:[%s13076_s24 + $0xef8] sm:$0xff]  }
 0x59e   : > { %v9439_v1 = vsel %vm9359_vm6, %v7680_v51, 0.0  ;;  %v7768_v12 = vpop.f32.mrf.mxu1  ;;  %12000 = vmatmul.mubr.bf16.vlgmr.msra.gmra.mxu1 %v3111_v63  ;;  %12004 = vmatpush3.bf16.msra.mxu0 %v12710_v21  ;;  %v12744_v51 = vld [vmem:[%s13076_s24 + $0xeb0] sm:$0xff]  }
 0x59f   : > { %v9440_v9 = vadd.f32 %v9439_v1, %v9438_v50  ;;  %v9441_v22 = vsel %vm9359_vm6, %v7768_v12, 0.0  ;;  %12024 = vmatpush3.bf16.msra.mxu1 %v12711_v41  ;;  %v11741_v53 = vpop.f32.mrf.mxu0  ;;  %12005 = vmatprep.subr.bf16.mxu0 %v12919_v38  ;;  %v12730_v50 = vld [vmem:[%s13076_s24 + $0xe28] sm:$0xff]  }
 0x5a0   : > { %v11761_v55 = vpop.f32.mrf.mxu1  ;;  %12025 = vmatprep.subr.bf16.mxu1 %v12919_v38  ;;  %12019 = vmatprep.mubr.msk.bf16.mxu0 %vm12920_vm5, %v12919_v38 }
 0x5a1   : > { %v9442_v20 = vadd.f32 %v9441_v22, %v9440_v9  ;;  %v7683_v23 = vpop.f32.mrf.mxu0  ;;  %12039 = vmatprep.mubr.msk.bf16.mxu1 %vm12920_vm5, %v12919_v38  ;;  %v12745_v9 = vld [vmem:[%s13076_s24 + $0xef0] sm:$0xff]  }
 0x5a2   : > { %v7771_v48 = vpop.f32.mrf.mxu1  ;;  %12006 = vmatpush3.bf16.msra.mxu0 %v12712_v3 }
 0x5a3   : > { %12026 = vmatpush3.bf16.msra.mxu1 %v12713_v47  ;;  %v11742_v27 = vpop.f32.mrf.mxu0  ;;  %12007 = vmatprep.subr.bf16.mxu0 %v12919_v38  ;;  %v12747_v48 = vld [vmem:[%s13076_s24 + $0xee8] sm:$0xff]  }
 0x5a4   : > { %v11762_v56 = vpop.f32.mrf.mxu1  ;;  %12027 = vmatprep.subr.bf16.mxu1 %v12919_v38  ;;  %v12748_v27 = vld [vmem:[%s13076_s24 + $0xea0] sm:$0xff]  }
 0x5a5   : > { %v12750_v56 = vld [vmem:[%s13076_s24 + $0xe98] sm:$0xff]  }
 0x5a6   : > { %12008 = vmatpush3.bf16.msra.mxu0 %v12714_v18 }
 0x5a7   : > { %12028 = vmatpush3.bf16.msra.mxu1 %v12715_v4  ;;  %12009 = vmatprep.subr.bf16.mxu0 %v12919_v38  ;;  %v12749_v4 = vld [vmem:[%s13076_s24 + $0xee0] sm:$0xff]  }
 0x5a8   : > { %12029 = vmatprep.subr.bf16.mxu1 %v12919_v38 }
 0x5aa   : > { %12010 = vmatpush3.bf16.msra.mxu0 %v12716_v7  ;;  %v12751_v7 = vld [vmem:[%s13076_s24 + $0xed8] sm:$0xff]  }
 0x5ab   : > { %12030 = vmatpush3.bf16.msra.mxu1 %v12717_v28  ;;  %12011 = vmatprep.subr.bf16.mxu0 %v12919_v38  ;;  %v12752_v28 = vld [vmem:[%s13076_s24 + $0xe90] sm:$0xff]  }
 0x5ac   : > { %12031 = vmatprep.subr.bf16.mxu1 %v12919_v38 }
 0x5ae   : > { %12012 = vmatpush3.bf16.msra.mxu0 %v12718_v33  ;;  %v12753_v33 = vld [vmem:[%s13076_s24 + $0xed0] sm:$0xff]  }
 0x5af   : > { %12032 = vmatpush3.bf16.msra.mxu1 %v12719_v35  ;;  %12013 = vmatprep.subr.bf16.mxu0 %v12919_v38  ;;  %v12754_v35 = vld [vmem:[%s13076_s24 + $0xe88] sm:$0xff]  }
 0x5b0   : > { %12033 = vmatprep.subr.bf16.mxu1 %v12919_v38 }
 0x5b2   : > { %12014 = vmatpush3.bf16.msra.mxu0 %v12720_v40  ;;  %v12755_v40 = vld [vmem:[%s13076_s24 + $0xec8] sm:$0xff]  }
 0x5b3   : > { %12034 = vmatpush3.bf16.msra.mxu1 %v12721_v17  ;;  %12015 = vmatprep.subr.bf16.mxu0 %v12919_v38  ;;  %v12756_v17 = vld [vmem:[%s13076_s24 + $0xe80] sm:$0xff]  }
 0x5b4   : > { %12035 = vmatprep.subr.bf16.mxu1 %v12919_v38 }
 0x5b6   : > { %12016 = vmatpush3.bf16.msra.mxu0 %v12722_v58  ;;  %v12757_v58 = vld [vmem:[%s13076_s24 + $0xec0] sm:$0xff]  }
 0x5b7   : > { %12036 = vmatpush3.bf16.msra.mxu1 %v12723_v43  ;;  %12017 = vmatprep.subr.bf16.mxu0 %v12919_v38  ;;  %v3116_v43 = vld [vmem:[%s14445_s25 + $0x3a] sm:$0x1] }
 0x5b8   : > { %12037 = vmatprep.subr.bf16.mxu1 %v12919_v38 }
 0x5ba   : > { %12018 = vmatpush3.bf16.msra.mxu0 %v12724_v5  ;;  %v3117_v5 = vld [vmem:[%s14445_s25 + $0x3b] sm:$0x1] }
 0x5bb   : > { %12038 = vmatpush3.bf16.msra.mxu1 %v12725_v42  ;;  %12043 = vmatprep.subr.bf16.mxu0 %v12919_v38 }
 0x5bc   : > { %12063 = vmatprep.subr.bf16.mxu1 %v12919_v38 }
 0x5bd   : > { %v7856_v19 = vpop.f32.mrf.mxu0  ;;  %12020 = vmatmul.mubr.bf16.vlgmr.msra.gmra.mxu0 %v3112_v25 }
 0x5be   : > { %v9443_v60 = vsel %vm9359_vm6, %v7856_v19, 0.0  ;;  %v7944_v31 = vpop.f32.mrf.mxu1  ;;  %12040 = vmatmul.mubr.bf16.vlgmr.msra.gmra.mxu1 %v3113_v11  ;;  %12044 = vmatpush3.bf16.msra.mxu0 %v12726_v34 }
 0x5bf   : > { %v9444_v24 = vadd.f32 %v9443_v60, %v9442_v20  ;;  %v9445_v30 = vsel %vm9359_vm6, %v7944_v31, 0.0  ;;  %12064 = vmatpush3.bf16.msra.mxu1 %v12727_v0  ;;  %v11781_v45 = vpop.f32.mrf.mxu0  ;;  %12045 = vmatprep.subr.bf16.mxu0 %v12919_v38  ;;  %v12746_v20 = vld [vmem:[%s13076_s24 + $0xea8] sm:$0xff]  }
 0x5c0   : > { %v11801_v62 = vpop.f32.mrf.mxu1  ;;  %12065 = vmatprep.subr.bf16.mxu1 %v12919_v38  ;;  %12059 = vmatprep.mubr.msk.bf16.mxu0 %vm12920_vm5, %v12919_v38 }
 0x5c1   : > { %v9446_v15 = vadd.f32 %v9445_v30, %v9444_v24  ;;  %v7859_v44 = vpop.f32.mrf.mxu0  ;;  %12079 = vmatprep.mubr.msk.bf16.mxu1 %vm12920_vm5, %v12919_v38 }
 0x5c2   : > { %v7947_v61 = vpop.f32.mrf.mxu1  ;;  %12046 = vmatpush3.bf16.msra.mxu0 %v12728_v52 }
 0x5c3   : > { %12066 = vmatpush3.bf16.msra.mxu1 %v12729_v26  ;;  %v11782_v39 = vpop.f32.mrf.mxu0  ;;  %12047 = vmatprep.subr.bf16.mxu0 %v12919_v38 }
 0x5c4   : > { %v11802_v29 = vpop.f32.mrf.mxu1  ;;  %12067 = vmatprep.subr.bf16.mxu1 %v12919_v38 }
 0x5c6   : > { %12048 = vmatpush3.bf16.msra.mxu0 %v12730_v50 }
 0x5c7   : > { %12068 = vmatpush3.bf16.msra.mxu1 %v12731_v46  ;;  %12049 = vmatprep.subr.bf16.mxu0 %v12919_v38 }
 0x5c8   : > { %12069 = vmatprep.subr.bf16.mxu1 %v12919_v38 }
 0x5ca   : > { %12050 = vmatpush3.bf16.msra.mxu0 %v12732_v10 }
 0x5cb   : > { %12070 = vmatpush3.bf16.msra.mxu1 %v12733_v32  ;;  %12051 = vmatprep.subr.bf16.mxu0 %v12919_v38 }
 0x5cc   : > { %12071 = vmatprep.subr.bf16.mxu1 %v12919_v38 }
 0x5ce   : > { %12052 = vmatpush3.bf16.msra.mxu0 %v12734_v36 }
 0x5cf   : > { %12072 = vmatpush3.bf16.msra.mxu1 %v12735_v14  ;;  %12053 = vmatprep.subr.bf16.mxu0 %v12919_v38 }
 0x5d0   : > { %12073 = vmatprep.subr.bf16.mxu1 %v12919_v38 }
 0x5d2   : > { %12054 = vmatpush3.bf16.msra.mxu0 %v12736_v57 }
 0x5d3   : > { %12074 = vmatpush3.bf16.msra.mxu1 %v12737_v2  ;;  %12055 = vmatprep.subr.bf16.mxu0 %v12919_v38 }
 0x5d4   : > { %12075 = vmatprep.subr.bf16.mxu1 %v12919_v38 }
 0x5d6   : > { %12056 = vmatpush3.bf16.msra.mxu0 %v12738_v49 }
 0x5d7   : > { %12076 = vmatpush3.bf16.msra.mxu1 %v12739_v54  ;;  %12057 = vmatprep.subr.bf16.mxu0 %v12919_v38 }
 0x5d8   : > { %12077 = vmatprep.subr.bf16.mxu1 %v12919_v38 }
 0x5da   : > { %12058 = vmatpush3.bf16.msra.mxu0 %v12740_v8 }
 0x5db   : > { %12078 = vmatpush3.bf16.msra.mxu1 %v12741_v59  ;;  %12083 = vmatprep.subr.bf16.mxu0 %v12919_v38 }
 0x5dc   : > { %12103 = vmatprep.subr.bf16.mxu1 %v12919_v38 }
 0x5dd   : > { %v8032_v21 = vpop.f32.mrf.mxu0  ;;  %12060 = vmatmul.mubr.bf16.vlgmr.msra.gmra.mxu0 %v3114_v13 }
 0x5de   : > { %v9447_v63 = vsel %vm9359_vm6, %v8032_v21, 0.0  ;;  %v8120_v41 = vpop.f32.mrf.mxu1  ;;  %12080 = vmatmul.mubr.bf16.vlgmr.msra.gmra.mxu1 %v3115_v37  ;;  %12084 = vmatpush3.bf16.msra.mxu0 %v12742_v6 }
 0x5df   : > { %v9448_v1 = vadd.f32 %v9447_v63, %v9446_v15  ;;  %v9449_v12 = vsel %vm9359_vm6, %v8120_v41, 0.0  ;;  %12104 = vmatpush3.bf16.msra.mxu1 %v12743_v16  ;;  %v11821_v3 = vpop.f32.mrf.mxu0  ;;  %12085 = vmatprep.subr.bf16.mxu0 %v12919_v38 }
 0x5e0   : > { %v11841_v22 = vpop.f32.mrf.mxu1  ;;  %12105 = vmatprep.subr.bf16.mxu1 %v12919_v38  ;;  %12099 = vmatprep.mubr.msk.bf16.mxu0 %vm12920_vm5, %v12919_v38 }
 0x5e1   : > { %v9450_v53 = vadd.f32 %v9449_v12, %v9448_v1  ;;  %v8035_v47 = vpop.f32.mrf.mxu0  ;;  %12119 = vmatprep.mubr.msk.bf16.mxu1 %vm12920_vm5, %v12919_v38 }
 0x5e2   : > { %v8123_v55 = vpop.f32.mrf.mxu1  ;;  %12086 = vmatpush3.bf16.msra.mxu0 %v12744_v51 }
 0x5e3   : > { %12106 = vmatpush3.bf16.msra.mxu1 %v12745_v9  ;;  %v11822_v23 = vpop.f32.mrf.mxu0  ;;  %12087 = vmatprep.subr.bf16.mxu0 %v12919_v38 }
 0x5e4   : > { %v11842_v18 = vpop.f32.mrf.mxu1  ;;  %12107 = vmatprep.subr.bf16.mxu1 %v12919_v38 }
 0x5e6   : > { %12088 = vmatpush3.bf16.msra.mxu0 %v12746_v20 }
 0x5e7   : > { %12108 = vmatpush3.bf16.msra.mxu1 %v12747_v48  ;;  %12089 = vmatprep.subr.bf16.mxu0 %v12919_v38 }
 0x5e8   : > { %12109 = vmatprep.subr.bf16.mxu1 %v12919_v38 }
 0x5ea   : > { %12090 = vmatpush3.bf16.msra.mxu0 %v12748_v27 }
 0x5eb   : > { %12110 = vmatpush3.bf16.msra.mxu1 %v12749_v4  ;;  %12091 = vmatprep.subr.bf16.mxu0 %v12919_v38 }
 0x5ec   : > { %12111 = vmatprep.subr.bf16.mxu1 %v12919_v38 }
 0x5ee   : > { %12092 = vmatpush3.bf16.msra.mxu0 %v12750_v56 }
 0x5ef   : > { %12112 = vmatpush3.bf16.msra.mxu1 %v12751_v7  ;;  %12093 = vmatprep.subr.bf16.mxu0 %v12919_v38 }
 0x5f0   : > { %12113 = vmatprep.subr.bf16.mxu1 %v12919_v38 }
 0x5f2   : > { %12094 = vmatpush3.bf16.msra.mxu0 %v12752_v28 }
 0x5f3   : > { %12114 = vmatpush3.bf16.msra.mxu1 %v12753_v33  ;;  %12095 = vmatprep.subr.bf16.mxu0 %v12919_v38 }
 0x5f4   : > { %12115 = vmatprep.subr.bf16.mxu1 %v12919_v38 }
 0x5f6   : > { %12096 = vmatpush3.bf16.msra.mxu0 %v12754_v35 }
 0x5f7   : > { %12116 = vmatpush3.bf16.msra.mxu1 %v12755_v40  ;;  %12097 = vmatprep.subr.bf16.mxu0 %v12919_v38 }
 0x5f8   : > { %12117 = vmatprep.subr.bf16.mxu1 %v12919_v38 }
 0x5fa   : > { %12098 = vmatpush3.bf16.msra.mxu0 %v12756_v17 }
 0x5fb   : > { %12118 = vmatpush3.bf16.msra.mxu1 %v12757_v58 }
 0x5fd   : > { %v8208_v42 = vpop.f32.mrf.mxu0  ;;  %12100 = vmatmul.mubr.bf16.vlgmr.msra.gmra.mxu0 %v3116_v43 }
 0x5fe   : > { %v9451_v25 = vsel %vm9359_vm6, %v8208_v42, 0.0  ;;  %v8296_v34 = vpop.f32.mrf.mxu1  ;;  %12120 = vmatmul.mubr.bf16.vlgmr.msra.gmra.mxu1 %v3117_v5 }
 0x5ff   : > { %v9452_v11 = vadd.f32 %v9451_v25, %v9450_v53  ;;  %v9453_v0 = vsel %vm9359_vm6, %v8296_v34, 0.0  ;;  %v11861_v19 = vpop.f32.mrf.mxu0 }
 0x600   : > { %v11881_v60 = vpop.f32.mrf.mxu1 }
 0x601   : > { %v9454_v31 = vadd.f32 %v9453_v0, %v9452_v11  ;;  %v8211_v52 = vpop.f32.mrf.mxu0 }
 0x602   : > { %v8299_v24 = vpop.f32.mrf.mxu1 }
 0x603   : > { %v11862_v30 = vpop.f32.mrf.mxu0 }
 0x604   : > { %v11882_v38 = vpop.f32.mrf.mxu1 }
 0x61d   : > { %v8384_v45 = vpop.f32.mrf.mxu0 }
 0x61e   : > { %v9455_v26 = vsel %vm9359_vm6, %v8384_v45, 0.0  ;;  %v8472_v62 = vpop.f32.mrf.mxu1 }
 0x61f   : > { %v9456_v15 = vadd.f32 %v9455_v26, %v9454_v31  ;;  %v9457_v44 = vsel %vm9359_vm6, %v8472_v62, 0.0  ;;  %v11901_v61 = vpop.f32.mrf.mxu0 }
 0x620   : > { %v11921_v50 = vpop.f32.mrf.mxu1 }
 0x621   : > { %v9458_v39 = vadd.f32 %v9457_v44, %v9456_v15  ;;  %v8387_v46 = vpop.f32.mrf.mxu0  ;;  %v9358_v15 = vld [vmem:[#allocation9] sm:$0x3] }
 0x622   : > { %v8475_v29 = vpop.f32.mrf.mxu1 }
 0x623   : > { %v11902_v10 = vpop.f32.mrf.mxu0 }
 0x624   : > { %v11922_v32 = vpop.f32.mrf.mxu1 }
 0x63d   : > { %v8560_v36 = vpop.f32.mrf.mxu0 }
 0x63e   : > { %v9459_v14 = vsel %vm9359_vm6, %v8560_v36, 0.0  ;;  %v8648_v57 = vpop.f32.mrf.mxu1 }
 0x63f   : > { %v9460_v2 = vadd.f32 %v9459_v14, %v9458_v39  ;;  %v9461_v49 = vsel %vm9359_vm6, %v8648_v57, 0.0  ;;  %v11941_v54 = vpop.f32.mrf.mxu0 }
 0x640   : > { %v11961_v8 = vpop.f32.mrf.mxu1 }
 0x641   : > { %v9462_v59 = vadd.f32 %v9461_v49, %v9460_v2  ;;  %v8563_v13 = vpop.f32.mrf.mxu0 }
 0x642   : > { %v8651_v6 = vpop.f32.mrf.mxu1 }
 0x643   : > { %v11942_v37 = vpop.f32.mrf.mxu0 }
 0x644   : > { %v11962_v16 = vpop.f32.mrf.mxu1 }
 0x65d   : > { %v8736_v21 = vpop.f32.mrf.mxu0 }
 0x65e   : > { %v9463_v63 = vsel %vm9359_vm6, %v8736_v21, 0.0  ;;  %v8824_v41 = vpop.f32.mrf.mxu1 }
 0x65f   : > { %v9464_v51 = vadd.f32 %v9463_v63, %v9462_v59  ;;  %v9465_v1 = vsel %vm9359_vm6, %v8824_v41, 0.0  ;;  %v11981_v12 = vpop.f32.mrf.mxu0 }
 0x660   : > { %v12001_v3 = vpop.f32.mrf.mxu1 }
 0x661   : > { %v9466_v9 = vadd.f32 %v9465_v1, %v9464_v51  ;;  %v8739_v22 = vpop.f32.mrf.mxu0 }
 0x662   : > { %v8827_v53 = vpop.f32.mrf.mxu1 }
 0x663   : > { %v11982_v47 = vpop.f32.mrf.mxu0 }
 0x664   : > { %v12002_v55 = vpop.f32.mrf.mxu1 }
 0x67d   : > { %v8912_v20 = vpop.f32.mrf.mxu0 }
 0x67e   : > { %v9000_v23 = vpop.f32.mrf.mxu1  ;;  %v9467_v42 = vsel %vm9359_vm6, %v8912_v20, 0.0 }
 0x67f   : > { %v12021_v48 = vpop.f32.mrf.mxu0  ;;  %v9468_v25 = vadd.f32 %v9467_v42, %v9466_v9  ;;  %v9469_v34 = vsel %vm9359_vm6, %v9000_v23, 0.0 }
 0x680   : > { %v12041_v18 = vpop.f32.mrf.mxu1 }
 0x681   : > { %v8915_v27 = vpop.f32.mrf.mxu0  ;;  %v9470_v0 = vadd.f32 %v9469_v34, %v9468_v25 }
 0x682   : > { %v9003_v4 = vpop.f32.mrf.mxu1 }
 0x683   : > { %v12022_v56 = vpop.f32.mrf.mxu0 }
 0x684   : > { %v12042_v7 = vpop.f32.mrf.mxu1 }
 0x69d   : > { %v9088_v28 = vpop.f32.mrf.mxu0 }
 0x69e   : > { %v9176_v33 = vpop.f32.mrf.mxu1  ;;  %v9471_v11 = vsel %vm9359_vm6, %v9088_v28, 0.0 }
 0x69f   : > { %v12061_v35 = vpop.f32.mrf.mxu0  ;;  %v9472_v19 = vadd.f32 %v9471_v11, %v9470_v0  ;;  %v9473_v60 = vsel %vm9359_vm6, %v9176_v33, 0.0 }
 0x6a0   : > { %v12081_v40 = vpop.f32.mrf.mxu1 }
 0x6a1   : > { %v9091_v17 = vpop.f32.mrf.mxu0  ;;  %v9474_v31 = vadd.f32 %v9473_v60, %v9472_v19 }
 0x6a2   : > { %v9179_v58 = vpop.f32.mrf.mxu1 }
 0x6a3   : > { %v12062_v43 = vpop.f32.mrf.mxu0 }
 0x6a4   : > { %v12082_v5 = vpop.f32.mrf.mxu1 }
 0x6bd   : > { %v9264_v52 = vpop.f32.mrf.mxu0 }
 0x6be   : > { %v9475_v24 = vsel %vm9359_vm6, %v9264_v52, 0.0  ;;  %v9352_v30 = vpop.f32.mrf.mxu1 }
 0x6bf   : > { %v9476_v38 = vadd.f32 %v9475_v24, %v9474_v31  ;;  %v9477_v45 = vsel %vm9359_vm6, %v9352_v30, 0.0  ;;  %v12101_v26 = vpop.f32.mrf.mxu0 }
 0x6c0   : > { %v12121_v62 = vpop.f32.mrf.mxu1 }
 0x6c1   : > { %v9478_v44 = vadd.f32 %v9477_v45, %v9476_v38  ;;  %v9267_v61 = vpop.f32.mrf.mxu0 }
 0x6c2   : > { %v9355_v50 = vpop.f32.mrf.mxu1 }
 0x6c3   : > { %v12102_v39 = vpop.f32.mrf.mxu0  ;;  %v9479_v46 = vadd.f32 %v9478_v44, %v9358_v15 }
 0x6c4   : > { %v12122_v29 = vpop.f32.mrf.mxu1 }
 0x6c5   : > { %9480 = vst [vmem:[#allocation9] sm:$0x3] %v9479_v46 }
 0x6c6   : > { %12851 = shalt.err (!%p12848_p1)
}
 0x6c7   : > { %12136 = dma.vmem_to_hbm [thread:$0]  (%p12155_p2), %s9489_s29, 32, %s15639_s3, [#allocation5]  }
 0x6c8   : > { %12891 = dma.done.wait (%p12155_p2), [#allocation5], 32  }
 0x6c9   : > { %12893 = vsyncadd (%p12155_p2), [#allocation5], 4294967264 }
 0x6ca PF: > { %p13_p11 = scmp.ge.s32.totalorder %s12964_s17, 4   ;;  %s15688_s12 = smov %s12900_s13 }
 0x6cb   : > { %s15689_s13 = smov %s12904_s14  ;;  %s15690_s14 = smov %s12974_s20 }
 0x6cc   : > { %s15691_s15 = smov %s12964_s17  ;;  %15 = sbr.rel (!%p13_p11) target bundleno = 4 (0x4), region = 82 }
 0x6d1   :  { %9501 = vsyncpa [#allocation4], 1 }
 0x6d2   :  { %9503 = vsyncpa [#allocation4 + $0x1], 1 }
 0x6d3   :  { %9504 = vsyncpa [#allocation7], 1 }
 0x6d4   :  { %9505 = vsyncpa [#allocation5], 1 }
 0x6d5   :  { %9507 = vsyncpa [#allocation5 + $0x1], 1 }

</bundles_post_ra>
